<compile_context>
chip_gen: v5e
topology: v5e:2x2
jax: 0.10.0
libtpu: 0.0.40
codegen_flags: <defaults>
</compile_context>

<pallas_src>
import jax
import jax.numpy as jnp
from jax.experimental import pallas as pl
from jax.experimental.pallas import tpu as pltpu

H, W = 28, 28
CO = 32                       # conv output channels
OH, OW = 26, 26               # conv output spatial (valid 3x3, stride 1)
PH, PW = 13, 13               # after 2x2/2 maxpool
NUM_CLASSES = 47
HIDDEN = 512

N_SPLIT = 2                   # hidden split -> "parallel" grid axis (2 TCs on v7x)
H_SPLIT = HIDDEN // N_SPLIT   # 256
K_STEPS = 2                   # fc1 K tiling (feature chunks of 22*128 = 2816)
S_TILE = 22                   # 128-lane packed-feature rows per K step
S_TOTAL = K_STEPS * S_TILE    # 44 rows -> 5632 padded features (5408 real)
K_PAD = S_TOTAL * 128         # 5632
ROWS_PAD = 4 * S_TOTAL        # 176 pooled positions (169 real, rest hit zero w1 rows)


# --------------------------- fused kernel ---------------------------
def fused_kernel(a_ref, wblk_ref, scale_ref, shift_ref, w1_ref, b1_ref, w2_ref,
                 o_ref, pooled_ref, acc_ref):
    k = pl.program_id(1)

    @pl.when(k == 0)
    def _():
        acc_ref[...] = jnp.zeros_like(acc_ref)
        # conv (packed 4-positions-per-row matmul) + BN + 2x2 maxpool + ReLU, kept in VMEM
        for hf in range(K_STEPS):
            z = None
            for q in range(4):                                   # the 4 pool candidates
                c = jnp.dot(a_ref[q * K_STEPS + hf], wblk_ref[...],
                            preferred_element_type=jnp.float32)  # (22, 128)
                c = c * scale_ref[...] + shift_ref[...]          # BN (+ conv bias folded)
                z = c if z is None else jnp.maximum(z, c)
            pooled_ref[hf] = jnp.maximum(z, 0.0)                 # ReLU after max (BN before max)

    # fc1: this step's (22 x 128) packed features against the matching (2816, H_SPLIT) w1 slab
    v = pooled_ref[k].astype(jnp.bfloat16)                       # (22, 128)
    part = jnp.zeros((8, H_SPLIT), jnp.float32)
    for s in range(S_TILE):
        row = jnp.broadcast_to(v[s:s + 1, :], (8, 128))          # 8 identical rows (MXU-friendly)
        part = part + jnp.dot(row, w1_ref[s * 128:(s + 1) * 128, :],
                              preferred_element_type=jnp.float32)     # (8, H_SPLIT)
    acc_ref[...] += part

    @pl.when(k == pl.num_programs(1) - 1)
    def _():
        h = jnp.maximum(acc_ref[...] + b1_ref[...], 0.0)         # (8, H_SPLIT), rows identical
        o_ref[0] = jnp.dot(h, w2_ref[...],
                           preferred_element_type=jnp.float32)   # (8, 128) partial logits


# --------------------------- wrapper ---------------------------
def simple_block_forward(x, params):
    # TODO(synk): the optional `transform` callable from __init__ is identity here (None in the module).
    x2d = x[0, 0]                                                # (28, 28); batch must be 1

    # glue (tiny, pure XLA): pool-candidate-grouped im2col patches, 4 pooled positions per row
    cand = []
    for di in range(2):
        for dj in range(2):
            taps = []
            for kh in range(3):
                for kw in range(3):
                    sl = x2d[di + kh:di + kh + 25:2, dj + kw:dj + kw + 25:2]   # (13, 13)
                    taps.append(sl.reshape(-1))
            aq = jnp.stack(taps, axis=1)                         # (169, 9)
            aq = jnp.pad(aq, ((0, ROWS_PAD - 169), (0, 16 - 9))) # (176, 16)
            cand.append(aq.reshape(K_STEPS, S_TILE, 64))         # 4 positions packed per 64 lanes
    a = jnp.stack(cand, axis=0).reshape(4 * K_STEPS, S_TILE, 64) # (8, 22, 64)

    # conv weights as a block-diagonal (64, 128): 4 copies of (16 taps, 32 ch) on the diagonal
    w9 = params['conv_w'].reshape(CO, 9).T                       # (9, 32)
    w9 = jnp.pad(w9, ((0, 16 - 9), (0, 0)))                      # (16, 32)
    wblk = jnp.kron(jnp.eye(4, dtype=w9.dtype), w9)              # (64, 128)

    # eval-mode BN (+ conv bias) folded to per-channel scale/shift, tiled over the 4 lane groups
    inv = params['bn_gamma'] / jnp.sqrt(params['bn_var'] + 1e-5)
    scale_t = jnp.tile(inv, 4).reshape(1, 128)
    shift_t = jnp.tile((params['conv_b'] - params['bn_mean']) * inv + params['bn_beta'],
                       4).reshape(1, 128)

    # fc1 weight: torch flat index c*169+hw  ->  packed index hw*32+c; zero rows for the pads; bf16
    w1 = params['fc1_w'].reshape(HIDDEN, CO, PH * PW).transpose(2, 1, 0)   # (169, 32, 512)
    w1 = jnp.pad(w1, ((0, ROWS_PAD - 169), (0, 0), (0, 0)))
    w1 = w1.reshape(K_PAD, HIDDEN).astype(jnp.bfloat16)                    # (5632, 512) bf16
    b1 = params['fc1_b'].reshape(1, HIDDEN)

    w2 = jnp.pad(params['fc2_w'].T, ((0, 0), (0, 128 - NUM_CLASSES)))      # (512, 128) f32

    out = pl.pallas_call(
        fused_kernel,
        out_shape=jax.ShapeDtypeStruct((N_SPLIT, 8, 128), jnp.float32),
        grid_spec=pltpu.PrefetchScalarGridSpec(
            num_scalar_prefetch=0,
            grid=(N_SPLIT, K_STEPS),
            in_specs=[
                pl.BlockSpec((4 * K_STEPS, S_TILE, 64), lambda n, k: (0, 0, 0)),  # patches
                pl.BlockSpec((64, 128), lambda n, k: (0, 0)),                     # conv weights
                pl.BlockSpec((1, 128), lambda n, k: (0, 0)),                      # BN scale
                pl.BlockSpec((1, 128), lambda n, k: (0, 0)),                      # BN shift
                pl.BlockSpec((S_TILE * 128, H_SPLIT), lambda n, k: (k, n)),       # w1 slab (bf16)
                pl.BlockSpec((1, H_SPLIT), lambda n, k: (0, n)),                  # b1 slab
                pl.BlockSpec((H_SPLIT, 128), lambda n, k: (n, 0)),                # w2 slab
            ],
            out_specs=pl.BlockSpec((1, 8, 128), lambda n, k: (n, 0, 0)),
            scratch_shapes=[pltpu.VMEM((K_STEPS, S_TILE, 128), jnp.float32),      # pooled acts
                            pltpu.VMEM((8, H_SPLIT), jnp.float32)],               # fc1 accumulator
        ),
        compiler_params=pltpu.CompilerParams(
            dimension_semantics=("parallel", "arbitrary")),
        cost_estimate=pl.CostEstimate(flops=10_000_000, transcendentals=0,
                                      bytes_accessed=6_300_000),
    )(a, wblk, scale_t, shift_t, w1, b1, w2)

    # sum the two hidden-split partial logit vectors, add fc2 bias, drop lane padding
    logits = out[:, 0, :].sum(axis=0)[:NUM_CLASSES] + params['fc2_b']
    return logits                                                # (47,)  == torch output


# --------------------------- pure-JAX reference ---------------------------
def reference_forward(x, params):
    conv = jax.lax.conv_general_dilated(
        x, params['conv_w'], window_strides=(1, 1), padding='VALID',
        dimension_numbers=('NCHW', 'OIHW', 'NCHW'))              # (1, 32, 26, 26)
    conv = conv + params['conv_b'][None, :, None, None]
    inv = params['bn_gamma'] / jnp.sqrt(params['bn_var'] + 1e-5)
    bn = (conv - params['bn_mean'][None, :, None, None]) * inv[None, :, None, None] \
        + params['bn_beta'][None, :, None, None]
    act = jnp.maximum(bn, 0.0)
    pooled = jax.lax.reduce_window(act, -jnp.inf, jax.lax.max,
                                   (1, 1, 2, 2), (1, 1, 2, 2), 'VALID')   # (1, 32, 13, 13)
    flat = pooled.reshape(-1)                                    # torch.flatten order
    h = jnp.maximum(flat @ params['fc1_w'].T + params['fc1_b'], 0.0)
    return h @ params['fc2_w'].T + params['fc2_b']               # (47,)


if __name__ == "__main__":
    key = jax.random.PRNGKey(0)
    ks = jax.random.split(key, 11)
    params = dict(
        conv_w=0.2 * jax.random.normal(ks[0], (CO, 1, 3, 3), jnp.float32),
        conv_b=0.1 * jax.random.normal(ks[1], (CO,), jnp.float32),
        bn_gamma=1.0 + 0.1 * jax.random.normal(ks[2], (CO,), jnp.float32),
        bn_beta=0.1 * jax.random.normal(ks[3], (CO,), jnp.float32),
        bn_mean=0.1 * jax.random.normal(ks[4], (CO,), jnp.float32),
        bn_var=1.0 + 0.1 * jax.random.uniform(ks[5], (CO,), jnp.float32),
        fc1_w=0.02 * jax.random.normal(ks[6], (HIDDEN, CO * PH * PW), jnp.float32),
        fc1_b=0.05 * jax.random.normal(ks[7], (HIDDEN,), jnp.float32),
        fc2_w=0.05 * jax.random.normal(ks[8], (NUM_CLASSES, HIDDEN), jnp.float32),
        fc2_b=0.05 * jax.random.normal(ks[9], (NUM_CLASSES,), jnp.float32),
    )
    x = jax.random.normal(ks[10], (1, 1, H, W), jnp.float32)

    out = jax.jit(simple_block_forward)(x, params)
    out = jax.block_until_ready(out)
    assert out.shape == (NUM_CLASSES,)

    ref = reference_forward(x, params)
    err = float(jnp.max(jnp.abs(out - ref)))
    # tolerance accounts for the bf16 fc1 weights/activations (fp32 accumulation)
    if err > 3e-2:
        raise AssertionError(f"mismatch vs reference, max abs err = {err}")

    print("KERNEL_OK")
</pallas_src>

<mosaic_0001>
module attributes {stable_mosaic.version = 11 : i64} {
  func.func @fused_kernel(%arg0: i32, %arg1: i32, %arg2: memref<8x22x64xf32, #tpu.memory_space<vmem>>, %arg3: memref<64x128xf32, #tpu.memory_space<vmem>>, %arg4: memref<1x128xf32, #tpu.memory_space<vmem>>, %arg5: memref<1x128xf32, #tpu.memory_space<vmem>>, %arg6: memref<2816x256xbf16, #tpu.memory_space<vmem>>, %arg7: memref<1x256xf32, #tpu.memory_space<vmem>>, %arg8: memref<256x128xf32, #tpu.memory_space<vmem>>, %arg9: memref<1x8x128xf32, #tpu.memory_space<vmem>>, %arg10: memref<2x22x128xf32, #tpu.memory_space<vmem>>, %arg11: memref<8x256xf32, #tpu.memory_space<vmem>>) attributes {dimension_semantics = [#tpu.dimension_semantics<parallel>, #tpu.dimension_semantics<arbitrary>], iteration_bounds = array<i64: 2, 2>, scalar_prefetch = 0 : i64, scratch_operands = 2 : i64, tpu.core_type = #tpu.core_type<tc>, window_params = [{pipeline_mode = #tpu.pipeline_mode<synchronous>, transform_indices = @transform_0, window_bounds = array<i64: 8, 22, 64>}, {pipeline_mode = #tpu.pipeline_mode<synchronous>, transform_indices = @transform_1, window_bounds = array<i64: 64, 128>}, {pipeline_mode = #tpu.pipeline_mode<synchronous>, transform_indices = @transform_2, window_bounds = array<i64: 1, 128>}, {pipeline_mode = #tpu.pipeline_mode<synchronous>, transform_indices = @transform_3, window_bounds = array<i64: 1, 128>}, {transform_indices = @transform_4, window_bounds = array<i64: 2816, 256>}, {transform_indices = @transform_5, window_bounds = array<i64: 1, 256>}, {transform_indices = @transform_6, window_bounds = array<i64: 256, 128>}, {transform_indices = @transform_7, window_bounds = array<i64: 1, 8, 128>}]} {
    %c0_i32 = arith.constant 0 : i32
    %0 = arith.cmpi eq, %arg1, %c0_i32 : i32
    %1 = arith.extui %0 : i1 to i32
    %c0_i32_0 = arith.constant 0 : i32
    %2 = arith.cmpi ne, %1, %c0_i32_0 : i32
    scf.if %2 {
      %cst_52 = arith.constant 0.000000e+00 : f32
      %146 = vector.broadcast %cst_52 : f32 to vector<8x256xf32>
      %c0_53 = arith.constant 0 : index
      %c0_54 = arith.constant 0 : index
      %147 = vector.load %arg11[%c0_53, %c0_54] : memref<8x256xf32, #tpu.memory_space<vmem>>, vector<8x256xf32>
      tpu.vector_store %arg11[%c0_53, %c0_54], %146 {strides = array<i32>} : memref<8x256xf32, #tpu.memory_space<vmem>>, vector<8x256xf32>,
      %c0_55 = arith.constant 0 : index
      %c0_56 = arith.constant 0 : index
      %c0_57 = arith.constant 0 : index
      %148 = vector.load %arg2[%c0_55, %c0_56, %c0_57] : memref<8x22x64xf32, #tpu.memory_space<vmem>>, vector<1x22x64xf32>
      %149 = vector.shape_cast %148 : vector<1x22x64xf32> to vector<22x64xf32>
      %c0_58 = arith.constant 0 : index
      %c0_59 = arith.constant 0 : index
      %150 = vector.load %arg3[%c0_58, %c0_59] : memref<64x128xf32, #tpu.memory_space<vmem>>, vector<64x128xf32>
      %cst_60 = arith.constant dense<0.000000e+00> : vector<22x128xf32>
      %151 = tpu.matmul %149, %150, %cst_60 {dimension_numbers = #tpu.dot_dimension_numbers<[1], [0], [0], [1], [0, 0, 1, 1], [], []>} : vector<22x64xf32>, vector<64x128xf32>, vector<22x128xf32> -> vector<22x128xf32>
      %c0_61 = arith.constant 0 : index
      %c0_62 = arith.constant 0 : index
      %152 = vector.load %arg4[%c0_61, %c0_62] : memref<1x128xf32, #tpu.memory_space<vmem>>, vector<1x128xf32>
      %153 = vector.broadcast %152 : vector<1x128xf32> to vector<22x128xf32>
      %154 = arith.mulf %151, %153 : vector<22x128xf32>
      %c0_63 = arith.constant 0 : index
      %c0_64 = arith.constant 0 : index
      %155 = vector.load %arg5[%c0_63, %c0_64] : memref<1x128xf32, #tpu.memory_space<vmem>>, vector<1x128xf32>
      %156 = vector.broadcast %155 : vector<1x128xf32> to vector<22x128xf32>
      %157 = arith.addf %154, %156 : vector<22x128xf32>
      %c2 = arith.constant 2 : index
      %c0_65 = arith.constant 0 : index
      %c0_66 = arith.constant 0 : index
      %158 = vector.load %arg2[%c2, %c0_65, %c0_66] : memref<8x22x64xf32, #tpu.memory_space<vmem>>, vector<1x22x64xf32>
      %159 = vector.shape_cast %158 : vector<1x22x64xf32> to vector<22x64xf32>
      %c0_67 = arith.constant 0 : index
      %c0_68 = arith.constant 0 : index
      %160 = vector.load %arg3[%c0_67, %c0_68] : memref<64x128xf32, #tpu.memory_space<vmem>>, vector<64x128xf32>
      %cst_69 = arith.constant dense<0.000000e+00> : vector<22x128xf32>
      %161 = tpu.matmul %159, %160, %cst_69 {dimension_numbers = #tpu.dot_dimension_numbers<[1], [0], [0], [1], [0, 0, 1, 1], [], []>} : vector<22x64xf32>, vector<64x128xf32>, vector<22x128xf32> -> vector<22x128xf32>
      %c0_70 = arith.constant 0 : index
      %c0_71 = arith.constant 0 : index
      %162 = vector.load %arg4[%c0_70, %c0_71] : memref<1x128xf32, #tpu.memory_space<vmem>>, vector<1x128xf32>
      %163 = vector.broadcast %162 : vector<1x128xf32> to vector<22x128xf32>
      %164 = arith.mulf %161, %163 : vector<22x128xf32>
      %c0_72 = arith.constant 0 : index
      %c0_73 = arith.constant 0 : index
      %165 = vector.load %arg5[%c0_72, %c0_73] : memref<1x128xf32, #tpu.memory_space<vmem>>, vector<1x128xf32>
      %166 = vector.broadcast %165 : vector<1x128xf32> to vector<22x128xf32>
      %167 = arith.addf %164, %166 : vector<22x128xf32>
      %168 = arith.maximumf %157, %167 : vector<22x128xf32>
      %c4 = arith.constant 4 : index
      %c0_74 = arith.constant 0 : index
      %c0_75 = arith.constant 0 : index
      %169 = vector.load %arg2[%c4, %c0_74, %c0_75] : memref<8x22x64xf32, #tpu.memory_space<vmem>>, vector<1x22x64xf32>
      %170 = vector.shape_cast %169 : vector<1x22x64xf32> to vector<22x64xf32>
      %c0_76 = arith.constant 0 : index
      %c0_77 = arith.constant 0 : index
      %171 = vector.load %arg3[%c0_76, %c0_77] : memref<64x128xf32, #tpu.memory_space<vmem>>, vector<64x128xf32>
      %cst_78 = arith.constant dense<0.000000e+00> : vector<22x128xf32>
      %172 = tpu.matmul %170, %171, %cst_78 {dimension_numbers = #tpu.dot_dimension_numbers<[1], [0], [0], [1], [0, 0, 1, 1], [], []>} : vector<22x64xf32>, vector<64x128xf32>, vector<22x128xf32> -> vector<22x128xf32>
      %c0_79 = arith.constant 0 : index
      %c0_80 = arith.constant 0 : index
      %173 = vector.load %arg4[%c0_79, %c0_80] : memref<1x128xf32, #tpu.memory_space<vmem>>, vector<1x128xf32>
      %174 = vector.broadcast %173 : vector<1x128xf32> to vector<22x128xf32>
      %175 = arith.mulf %172, %174 : vector<22x128xf32>
      %c0_81 = arith.constant 0 : index
      %c0_82 = arith.constant 0 : index
      %176 = vector.load %arg5[%c0_81, %c0_82] : memref<1x128xf32, #tpu.memory_space<vmem>>, vector<1x128xf32>
      %177 = vector.broadcast %176 : vector<1x128xf32> to vector<22x128xf32>
      %178 = arith.addf %175, %177 : vector<22x128xf32>
      %179 = arith.maximumf %168, %178 : vector<22x128xf32>
      %c6 = arith.constant 6 : index
      %c0_83 = arith.constant 0 : index
      %c0_84 = arith.constant 0 : index
      %180 = vector.load %arg2[%c6, %c0_83, %c0_84] : memref<8x22x64xf32, #tpu.memory_space<vmem>>, vector<1x22x64xf32>
      %181 = vector.shape_cast %180 : vector<1x22x64xf32> to vector<22x64xf32>
      %c0_85 = arith.constant 0 : index
      %c0_86 = arith.constant 0 : index
      %182 = vector.load %arg3[%c0_85, %c0_86] : memref<64x128xf32, #tpu.memory_space<vmem>>, vector<64x128xf32>
      %cst_87 = arith.constant dense<0.000000e+00> : vector<22x128xf32>
      %183 = tpu.matmul %181, %182, %cst_87 {dimension_numbers = #tpu.dot_dimension_numbers<[1], [0], [0], [1], [0, 0, 1, 1], [], []>} : vector<22x64xf32>, vector<64x128xf32>, vector<22x128xf32> -> vector<22x128xf32>
      %c0_88 = arith.constant 0 : index
      %c0_89 = arith.constant 0 : index
      %184 = vector.load %arg4[%c0_88, %c0_89] : memref<1x128xf32, #tpu.memory_space<vmem>>, vector<1x128xf32>
      %185 = vector.broadcast %184 : vector<1x128xf32> to vector<22x128xf32>
      %186 = arith.mulf %183, %185 : vector<22x128xf32>
      %c0_90 = arith.constant 0 : index
      %c0_91 = arith.constant 0 : index
      %187 = vector.load %arg5[%c0_90, %c0_91] : memref<1x128xf32, #tpu.memory_space<vmem>>, vector<1x128xf32>
      %188 = vector.broadcast %187 : vector<1x128xf32> to vector<22x128xf32>
      %189 = arith.addf %186, %188 : vector<22x128xf32>
      %190 = arith.maximumf %179, %189 : vector<22x128xf32>
      %cst_92 = arith.constant 0.000000e+00 : f32
      %191 = vector.broadcast %cst_92 : f32 to vector<22x128xf32>
      %192 = arith.maximumf %190, %191 : vector<22x128xf32>
      %c0_93 = arith.constant 0 : index
      %c0_94 = arith.constant 0 : index
      %c0_95 = arith.constant 0 : index
      %193 = vector.load %arg10[%c0_93, %c0_94, %c0_95] : memref<2x22x128xf32, #tpu.memory_space<vmem>>, vector<1x22x128xf32>
      %194 = vector.shape_cast %193 : vector<1x22x128xf32> to vector<22x128xf32>
      %195 = vector.shape_cast %192 : vector<22x128xf32> to vector<1x22x128xf32>
      tpu.vector_store %arg10[%c0_93, %c0_94, %c0_95], %195 {strides = array<i32>} : memref<2x22x128xf32, #tpu.memory_space<vmem>>, vector<1x22x128xf32>,
      %c1 = arith.constant 1 : index
      %c0_96 = arith.constant 0 : index
      %c0_97 = arith.constant 0 : index
      %196 = vector.load %arg2[%c1, %c0_96, %c0_97] : memref<8x22x64xf32, #tpu.memory_space<vmem>>, vector<1x22x64xf32>
      %197 = vector.shape_cast %196 : vector<1x22x64xf32> to vector<22x64xf32>
      %c0_98 = arith.constant 0 : index
      %c0_99 = arith.constant 0 : index
      %198 = vector.load %arg3[%c0_98, %c0_99] : memref<64x128xf32, #tpu.memory_space<vmem>>, vector<64x128xf32>
      %cst_100 = arith.constant dense<0.000000e+00> : vector<22x128xf32>
      %199 = tpu.matmul %197, %198, %cst_100 {dimension_numbers = #tpu.dot_dimension_numbers<[1], [0], [0], [1], [0, 0, 1, 1], [], []>} : vector<22x64xf32>, vector<64x128xf32>, vector<22x128xf32> -> vector<22x128xf32>
      %c0_101 = arith.constant 0 : index
      %c0_102 = arith.constant 0 : index
      %200 = vector.load %arg4[%c0_101, %c0_102] : memref<1x128xf32, #tpu.memory_space<vmem>>, vector<1x128xf32>
      %201 = vector.broadcast %200 : vector<1x128xf32> to vector<22x128xf32>
      %202 = arith.mulf %199, %201 : vector<22x128xf32>
      %c0_103 = arith.constant 0 : index
      %c0_104 = arith.constant 0 : index
      %203 = vector.load %arg5[%c0_103, %c0_104] : memref<1x128xf32, #tpu.memory_space<vmem>>, vector<1x128xf32>
      %204 = vector.broadcast %203 : vector<1x128xf32> to vector<22x128xf32>
      %205 = arith.addf %202, %204 : vector<22x128xf32>
      %c3 = arith.constant 3 : index
      %c0_105 = arith.constant 0 : index
      %c0_106 = arith.constant 0 : index
      %206 = vector.load %arg2[%c3, %c0_105, %c0_106] : memref<8x22x64xf32, #tpu.memory_space<vmem>>, vector<1x22x64xf32>
      %207 = vector.shape_cast %206 : vector<1x22x64xf32> to vector<22x64xf32>
      %c0_107 = arith.constant 0 : index
      %c0_108 = arith.constant 0 : index
      %208 = vector.load %arg3[%c0_107, %c0_108] : memref<64x128xf32, #tpu.memory_space<vmem>>, vector<64x128xf32>
      %cst_109 = arith.constant dense<0.000000e+00> : vector<22x128xf32>
      %209 = tpu.matmul %207, %208, %cst_109 {dimension_numbers = #tpu.dot_dimension_numbers<[1], [0], [0], [1], [0, 0, 1, 1], [], []>} : vector<22x64xf32>, vector<64x128xf32>, vector<22x128xf32> -> vector<22x128xf32>
      %c0_110 = arith.constant 0 : index
      %c0_111 = arith.constant 0 : index
      %210 = vector.load %arg4[%c0_110, %c0_111] : memref<1x128xf32, #tpu.memory_space<vmem>>, vector<1x128xf32>
      %211 = vector.broadcast %210 : vector<1x128xf32> to vector<22x128xf32>
      %212 = arith.mulf %209, %211 : vector<22x128xf32>
      %c0_112 = arith.constant 0 : index
      %c0_113 = arith.constant 0 : index
      %213 = vector.load %arg5[%c0_112, %c0_113] : memref<1x128xf32, #tpu.memory_space<vmem>>, vector<1x128xf32>
      %214 = vector.broadcast %213 : vector<1x128xf32> to vector<22x128xf32>
      %215 = arith.addf %212, %214 : vector<22x128xf32>
      %216 = arith.maximumf %205, %215 : vector<22x128xf32>
      %c5 = arith.constant 5 : index
      %c0_114 = arith.constant 0 : index
      %c0_115 = arith.constant 0 : index
      %217 = vector.load %arg2[%c5, %c0_114, %c0_115] : memref<8x22x64xf32, #tpu.memory_space<vmem>>, vector<1x22x64xf32>
      %218 = vector.shape_cast %217 : vector<1x22x64xf32> to vector<22x64xf32>
      %c0_116 = arith.constant 0 : index
      %c0_117 = arith.constant 0 : index
      %219 = vector.load %arg3[%c0_116, %c0_117] : memref<64x128xf32, #tpu.memory_space<vmem>>, vector<64x128xf32>
      %cst_118 = arith.constant dense<0.000000e+00> : vector<22x128xf32>
      %220 = tpu.matmul %218, %219, %cst_118 {dimension_numbers = #tpu.dot_dimension_numbers<[1], [0], [0], [1], [0, 0, 1, 1], [], []>} : vector<22x64xf32>, vector<64x128xf32>, vector<22x128xf32> -> vector<22x128xf32>
      %c0_119 = arith.constant 0 : index
      %c0_120 = arith.constant 0 : index
      %221 = vector.load %arg4[%c0_119, %c0_120] : memref<1x128xf32, #tpu.memory_space<vmem>>, vector<1x128xf32>
      %222 = vector.broadcast %221 : vector<1x128xf32> to vector<22x128xf32>
      %223 = arith.mulf %220, %222 : vector<22x128xf32>
      %c0_121 = arith.constant 0 : index
      %c0_122 = arith.constant 0 : index
      %224 = vector.load %arg5[%c0_121, %c0_122] : memref<1x128xf32, #tpu.memory_space<vmem>>, vector<1x128xf32>
      %225 = vector.broadcast %224 : vector<1x128xf32> to vector<22x128xf32>
      %226 = arith.addf %223, %225 : vector<22x128xf32>
      %227 = arith.maximumf %216, %226 : vector<22x128xf32>
      %c7 = arith.constant 7 : index
      %c0_123 = arith.constant 0 : index
      %c0_124 = arith.constant 0 : index
      %228 = vector.load %arg2[%c7, %c0_123, %c0_124] : memref<8x22x64xf32, #tpu.memory_space<vmem>>, vector<1x22x64xf32>
      %229 = vector.shape_cast %228 : vector<1x22x64xf32> to vector<22x64xf32>
      %c0_125 = arith.constant 0 : index
      %c0_126 = arith.constant 0 : index
      %230 = vector.load %arg3[%c0_125, %c0_126] : memref<64x128xf32, #tpu.memory_space<vmem>>, vector<64x128xf32>
      %cst_127 = arith.constant dense<0.000000e+00> : vector<22x128xf32>
      %231 = tpu.matmul %229, %230, %cst_127 {dimension_numbers = #tpu.dot_dimension_numbers<[1], [0], [0], [1], [0, 0, 1, 1], [], []>} : vector<22x64xf32>, vector<64x128xf32>, vector<22x128xf32> -> vector<22x128xf32>
      %c0_128 = arith.constant 0 : index
      %c0_129 = arith.constant 0 : index
      %232 = vector.load %arg4[%c0_128, %c0_129] : memref<1x128xf32, #tpu.memory_space<vmem>>, vector<1x128xf32>
      %233 = vector.broadcast %232 : vector<1x128xf32> to vector<22x128xf32>
      %234 = arith.mulf %231, %233 : vector<22x128xf32>
      %c0_130 = arith.constant 0 : index
      %c0_131 = arith.constant 0 : index
      %235 = vector.load %arg5[%c0_130, %c0_131] : memref<1x128xf32, #tpu.memory_space<vmem>>, vector<1x128xf32>
      %236 = vector.broadcast %235 : vector<1x128xf32> to vector<22x128xf32>
      %237 = arith.addf %234, %236 : vector<22x128xf32>
      %238 = arith.maximumf %227, %237 : vector<22x128xf32>
      %cst_132 = arith.constant 0.000000e+00 : f32
      %239 = vector.broadcast %cst_132 : f32 to vector<22x128xf32>
      %240 = arith.maximumf %238, %239 : vector<22x128xf32>
      %c1_133 = arith.constant 1 : index
      %c0_134 = arith.constant 0 : index
      %c0_135 = arith.constant 0 : index
      %241 = vector.load %arg10[%c1_133, %c0_134, %c0_135] : memref<2x22x128xf32, #tpu.memory_space<vmem>>, vector<1x22x128xf32>
      %242 = vector.shape_cast %241 : vector<1x22x128xf32> to vector<22x128xf32>
      %243 = vector.shape_cast %240 : vector<22x128xf32> to vector<1x22x128xf32>
      tpu.vector_store %arg10[%c1_133, %c0_134, %c0_135], %243 {strides = array<i32>} : memref<2x22x128xf32, #tpu.memory_space<vmem>>, vector<1x22x128xf32>,
    } else {
    }
    %3 = arith.index_cast %arg1 : i32 to index
    %c0 = arith.constant 0 : index
    %c0_1 = arith.constant 0 : index
    %4 = vector.load %arg10[%3, %c0, %c0_1] : memref<2x22x128xf32, #tpu.memory_space<vmem>>, vector<1x22x128xf32>
    %5 = vector.shape_cast %4 : vector<1x22x128xf32> to vector<22x128xf32>
    %6 = arith.truncf %5 : vector<22x128xf32> to vector<22x128xbf16>
    %cst = arith.constant 0.000000e+00 : f32
    %7 = vector.broadcast %cst : f32 to vector<8x256xf32>
    %8 = vector.extract_strided_slice %6 {offsets = [0, 0], sizes = [1, 128], strides = [1, 1]} : vector<22x128xbf16> to vector<1x128xbf16>
    %9 = vector.shape_cast %8 : vector<1x128xbf16> to vector<1x128xbf16>
    %10 = vector.broadcast %9 : vector<1x128xbf16> to vector<8x128xbf16>
    %c0_2 = arith.constant 0 : index
    %c0_3 = arith.constant 0 : index
    %11 = vector.load %arg6[%c0_2, %c0_3] : memref<2816x256xbf16, #tpu.memory_space<vmem>>, vector<128x256xbf16>
    %cst_4 = arith.constant dense<0.000000e+00> : vector<8x256xf32>
    %12 = tpu.matmul %10, %11, %cst_4 {dimension_numbers = #tpu.dot_dimension_numbers<[1], [0], [0], [1], [0, 0, 1, 1], [], []>} : vector<8x128xbf16>, vector<128x256xbf16>, vector<8x256xf32> -> vector<8x256xf32>
    %13 = arith.addf %7, %12 : vector<8x256xf32>
    %14 = vector.extract_strided_slice %6 {offsets = [1, 0], sizes = [1, 128], strides = [1, 1]} : vector<22x128xbf16> to vector<1x128xbf16>
    %15 = vector.shape_cast %14 : vector<1x128xbf16> to vector<1x128xbf16>
    %16 = vector.broadcast %15 : vector<1x128xbf16> to vector<8x128xbf16>
    %c128 = arith.constant 128 : index
    %c0_5 = arith.constant 0 : index
    %17 = vector.load %arg6[%c128, %c0_5] : memref<2816x256xbf16, #tpu.memory_space<vmem>>, vector<128x256xbf16>
    %cst_6 = arith.constant dense<0.000000e+00> : vector<8x256xf32>
    %18 = tpu.matmul %16, %17, %cst_6 {dimension_numbers = #tpu.dot_dimension_numbers<[1], [0], [0], [1], [0, 0, 1, 1], [], []>} : vector<8x128xbf16>, vector<128x256xbf16>, vector<8x256xf32> -> vector<8x256xf32>
    %19 = arith.addf %13, %18 : vector<8x256xf32>
    %20 = vector.extract_strided_slice %6 {offsets = [2, 0], sizes = [1, 128], strides = [1, 1]} : vector<22x128xbf16> to vector<1x128xbf16>
    %21 = vector.shape_cast %20 : vector<1x128xbf16> to vector<1x128xbf16>
    %22 = vector.broadcast %21 : vector<1x128xbf16> to vector<8x128xbf16>
    %c256 = arith.constant 256 : index
    %c0_7 = arith.constant 0 : index
    %23 = vector.load %arg6[%c256, %c0_7] : memref<2816x256xbf16, #tpu.memory_space<vmem>>, vector<128x256xbf16>
    %cst_8 = arith.constant dense<0.000000e+00> : vector<8x256xf32>
    %24 = tpu.matmul %22, %23, %cst_8 {dimension_numbers = #tpu.dot_dimension_numbers<[1], [0], [0], [1], [0, 0, 1, 1], [], []>} : vector<8x128xbf16>, vector<128x256xbf16>, vector<8x256xf32> -> vector<8x256xf32>
    %25 = arith.addf %19, %24 : vector<8x256xf32>
    %26 = vector.extract_strided_slice %6 {offsets = [3, 0], sizes = [1, 128], strides = [1, 1]} : vector<22x128xbf16> to vector<1x128xbf16>
    %27 = vector.shape_cast %26 : vector<1x128xbf16> to vector<1x128xbf16>
    %28 = vector.broadcast %27 : vector<1x128xbf16> to vector<8x128xbf16>
    %c384 = arith.constant 384 : index
    %c0_9 = arith.constant 0 : index
    %29 = vector.load %arg6[%c384, %c0_9] : memref<2816x256xbf16, #tpu.memory_space<vmem>>, vector<128x256xbf16>
    %cst_10 = arith.constant dense<0.000000e+00> : vector<8x256xf32>
    %30 = tpu.matmul %28, %29, %cst_10 {dimension_numbers = #tpu.dot_dimension_numbers<[1], [0], [0], [1], [0, 0, 1, 1], [], []>} : vector<8x128xbf16>, vector<128x256xbf16>, vector<8x256xf32> -> vector<8x256xf32>
    %31 = arith.addf %25, %30 : vector<8x256xf32>
    %32 = vector.extract_strided_slice %6 {offsets = [4, 0], sizes = [1, 128], strides = [1, 1]} : vector<22x128xbf16> to vector<1x128xbf16>
    %33 = vector.shape_cast %32 : vector<1x128xbf16> to vector<1x128xbf16>
    %34 = vector.broadcast %33 : vector<1x128xbf16> to vector<8x128xbf16>
    %c512 = arith.constant 512 : index
    %c0_11 = arith.constant 0 : index
    %35 = vector.load %arg6[%c512, %c0_11] : memref<2816x256xbf16, #tpu.memory_space<vmem>>, vector<128x256xbf16>
    %cst_12 = arith.constant dense<0.000000e+00> : vector<8x256xf32>
    %36 = tpu.matmul %34, %35, %cst_12 {dimension_numbers = #tpu.dot_dimension_numbers<[1], [0], [0], [1], [0, 0, 1, 1], [], []>} : vector<8x128xbf16>, vector<128x256xbf16>, vector<8x256xf32> -> vector<8x256xf32>
    %37 = arith.addf %31, %36 : vector<8x256xf32>
    %38 = vector.extract_strided_slice %6 {offsets = [5, 0], sizes = [1, 128], strides = [1, 1]} : vector<22x128xbf16> to vector<1x128xbf16>
    %39 = vector.shape_cast %38 : vector<1x128xbf16> to vector<1x128xbf16>
    %40 = vector.broadcast %39 : vector<1x128xbf16> to vector<8x128xbf16>
    %c640 = arith.constant 640 : index
    %c0_13 = arith.constant 0 : index
    %41 = vector.load %arg6[%c640, %c0_13] : memref<2816x256xbf16, #tpu.memory_space<vmem>>, vector<128x256xbf16>
    %cst_14 = arith.constant dense<0.000000e+00> : vector<8x256xf32>
    %42 = tpu.matmul %40, %41, %cst_14 {dimension_numbers = #tpu.dot_dimension_numbers<[1], [0], [0], [1], [0, 0, 1, 1], [], []>} : vector<8x128xbf16>, vector<128x256xbf16>, vector<8x256xf32> -> vector<8x256xf32>
    %43 = arith.addf %37, %42 : vector<8x256xf32>
    %44 = vector.extract_strided_slice %6 {offsets = [6, 0], sizes = [1, 128], strides = [1, 1]} : vector<22x128xbf16> to vector<1x128xbf16>
    %45 = vector.shape_cast %44 : vector<1x128xbf16> to vector<1x128xbf16>
    %46 = vector.broadcast %45 : vector<1x128xbf16> to vector<8x128xbf16>
    %c768 = arith.constant 768 : index
    %c0_15 = arith.constant 0 : index
    %47 = vector.load %arg6[%c768, %c0_15] : memref<2816x256xbf16, #tpu.memory_space<vmem>>, vector<128x256xbf16>
    %cst_16 = arith.constant dense<0.000000e+00> : vector<8x256xf32>
    %48 = tpu.matmul %46, %47, %cst_16 {dimension_numbers = #tpu.dot_dimension_numbers<[1], [0], [0], [1], [0, 0, 1, 1], [], []>} : vector<8x128xbf16>, vector<128x256xbf16>, vector<8x256xf32> -> vector<8x256xf32>
    %49 = arith.addf %43, %48 : vector<8x256xf32>
    %50 = vector.extract_strided_slice %6 {offsets = [7, 0], sizes = [1, 128], strides = [1, 1]} : vector<22x128xbf16> to vector<1x128xbf16>
    %51 = vector.shape_cast %50 : vector<1x128xbf16> to vector<1x128xbf16>
    %52 = vector.broadcast %51 : vector<1x128xbf16> to vector<8x128xbf16>
    %c896 = arith.constant 896 : index
    %c0_17 = arith.constant 0 : index
    %53 = vector.load %arg6[%c896, %c0_17] : memref<2816x256xbf16, #tpu.memory_space<vmem>>, vector<128x256xbf16>
    %cst_18 = arith.constant dense<0.000000e+00> : vector<8x256xf32>
    %54 = tpu.matmul %52, %53, %cst_18 {dimension_numbers = #tpu.dot_dimension_numbers<[1], [0], [0], [1], [0, 0, 1, 1], [], []>} : vector<8x128xbf16>, vector<128x256xbf16>, vector<8x256xf32> -> vector<8x256xf32>
    %55 = arith.addf %49, %54 : vector<8x256xf32>
    %56 = vector.extract_strided_slice %6 {offsets = [8, 0], sizes = [1, 128], strides = [1, 1]} : vector<22x128xbf16> to vector<1x128xbf16>
    %57 = vector.shape_cast %56 : vector<1x128xbf16> to vector<1x128xbf16>
    %58 = vector.broadcast %57 : vector<1x128xbf16> to vector<8x128xbf16>
    %c1024 = arith.constant 1024 : index
    %c0_19 = arith.constant 0 : index
    %59 = vector.load %arg6[%c1024, %c0_19] : memref<2816x256xbf16, #tpu.memory_space<vmem>>, vector<128x256xbf16>
    %cst_20 = arith.constant dense<0.000000e+00> : vector<8x256xf32>
    %60 = tpu.matmul %58, %59, %cst_20 {dimension_numbers = #tpu.dot_dimension_numbers<[1], [0], [0], [1], [0, 0, 1, 1], [], []>} : vector<8x128xbf16>, vector<128x256xbf16>, vector<8x256xf32> -> vector<8x256xf32>
    %61 = arith.addf %55, %60 : vector<8x256xf32>
    %62 = vector.extract_strided_slice %6 {offsets = [9, 0], sizes = [1, 128], strides = [1, 1]} : vector<22x128xbf16> to vector<1x128xbf16>
    %63 = vector.shape_cast %62 : vector<1x128xbf16> to vector<1x128xbf16>
    %64 = vector.broadcast %63 : vector<1x128xbf16> to vector<8x128xbf16>
    %c1152 = arith.constant 1152 : index
    %c0_21 = arith.constant 0 : index
    %65 = vector.load %arg6[%c1152, %c0_21] : memref<2816x256xbf16, #tpu.memory_space<vmem>>, vector<128x256xbf16>
    %cst_22 = arith.constant dense<0.000000e+00> : vector<8x256xf32>
    %66 = tpu.matmul %64, %65, %cst_22 {dimension_numbers = #tpu.dot_dimension_numbers<[1], [0], [0], [1], [0, 0, 1, 1], [], []>} : vector<8x128xbf16>, vector<128x256xbf16>, vector<8x256xf32> -> vector<8x256xf32>
    %67 = arith.addf %61, %66 : vector<8x256xf32>
    %68 = vector.extract_strided_slice %6 {offsets = [10, 0], sizes = [1, 128], strides = [1, 1]} : vector<22x128xbf16> to vector<1x128xbf16>
    %69 = vector.shape_cast %68 : vector<1x128xbf16> to vector<1x128xbf16>
    %70 = vector.broadcast %69 : vector<1x128xbf16> to vector<8x128xbf16>
    %c1280 = arith.constant 1280 : index
    %c0_23 = arith.constant 0 : index
    %71 = vector.load %arg6[%c1280, %c0_23] : memref<2816x256xbf16, #tpu.memory_space<vmem>>, vector<128x256xbf16>
    %cst_24 = arith.constant dense<0.000000e+00> : vector<8x256xf32>
    %72 = tpu.matmul %70, %71, %cst_24 {dimension_numbers = #tpu.dot_dimension_numbers<[1], [0], [0], [1], [0, 0, 1, 1], [], []>} : vector<8x128xbf16>, vector<128x256xbf16>, vector<8x256xf32> -> vector<8x256xf32>
    %73 = arith.addf %67, %72 : vector<8x256xf32>
    %74 = vector.extract_strided_slice %6 {offsets = [11, 0], sizes = [1, 128], strides = [1, 1]} : vector<22x128xbf16> to vector<1x128xbf16>
    %75 = vector.shape_cast %74 : vector<1x128xbf16> to vector<1x128xbf16>
    %76 = vector.broadcast %75 : vector<1x128xbf16> to vector<8x128xbf16>
    %c1408 = arith.constant 1408 : index
    %c0_25 = arith.constant 0 : index
    %77 = vector.load %arg6[%c1408, %c0_25] : memref<2816x256xbf16, #tpu.memory_space<vmem>>, vector<128x256xbf16>
    %cst_26 = arith.constant dense<0.000000e+00> : vector<8x256xf32>
    %78 = tpu.matmul %76, %77, %cst_26 {dimension_numbers = #tpu.dot_dimension_numbers<[1], [0], [0], [1], [0, 0, 1, 1], [], []>} : vector<8x128xbf16>, vector<128x256xbf16>, vector<8x256xf32> -> vector<8x256xf32>
    %79 = arith.addf %73, %78 : vector<8x256xf32>
    %80 = vector.extract_strided_slice %6 {offsets = [12, 0], sizes = [1, 128], strides = [1, 1]} : vector<22x128xbf16> to vector<1x128xbf16>
    %81 = vector.shape_cast %80 : vector<1x128xbf16> to vector<1x128xbf16>
    %82 = vector.broadcast %81 : vector<1x128xbf16> to vector<8x128xbf16>
    %c1536 = arith.constant 1536 : index
    %c0_27 = arith.constant 0 : index
    %83 = vector.load %arg6[%c1536, %c0_27] : memref<2816x256xbf16, #tpu.memory_space<vmem>>, vector<128x256xbf16>
    %cst_28 = arith.constant dense<0.000000e+00> : vector<8x256xf32>
    %84 = tpu.matmul %82, %83, %cst_28 {dimension_numbers = #tpu.dot_dimension_numbers<[1], [0], [0], [1], [0, 0, 1, 1], [], []>} : vector<8x128xbf16>, vector<128x256xbf16>, vector<8x256xf32> -> vector<8x256xf32>
    %85 = arith.addf %79, %84 : vector<8x256xf32>
    %86 = vector.extract_strided_slice %6 {offsets = [13, 0], sizes = [1, 128], strides = [1, 1]} : vector<22x128xbf16> to vector<1x128xbf16>
    %87 = vector.shape_cast %86 : vector<1x128xbf16> to vector<1x128xbf16>
    %88 = vector.broadcast %87 : vector<1x128xbf16> to vector<8x128xbf16>
    %c1664 = arith.constant 1664 : index
    %c0_29 = arith.constant 0 : index
    %89 = vector.load %arg6[%c1664, %c0_29] : memref<2816x256xbf16, #tpu.memory_space<vmem>>, vector<128x256xbf16>
    %cst_30 = arith.constant dense<0.000000e+00> : vector<8x256xf32>
    %90 = tpu.matmul %88, %89, %cst_30 {dimension_numbers = #tpu.dot_dimension_numbers<[1], [0], [0], [1], [0, 0, 1, 1], [], []>} : vector<8x128xbf16>, vector<128x256xbf16>, vector<8x256xf32> -> vector<8x256xf32>
    %91 = arith.addf %85, %90 : vector<8x256xf32>
    %92 = vector.extract_strided_slice %6 {offsets = [14, 0], sizes = [1, 128], strides = [1, 1]} : vector<22x128xbf16> to vector<1x128xbf16>
    %93 = vector.shape_cast %92 : vector<1x128xbf16> to vector<1x128xbf16>
    %94 = vector.broadcast %93 : vector<1x128xbf16> to vector<8x128xbf16>
    %c1792 = arith.constant 1792 : index
    %c0_31 = arith.constant 0 : index
    %95 = vector.load %arg6[%c1792, %c0_31] : memref<2816x256xbf16, #tpu.memory_space<vmem>>, vector<128x256xbf16>
    %cst_32 = arith.constant dense<0.000000e+00> : vector<8x256xf32>
    %96 = tpu.matmul %94, %95, %cst_32 {dimension_numbers = #tpu.dot_dimension_numbers<[1], [0], [0], [1], [0, 0, 1, 1], [], []>} : vector<8x128xbf16>, vector<128x256xbf16>, vector<8x256xf32> -> vector<8x256xf32>
    %97 = arith.addf %91, %96 : vector<8x256xf32>
    %98 = vector.extract_strided_slice %6 {offsets = [15, 0], sizes = [1, 128], strides = [1, 1]} : vector<22x128xbf16> to vector<1x128xbf16>
    %99 = vector.shape_cast %98 : vector<1x128xbf16> to vector<1x128xbf16>
    %100 = vector.broadcast %99 : vector<1x128xbf16> to vector<8x128xbf16>
    %c1920 = arith.constant 1920 : index
    %c0_33 = arith.constant 0 : index
    %101 = vector.load %arg6[%c1920, %c0_33] : memref<2816x256xbf16, #tpu.memory_space<vmem>>, vector<128x256xbf16>
    %cst_34 = arith.constant dense<0.000000e+00> : vector<8x256xf32>
    %102 = tpu.matmul %100, %101, %cst_34 {dimension_numbers = #tpu.dot_dimension_numbers<[1], [0], [0], [1], [0, 0, 1, 1], [], []>} : vector<8x128xbf16>, vector<128x256xbf16>, vector<8x256xf32> -> vector<8x256xf32>
    %103 = arith.addf %97, %102 : vector<8x256xf32>
    %104 = vector.extract_strided_slice %6 {offsets = [16, 0], sizes = [1, 128], strides = [1, 1]} : vector<22x128xbf16> to vector<1x128xbf16>
    %105 = vector.shape_cast %104 : vector<1x128xbf16> to vector<1x128xbf16>
    %106 = vector.broadcast %105 : vector<1x128xbf16> to vector<8x128xbf16>
    %c2048 = arith.constant 2048 : index
    %c0_35 = arith.constant 0 : index
    %107 = vector.load %arg6[%c2048, %c0_35] : memref<2816x256xbf16, #tpu.memory_space<vmem>>, vector<128x256xbf16>
    %cst_36 = arith.constant dense<0.000000e+00> : vector<8x256xf32>
    %108 = tpu.matmul %106, %107, %cst_36 {dimension_numbers = #tpu.dot_dimension_numbers<[1], [0], [0], [1], [0, 0, 1, 1], [], []>} : vector<8x128xbf16>, vector<128x256xbf16>, vector<8x256xf32> -> vector<8x256xf32>
    %109 = arith.addf %103, %108 : vector<8x256xf32>
    %110 = vector.extract_strided_slice %6 {offsets = [17, 0], sizes = [1, 128], strides = [1, 1]} : vector<22x128xbf16> to vector<1x128xbf16>
    %111 = vector.shape_cast %110 : vector<1x128xbf16> to vector<1x128xbf16>
    %112 = vector.broadcast %111 : vector<1x128xbf16> to vector<8x128xbf16>
    %c2176 = arith.constant 2176 : index
    %c0_37 = arith.constant 0 : index
    %113 = vector.load %arg6[%c2176, %c0_37] : memref<2816x256xbf16, #tpu.memory_space<vmem>>, vector<128x256xbf16>
    %cst_38 = arith.constant dense<0.000000e+00> : vector<8x256xf32>
    %114 = tpu.matmul %112, %113, %cst_38 {dimension_numbers = #tpu.dot_dimension_numbers<[1], [0], [0], [1], [0, 0, 1, 1], [], []>} : vector<8x128xbf16>, vector<128x256xbf16>, vector<8x256xf32> -> vector<8x256xf32>
    %115 = arith.addf %109, %114 : vector<8x256xf32>
    %116 = vector.extract_strided_slice %6 {offsets = [18, 0], sizes = [1, 128], strides = [1, 1]} : vector<22x128xbf16> to vector<1x128xbf16>
    %117 = vector.shape_cast %116 : vector<1x128xbf16> to vector<1x128xbf16>
    %118 = vector.broadcast %117 : vector<1x128xbf16> to vector<8x128xbf16>
    %c2304 = arith.constant 2304 : index
    %c0_39 = arith.constant 0 : index
    %119 = vector.load %arg6[%c2304, %c0_39] : memref<2816x256xbf16, #tpu.memory_space<vmem>>, vector<128x256xbf16>
    %cst_40 = arith.constant dense<0.000000e+00> : vector<8x256xf32>
    %120 = tpu.matmul %118, %119, %cst_40 {dimension_numbers = #tpu.dot_dimension_numbers<[1], [0], [0], [1], [0, 0, 1, 1], [], []>} : vector<8x128xbf16>, vector<128x256xbf16>, vector<8x256xf32> -> vector<8x256xf32>
    %121 = arith.addf %115, %120 : vector<8x256xf32>
    %122 = vector.extract_strided_slice %6 {offsets = [19, 0], sizes = [1, 128], strides = [1, 1]} : vector<22x128xbf16> to vector<1x128xbf16>
    %123 = vector.shape_cast %122 : vector<1x128xbf16> to vector<1x128xbf16>
    %124 = vector.broadcast %123 : vector<1x128xbf16> to vector<8x128xbf16>
    %c2432 = arith.constant 2432 : index
    %c0_41 = arith.constant 0 : index
    %125 = vector.load %arg6[%c2432, %c0_41] : memref<2816x256xbf16, #tpu.memory_space<vmem>>, vector<128x256xbf16>
    %cst_42 = arith.constant dense<0.000000e+00> : vector<8x256xf32>
    %126 = tpu.matmul %124, %125, %cst_42 {dimension_numbers = #tpu.dot_dimension_numbers<[1], [0], [0], [1], [0, 0, 1, 1], [], []>} : vector<8x128xbf16>, vector<128x256xbf16>, vector<8x256xf32> -> vector<8x256xf32>
    %127 = arith.addf %121, %126 : vector<8x256xf32>
    %128 = vector.extract_strided_slice %6 {offsets = [20, 0], sizes = [1, 128], strides = [1, 1]} : vector<22x128xbf16> to vector<1x128xbf16>
    %129 = vector.shape_cast %128 : vector<1x128xbf16> to vector<1x128xbf16>
    %130 = vector.broadcast %129 : vector<1x128xbf16> to vector<8x128xbf16>
    %c2560 = arith.constant 2560 : index
    %c0_43 = arith.constant 0 : index
    %131 = vector.load %arg6[%c2560, %c0_43] : memref<2816x256xbf16, #tpu.memory_space<vmem>>, vector<128x256xbf16>
    %cst_44 = arith.constant dense<0.000000e+00> : vector<8x256xf32>
    %132 = tpu.matmul %130, %131, %cst_44 {dimension_numbers = #tpu.dot_dimension_numbers<[1], [0], [0], [1], [0, 0, 1, 1], [], []>} : vector<8x128xbf16>, vector<128x256xbf16>, vector<8x256xf32> -> vector<8x256xf32>
    %133 = arith.addf %127, %132 : vector<8x256xf32>
    %134 = vector.extract_strided_slice %6 {offsets = [21, 0], sizes = [1, 128], strides = [1, 1]} : vector<22x128xbf16> to vector<1x128xbf16>
    %135 = vector.shape_cast %134 : vector<1x128xbf16> to vector<1x128xbf16>
    %136 = vector.broadcast %135 : vector<1x128xbf16> to vector<8x128xbf16>
    %c2688 = arith.constant 2688 : index
    %c0_45 = arith.constant 0 : index
    %137 = vector.load %arg6[%c2688, %c0_45] : memref<2816x256xbf16, #tpu.memory_space<vmem>>, vector<128x256xbf16>
    %cst_46 = arith.constant dense<0.000000e+00> : vector<8x256xf32>
    %138 = tpu.matmul %136, %137, %cst_46 {dimension_numbers = #tpu.dot_dimension_numbers<[1], [0], [0], [1], [0, 0, 1, 1], [], []>} : vector<8x128xbf16>, vector<128x256xbf16>, vector<8x256xf32> -> vector<8x256xf32>
    %139 = arith.addf %133, %138 : vector<8x256xf32>
    %c0_47 = arith.constant 0 : index
    %c0_48 = arith.constant 0 : index
    %140 = vector.load %arg11[%c0_47, %c0_48] : memref<8x256xf32, #tpu.memory_space<vmem>>, vector<8x256xf32>
    %141 = arith.addf %140, %139 : vector<8x256xf32>
    %c0_49 = arith.constant 0 : index
    %c0_50 = arith.constant 0 : index
    %142 = vector.load %arg11[%c0_49, %c0_50] : memref<8x256xf32, #tpu.memory_space<vmem>>, vector<8x256xf32>
    tpu.vector_store %arg11[%c0_49, %c0_50], %141 {strides = array<i32>} : memref<8x256xf32, #tpu.memory_space<vmem>>, vector<8x256xf32>,
    %c1_i32 = arith.constant 1 : i32
    %143 = arith.cmpi eq, %arg1, %c1_i32 : i32
    %144 = arith.extui %143 : i1 to i32
    %c0_i32_51 = arith.constant 0 : i32
    %145 = arith.cmpi ne, %144, %c0_i32_51 : i32
    scf.if %145 {
      %c0_52 = arith.constant 0 : index
      %c0_53 = arith.constant 0 : index
      %146 = vector.load %arg11[%c0_52, %c0_53] : memref<8x256xf32, #tpu.memory_space<vmem>>, vector<8x256xf32>
      %c0_54 = arith.constant 0 : index
      %c0_55 = arith.constant 0 : index
      %147 = vector.load %arg7[%c0_54, %c0_55] : memref<1x256xf32, #tpu.memory_space<vmem>>, vector<1x256xf32>
      %148 = vector.broadcast %147 : vector<1x256xf32> to vector<8x256xf32>
      %149 = arith.addf %146, %148 : vector<8x256xf32>
      %cst_56 = arith.constant 0.000000e+00 : f32
      %150 = vector.broadcast %cst_56 : f32 to vector<8x256xf32>
      %151 = arith.maximumf %149, %150 : vector<8x256xf32>
      %c0_57 = arith.constant 0 : index
      %c0_58 = arith.constant 0 : index
      %152 = vector.load %arg8[%c0_57, %c0_58] : memref<256x128xf32, #tpu.memory_space<vmem>>, vector<256x128xf32>
      %cst_59 = arith.constant dense<0.000000e+00> : vector<8x128xf32>
      %153 = tpu.matmul %151, %152, %cst_59 {dimension_numbers = #tpu.dot_dimension_numbers<[1], [0], [0], [1], [0, 0, 1, 1], [], []>} : vector<8x256xf32>, vector<256x128xf32>, vector<8x128xf32> -> vector<8x128xf32>
      %c0_60 = arith.constant 0 : index
      %c0_61 = arith.constant 0 : index
      %c0_62 = arith.constant 0 : index
      %154 = vector.load %arg9[%c0_60, %c0_61, %c0_62] : memref<1x8x128xf32, #tpu.memory_space<vmem>>, vector<1x8x128xf32>
      %155 = vector.shape_cast %154 : vector<1x8x128xf32> to vector<8x128xf32>
      %156 = vector.shape_cast %153 : vector<8x128xf32> to vector<1x8x128xf32>
      tpu.vector_store %arg9[%c0_60, %c0_61, %c0_62], %156 {strides = array<i32>} : memref<1x8x128xf32, #tpu.memory_space<vmem>>, vector<1x8x128xf32>,
    } else {
    }
    return
  }
  func.func @transform_0(%arg0: i32, %arg1: i32) -> (i32, i32, i32) {
    %c0_i32 = arith.constant 0 : i32
    %c0_i32_0 = arith.constant 0 : i32
    %c0_i32_1 = arith.constant 0 : i32
    %c0_i32_2 = arith.constant 0 : i32
    return %c0_i32, %c0_i32_0, %c0_i32_1 : i32, i32, i32
  }
  func.func @transform_1(%arg0: i32, %arg1: i32) -> (i32, i32) {
    %c0_i32 = arith.constant 0 : i32
    %c0_i32_0 = arith.constant 0 : i32
    %c0_i32_1 = arith.constant 0 : i32
    return %c0_i32, %c0_i32_0 : i32, i32
  }
  func.func @transform_2(%arg0: i32, %arg1: i32) -> (i32, i32) {
    %c0_i32 = arith.constant 0 : i32
    %c0_i32_0 = arith.constant 0 : i32
    %c0_i32_1 = arith.constant 0 : i32
    return %c0_i32, %c0_i32_0 : i32, i32
  }
  func.func @transform_3(%arg0: i32, %arg1: i32) -> (i32, i32) {
    %c0_i32 = arith.constant 0 : i32
    %c0_i32_0 = arith.constant 0 : i32
    %c0_i32_1 = arith.constant 0 : i32
    return %c0_i32, %c0_i32_0 : i32, i32
  }
  func.func @transform_4(%arg0: i32, %arg1: i32) -> (i32, i32) {
    %c0_i32 = arith.constant 0 : i32
    return %arg1, %arg0 : i32, i32
  }
  func.func @transform_5(%arg0: i32, %arg1: i32) -> (i32, i32) {
    %c0_i32 = arith.constant 0 : i32
    %c0_i32_0 = arith.constant 0 : i32
    return %c0_i32, %arg0 : i32, i32
  }
  func.func @transform_6(%arg0: i32, %arg1: i32) -> (i32, i32) {
    %c0_i32 = arith.constant 0 : i32
    %c0_i32_0 = arith.constant 0 : i32
    return %arg0, %c0_i32 : i32, i32
  }
  func.func @transform_7(%arg0: i32, %arg1: i32) -> (i32, i32, i32) {
    %c0_i32 = arith.constant 0 : i32
    %c0_i32_0 = arith.constant 0 : i32
    %c0_i32_1 = arith.constant 0 : i32
    return %arg0, %c0_i32, %c0_i32_0 : i32, i32, i32
  }
}

</mosaic_0001>

<bundles_post_ra>
// kernel: tile.13
= control target key start
LH: loop header
LB: loop body
LE: loop exit
PB: predicated region body
PF: predicated region fallthrough
CT: control target
= control target key end

     0   :  { %s22_s0 = inlined_call_operand.vmem [shape: f32[32], index: 0, kind: input, shape index: {}]   ;;  %s23_s1 = inlined_call_operand.vmem [shape: f32[4,32], index: 1, kind: output, shape index: {}]  }
   0x1   :  { %v4_v0 = vld [vmem:[%s22_s0] ss:$0 sm:$0xff] }
   0x2   :  { %5 = vst [vmem:[%s23_s1] sm:$0xf] %v4_v0 }

// kernel: tile.14
= control target key start
LH: loop header
LB: loop body
LE: loop exit
PB: predicated region body
PF: predicated region fallthrough
CT: control target
= control target key end

     0   :  { %s37_s8 = smov 32   ;;  %s38_s9 = smov 64   ;;  %vm7_vm0 = vcmask 261120   ;;  %vm13_vm1 = vcmask 1048320   ;;  %vm19_vm2 = vcmask 785920   ;;  %vm25_vm3 = vcmask 523520   ;;  %s55_s0 = inlined_call_operand.vmem [shape: f32[4,32], index: 0, kind: input, shape index: {}]   ;;  %s56_s1 = inlined_call_operand.vmem [shape: f32[1,128], index: 1, kind: output, shape index: {}]  }
   0x1   :  { %v4_v0 = vld [vmem:[%s55_s0] sm:$0xf]  ;;  %s36_s0 = smov 96  }
   0x2   :  { %5 = vst [vmem:[#allocation1] sm:$0xf] %v4_v0 }
   0x9   :  { %v10_v1 = vld [vmem:[#allocation1 + $0x3] sm:$0x1]   ;;  %v22_v2 = vld [vmem:[#allocation1 + $0x1] sm:$0x1]   ;;  %v16_v3 = vld [vmem:[#allocation1 + $0x2] sm:$0x1]  }
   0xa   :  { %11 = vrot.lane.b32.xlu0 %v10_v1, %s36_s0  ;;  %23 = vrot.lane.b32.xlu1 %v22_v2, %s37_s8  ;;  %v6_v4 = vld [vmem:[#allocation1] sm:$0x1]  }
   0xb   :  { %8 = vst.msk [vmem:[#allocation0] sm:$0x1] %vm7_vm0, %v6_v4  }
  0x12   :  { %17 = vrot.lane.b32.xlu0 %v16_v3, %s38_s9 }
  0x7c   :  { %v12_v5 = vpop.permute.xlu0 %11   ;;  %v24_v6 = vpop.permute.xlu1 %23  }
  0x7d   :  { %14 = vst.msk [vmem:[#allocation0] sm:$0x1] %vm13_vm1, %v12_v5  }
  0x84   :  { %v18_v7 = vpop.permute.xlu0 %17  }
  0x85   :  { %20 = vst.msk [vmem:[#allocation0] sm:$0x1] %vm19_vm2, %v18_v7  }
  0x86   :  { %26 = vst.msk [vmem:[#allocation0] sm:$0x1] %vm25_vm3, %v24_v6  }
  0x8d   :  { %v29_v8 = vld [vmem:[#allocation0] sm:$0x1] }
  0x8e   :  { %32 = vst [vmem:[%s56_s1] sm:$0x1] %v29_v8 }

// kernel: simple_block_forward.1
= control target key start
LH: loop header
LB: loop body
LE: loop exit
PB: predicated region body
PF: predicated region fallthrough
CT: control target
= control target key end

     0   :  { %s10394_s0 = inlined_call_operand.vmem [shape: f32[8,22,64], index: 0, kind: input, shape index: {}]   ;;  %s10395_s1 = inlined_call_operand.vmem [shape: f32[64,128], index: 1, kind: input, shape index: {}]   ;;  %s10396_s2 = inlined_call_operand.vmem [shape: f32[1,128], index: 2, kind: input, shape index: {}]   ;;  %s10397_s3 = inlined_call_operand.vmem [shape: f32[1,128], index: 3, kind: input, shape index: {}]   ;;  %s10398_s4 = inlined_call_operand.vmem [shape: bf16[5632,512], index: 4, kind: input, shape index: {}]   ;;  %s10399_s5 = inlined_call_operand.vmem [shape: f32[1,512], index: 5, kind: input, shape index: {}]   ;;  %s10400_s6 = inlined_call_operand.vmem [shape: f32[512,128], index: 6, kind: input, shape index: {}]   ;;  %s10401_s7 = inlined_call_operand.vmem [shape: f32[2,8,128], index: 7, kind: output, shape index: {}]  }
   0x1   :  { %10402 = sst [smem:[#allocation5_spill]] %s10398_s4 }
   0x2   :  { %s8604_s24 = smov 0   ;;  %s8606_s25 = smov 0  }
   0x3   :  { %s8608_s26 = smov 0   ;;  %s8610_s27 = smov 0  }
   0x4   :  { %s8612_s28 = smov 0   ;;  %s8614_s29 = smov 0  }
   0x5   :  { %s8616_s30 = smov 0  }
   0x6 LB: > { %s26_s8 = sadd.s32 1, %s8553_s28  ;;  %s29_s9 = sadd.s32 1, %s8557_s29  ;;  %s8561_s30 = sphi %s8616_s30, %s17_s30   ;;  %s8557_s29 = sphi %s8614_s29, %s10409_s29   ;;  %s8553_s28 = sphi %s8612_s28, %s10408_s28   ;;  %s8549_s27 = sphi %s8610_s27, %s10407_s27   ;;  %s8545_s26 = sphi %s8608_s26, %s10406_s26   ;;  %s8541_s25 = sphi %s8606_s25, %s10405_s25   ;;  %s8537_s24 = sphi %s8604_s24, %s10404_s24  }
   0x7   : > { %p27_p0 = scmp.ge.s32.totalorder %s26_s8, 2  ;;  %p129_p1 = scmp.ne.s32.totalorder %s8541_s25, %s8537_s24 }
   0x8   : > { %p130_p2 = scmp.eq.s32.totalorder %s8561_s30, 0  ;;  %s122_s13 = sadd.s32 1, %s8541_s25 }
   0x9   : > { %s10411_s8 = smov (%p27_p0, %s26_s8), 0  ;;  %s10413_s9 = smov (!%p27_p0, %s29_s9), %s8557_s29 }
   0xa   : > { %p131_p3 = por %p130_p2, %p129_p1  ;;  %p31_p4 = scmp.ge.s32.totalorder %s10413_s9, 2 }
   0xb   : > { %s117_s10 = ssub.s32 %s8553_s28, %s10411_s8  ;;  %p6625_p6 = scmp.ge.s32.totalorder %s8561_s30, 4 }
   0xc   : > { %s10415_s9 = smov (%p31_p4, %s10413_s9), 0 }
   0xd   : > { %s118_s11 = ssub.s32 %s8557_s29, %s10415_s9  ;;  %245 = sbr.rel (%p6625_p6) target bundleno = 380 (0x17c), region = 32 }
   0xe   : > { %s119_s12 = sor.u32 %s118_s11, %s117_s10 }
   0xf   : > { %p120_p5 = scmp.eq.s32.totalorder %s119_s12, 0 }
  0x11   : > { %s8655_s14 = scalar_select %p120_p5, %s8541_s25, %s122_s13  }
  0x12   : > { %248 = sbr.rel (!%p131_p3) target bundleno = 380 (0x17c), region = 36  ;;  %s250_s15 = sand.u32 (%p131_p3), 1, %s8541_s25  }
  0x13   : > { %s8444_s16 = smul.u32 (%p131_p3), 2816, %s250_s15  ;;  %s6626_s17 = sshll.u32 (%p131_p3), %s8557_s29, 1 }
  0x14   : > { %s8091_s18 = smul.u32 (%p131_p3), 1408, %s8553_s28  ;;  %s10403_s4 = sld [smem:[#allocation5_spill]] (%p131_p3) }
  0x15   : > { %s8669_s10 = scalar_lea.vmem (%p131_p3), [#allocation4], %s8444_s16 }
  0x16   : > { %s256_s19 = sadd.s32 (%p131_p3), %s8091_s18, %s6626_s17 }
  0x17   : > { %s6628_s20 = sshll.u32 %s256_s19, 2 }
  0x1a   : > { %s8664_s23 = scalar_lea.vmem %s10403_s4, %s6628_s20 }
  0x1b   : > { %v990_v0 = vld [vmem:[%s8664_s23] sm:$0xff]  ;;  %v992_v1 = vld [vmem:[%s8664_s23 + $0x10] sm:$0xff] }
  0x1c   : > { %v994_v2 = vld [vmem:[%s8664_s23 + $0x20] sm:$0xff]  ;;  %991 = vst [vmem:[%s8669_s10] sm:$0xff] %v990_v0  ;;  %v996_v3 = vld [vmem:[%s8664_s23 + $0x30] sm:$0xff] }
  0x1d   : > { %993 = vst [vmem:[%s8669_s10 + $0x8] sm:$0xff] %v992_v1  ;;  %v998_v4 = vld [vmem:[%s8664_s23 + $0x40] sm:$0xff]  ;;  %v1000_v5 = vld [vmem:[%s8664_s23 + $0x50] sm:$0xff] }
  0x1e   : > { %995 = vst [vmem:[%s8669_s10 + $0x10] sm:$0xff] %v994_v2  ;;  %v1002_v6 = vld [vmem:[%s8664_s23 + $0x60] sm:$0xff]  ;;  %v1004_v7 = vld [vmem:[%s8664_s23 + $0x70] sm:$0xff] }
  0x1f   : > { %997 = vst [vmem:[%s8669_s10 + $0x18] sm:$0xff] %v996_v3  ;;  %v1006_v8 = vld [vmem:[%s8664_s23 + $0x80] sm:$0xff]  ;;  %v1008_v9 = vld [vmem:[%s8664_s23 + $0x90] sm:$0xff] }
  0x20   : > { %999 = vst [vmem:[%s8669_s10 + $0x20] sm:$0xff] %v998_v4  ;;  %v1010_v10 = vld [vmem:[%s8664_s23 + $0xa0] sm:$0xff]  ;;  %v1012_v11 = vld [vmem:[%s8664_s23 + $0xb0] sm:$0xff] }
  0x21   : > { %1001 = vst [vmem:[%s8669_s10 + $0x28] sm:$0xff] %v1000_v5  ;;  %v1014_v12 = vld [vmem:[%s8664_s23 + $0xc0] sm:$0xff]  ;;  %v1016_v13 = vld [vmem:[%s8664_s23 + $0xd0] sm:$0xff] }
  0x22   : > { %1003 = vst [vmem:[%s8669_s10 + $0x30] sm:$0xff] %v1002_v6  ;;  %v1018_v14 = vld [vmem:[%s8664_s23 + $0xe0] sm:$0xff]  ;;  %v1020_v15 = vld [vmem:[%s8664_s23 + $0xf0] sm:$0xff] }
  0x23   : > { %1005 = vst [vmem:[%s8669_s10 + $0x38] sm:$0xff] %v1004_v7  ;;  %v1022_v16 = vld [vmem:[%s8664_s23 + $0x100] sm:$0xff]  ;;  %v1024_v17 = vld [vmem:[%s8664_s23 + $0x110] sm:$0xff] }
  0x24   : > { %1007 = vst [vmem:[%s8669_s10 + $0x40] sm:$0xff] %v1006_v8  ;;  %v1026_v18 = vld [vmem:[%s8664_s23 + $0x120] sm:$0xff]  ;;  %v1028_v19 = vld [vmem:[%s8664_s23 + $0x130] sm:$0xff] }
  0x25   : > { %1009 = vst [vmem:[%s8669_s10 + $0x48] sm:$0xff] %v1008_v9  ;;  %v1030_v20 = vld [vmem:[%s8664_s23 + $0x140] sm:$0xff]  ;;  %v1032_v21 = vld [vmem:[%s8664_s23 + $0x150] sm:$0xff] }
  0x26   : > { %1011 = vst [vmem:[%s8669_s10 + $0x50] sm:$0xff] %v1010_v10  ;;  %v1034_v22 = vld [vmem:[%s8664_s23 + $0x160] sm:$0xff]  ;;  %v1036_v23 = vld [vmem:[%s8664_s23 + $0x170] sm:$0xff] }
  0x27   : > { %1013 = vst [vmem:[%s8669_s10 + $0x58] sm:$0xff] %v1012_v11  ;;  %v1038_v24 = vld [vmem:[%s8664_s23 + $0x180] sm:$0xff]  ;;  %v1040_v25 = vld [vmem:[%s8664_s23 + $0x190] sm:$0xff] }
  0x28   : > { %1015 = vst [vmem:[%s8669_s10 + $0x60] sm:$0xff] %v1014_v12  ;;  %v1042_v26 = vld [vmem:[%s8664_s23 + $0x1a0] sm:$0xff]  ;;  %v1044_v27 = vld [vmem:[%s8664_s23 + $0x1b0] sm:$0xff] }
  0x29   : > { %1017 = vst [vmem:[%s8669_s10 + $0x68] sm:$0xff] %v1016_v13  ;;  %v1046_v28 = vld [vmem:[%s8664_s23 + $0x1c0] sm:$0xff]  ;;  %v1048_v29 = vld [vmem:[%s8664_s23 + $0x1d0] sm:$0xff] }
  0x2a   : > { %1019 = vst [vmem:[%s8669_s10 + $0x70] sm:$0xff] %v1018_v14  ;;  %v1050_v30 = vld [vmem:[%s8664_s23 + $0x1e0] sm:$0xff]  ;;  %v1052_v31 = vld [vmem:[%s8664_s23 + $0x1f0] sm:$0xff] }
  0x2b   : > { %1021 = vst [vmem:[%s8669_s10 + $0x78] sm:$0xff] %v1020_v15  ;;  %v1054_v32 = vld [vmem:[%s8664_s23 + $0x200] sm:$0xff]  ;;  %v1056_v33 = vld [vmem:[%s8664_s23 + $0x210] sm:$0xff] }
  0x2c   : > { %1023 = vst [vmem:[%s8669_s10 + $0x80] sm:$0xff] %v1022_v16  ;;  %v1058_v34 = vld [vmem:[%s8664_s23 + $0x220] sm:$0xff]  ;;  %v1060_v35 = vld [vmem:[%s8664_s23 + $0x230] sm:$0xff] }
  0x2d   : > { %1025 = vst [vmem:[%s8669_s10 + $0x88] sm:$0xff] %v1024_v17  ;;  %v1062_v36 = vld [vmem:[%s8664_s23 + $0x240] sm:$0xff]  ;;  %v1064_v37 = vld [vmem:[%s8664_s23 + $0x250] sm:$0xff] }
  0x2e   : > { %1027 = vst [vmem:[%s8669_s10 + $0x90] sm:$0xff] %v1026_v18  ;;  %v1066_v38 = vld [vmem:[%s8664_s23 + $0x260] sm:$0xff]  ;;  %v1068_v39 = vld [vmem:[%s8664_s23 + $0x270] sm:$0xff] }
  0x2f   : > { %1029 = vst [vmem:[%s8669_s10 + $0x98] sm:$0xff] %v1028_v19  ;;  %v1070_v40 = vld [vmem:[%s8664_s23 + $0x280] sm:$0xff]  ;;  %v1072_v41 = vld [vmem:[%s8664_s23 + $0x290] sm:$0xff] }
  0x30   : > { %1031 = vst [vmem:[%s8669_s10 + $0xa0] sm:$0xff] %v1030_v20  ;;  %v1074_v42 = vld [vmem:[%s8664_s23 + $0x2a0] sm:$0xff]  ;;  %v1076_v43 = vld [vmem:[%s8664_s23 + $0x2b0] sm:$0xff] }
  0x31   : > { %1033 = vst [vmem:[%s8669_s10 + $0xa8] sm:$0xff] %v1032_v21  ;;  %v1078_v44 = vld [vmem:[%s8664_s23 + $0x2c0] sm:$0xff]  ;;  %v1080_v45 = vld [vmem:[%s8664_s23 + $0x2d0] sm:$0xff] }
  0x32   : > { %1035 = vst [vmem:[%s8669_s10 + $0xb0] sm:$0xff] %v1034_v22  ;;  %v1082_v46 = vld [vmem:[%s8664_s23 + $0x2e0] sm:$0xff]  ;;  %v1084_v47 = vld [vmem:[%s8664_s23 + $0x2f0] sm:$0xff] }
  0x33   : > { %1037 = vst [vmem:[%s8669_s10 + $0xb8] sm:$0xff] %v1036_v23  ;;  %v1086_v48 = vld [vmem:[%s8664_s23 + $0x300] sm:$0xff]  ;;  %v1088_v49 = vld [vmem:[%s8664_s23 + $0x310] sm:$0xff] }
  0x34   : > { %1039 = vst [vmem:[%s8669_s10 + $0xc0] sm:$0xff] %v1038_v24  ;;  %v1090_v50 = vld [vmem:[%s8664_s23 + $0x320] sm:$0xff]  ;;  %v1092_v51 = vld [vmem:[%s8664_s23 + $0x330] sm:$0xff] }
  0x35   : > { %1041 = vst [vmem:[%s8669_s10 + $0xc8] sm:$0xff] %v1040_v25  ;;  %v1094_v52 = vld [vmem:[%s8664_s23 + $0x340] sm:$0xff]  ;;  %v1096_v53 = vld [vmem:[%s8664_s23 + $0x350] sm:$0xff] }
  0x36   : > { %1043 = vst [vmem:[%s8669_s10 + $0xd0] sm:$0xff] %v1042_v26  ;;  %v1098_v54 = vld [vmem:[%s8664_s23 + $0x360] sm:$0xff]  ;;  %v1100_v55 = vld [vmem:[%s8664_s23 + $0x370] sm:$0xff] }
  0x37   : > { %1045 = vst [vmem:[%s8669_s10 + $0xd8] sm:$0xff] %v1044_v27  ;;  %v1102_v56 = vld [vmem:[%s8664_s23 + $0x380] sm:$0xff]  ;;  %v1104_v57 = vld [vmem:[%s8664_s23 + $0x390] sm:$0xff] }
  0x38   : > { %1047 = vst [vmem:[%s8669_s10 + $0xe0] sm:$0xff] %v1046_v28  ;;  %v1106_v58 = vld [vmem:[%s8664_s23 + $0x3a0] sm:$0xff]  ;;  %v1108_v59 = vld [vmem:[%s8664_s23 + $0x3b0] sm:$0xff] }
  0x39   : > { %1049 = vst [vmem:[%s8669_s10 + $0xe8] sm:$0xff] %v1048_v29  ;;  %v1110_v60 = vld [vmem:[%s8664_s23 + $0x3c0] sm:$0xff]  ;;  %v1112_v61 = vld [vmem:[%s8664_s23 + $0x3d0] sm:$0xff] }
  0x3a   : > { %1051 = vst [vmem:[%s8669_s10 + $0xf0] sm:$0xff] %v1050_v30  ;;  %v1114_v62 = vld [vmem:[%s8664_s23 + $0x3e0] sm:$0xff]  ;;  %v1116_v63 = vld [vmem:[%s8664_s23 + $0x3f0] sm:$0xff] }
  0x3b   : > { %1053 = vst [vmem:[%s8669_s10 + $0xf8] sm:$0xff] %v1052_v31  ;;  %v1118_v0 = vld [vmem:[%s8664_s23 + $0x400] sm:$0xff]  ;;  %v1120_v1 = vld [vmem:[%s8664_s23 + $0x410] sm:$0xff] }
  0x3c   : > { %1055 = vst [vmem:[%s8669_s10 + $0x100] sm:$0xff] %v1054_v32  ;;  %v1122_v2 = vld [vmem:[%s8664_s23 + $0x420] sm:$0xff]  ;;  %v1124_v3 = vld [vmem:[%s8664_s23 + $0x430] sm:$0xff] }
  0x3d   : > { %1057 = vst [vmem:[%s8669_s10 + $0x108] sm:$0xff] %v1056_v33  ;;  %v1126_v4 = vld [vmem:[%s8664_s23 + $0x440] sm:$0xff]  ;;  %v1128_v5 = vld [vmem:[%s8664_s23 + $0x450] sm:$0xff] }
  0x3e   : > { %1059 = vst [vmem:[%s8669_s10 + $0x110] sm:$0xff] %v1058_v34  ;;  %v1130_v6 = vld [vmem:[%s8664_s23 + $0x460] sm:$0xff]  ;;  %v1132_v7 = vld [vmem:[%s8664_s23 + $0x470] sm:$0xff] }
  0x3f   : > { %1061 = vst [vmem:[%s8669_s10 + $0x118] sm:$0xff] %v1060_v35  ;;  %v1134_v8 = vld [vmem:[%s8664_s23 + $0x480] sm:$0xff]  ;;  %v1136_v9 = vld [vmem:[%s8664_s23 + $0x490] sm:$0xff] }
  0x40   : > { %1063 = vst [vmem:[%s8669_s10 + $0x120] sm:$0xff] %v1062_v36  ;;  %v1138_v10 = vld [vmem:[%s8664_s23 + $0x4a0] sm:$0xff]  ;;  %v1140_v11 = vld [vmem:[%s8664_s23 + $0x4b0] sm:$0xff] }
  0x41   : > { %1065 = vst [vmem:[%s8669_s10 + $0x128] sm:$0xff] %v1064_v37  ;;  %v1142_v12 = vld [vmem:[%s8664_s23 + $0x4c0] sm:$0xff]  ;;  %v1144_v13 = vld [vmem:[%s8664_s23 + $0x4d0] sm:$0xff] }
  0x42   : > { %1067 = vst [vmem:[%s8669_s10 + $0x130] sm:$0xff] %v1066_v38  ;;  %v1146_v14 = vld [vmem:[%s8664_s23 + $0x4e0] sm:$0xff]  ;;  %v1148_v15 = vld [vmem:[%s8664_s23 + $0x4f0] sm:$0xff] }
  0x43   : > { %1069 = vst [vmem:[%s8669_s10 + $0x138] sm:$0xff] %v1068_v39  ;;  %v1150_v16 = vld [vmem:[%s8664_s23 + $0x500] sm:$0xff]  ;;  %v1152_v17 = vld [vmem:[%s8664_s23 + $0x510] sm:$0xff] }
  0x44   : > { %1071 = vst [vmem:[%s8669_s10 + $0x140] sm:$0xff] %v1070_v40  ;;  %v1154_v18 = vld [vmem:[%s8664_s23 + $0x520] sm:$0xff]  ;;  %v1156_v19 = vld [vmem:[%s8664_s23 + $0x530] sm:$0xff] }
  0x45   : > { %1073 = vst [vmem:[%s8669_s10 + $0x148] sm:$0xff] %v1072_v41  ;;  %v1158_v20 = vld [vmem:[%s8664_s23 + $0x540] sm:$0xff]  ;;  %v1160_v21 = vld [vmem:[%s8664_s23 + $0x550] sm:$0xff] }
  0x46   : > { %1075 = vst [vmem:[%s8669_s10 + $0x150] sm:$0xff] %v1074_v42  ;;  %v1162_v22 = vld [vmem:[%s8664_s23 + $0x560] sm:$0xff]  ;;  %v1164_v23 = vld [vmem:[%s8664_s23 + $0x570] sm:$0xff] }
  0x47   : > { %1077 = vst [vmem:[%s8669_s10 + $0x158] sm:$0xff] %v1076_v43  ;;  %v1166_v24 = vld [vmem:[%s8664_s23 + $0x580] sm:$0xff]  ;;  %v1168_v25 = vld [vmem:[%s8664_s23 + $0x590] sm:$0xff] }
  0x48   : > { %1079 = vst [vmem:[%s8669_s10 + $0x160] sm:$0xff] %v1078_v44  ;;  %v1170_v26 = vld [vmem:[%s8664_s23 + $0x5a0] sm:$0xff]  ;;  %v1172_v27 = vld [vmem:[%s8664_s23 + $0x5b0] sm:$0xff] }
  0x49   : > { %1081 = vst [vmem:[%s8669_s10 + $0x168] sm:$0xff] %v1080_v45  ;;  %v1174_v28 = vld [vmem:[%s8664_s23 + $0x5c0] sm:$0xff]  ;;  %v1176_v29 = vld [vmem:[%s8664_s23 + $0x5d0] sm:$0xff] }
  0x4a   : > { %1083 = vst [vmem:[%s8669_s10 + $0x170] sm:$0xff] %v1082_v46  ;;  %v1178_v30 = vld [vmem:[%s8664_s23 + $0x5e0] sm:$0xff]  ;;  %v1180_v31 = vld [vmem:[%s8664_s23 + $0x5f0] sm:$0xff] }
  0x4b   : > { %1085 = vst [vmem:[%s8669_s10 + $0x178] sm:$0xff] %v1084_v47  ;;  %v1182_v32 = vld [vmem:[%s8664_s23 + $0x600] sm:$0xff]  ;;  %v1184_v33 = vld [vmem:[%s8664_s23 + $0x610] sm:$0xff] }
  0x4c   : > { %1087 = vst [vmem:[%s8669_s10 + $0x180] sm:$0xff] %v1086_v48  ;;  %v1186_v34 = vld [vmem:[%s8664_s23 + $0x620] sm:$0xff]  ;;  %v1188_v35 = vld [vmem:[%s8664_s23 + $0x630] sm:$0xff] }
  0x4d   : > { %1089 = vst [vmem:[%s8669_s10 + $0x188] sm:$0xff] %v1088_v49  ;;  %v1190_v36 = vld [vmem:[%s8664_s23 + $0x640] sm:$0xff]  ;;  %v1192_v37 = vld [vmem:[%s8664_s23 + $0x650] sm:$0xff] }
  0x4e   : > { %1091 = vst [vmem:[%s8669_s10 + $0x190] sm:$0xff] %v1090_v50  ;;  %v1194_v38 = vld [vmem:[%s8664_s23 + $0x660] sm:$0xff]  ;;  %v1196_v39 = vld [vmem:[%s8664_s23 + $0x670] sm:$0xff] }
  0x4f   : > { %1093 = vst [vmem:[%s8669_s10 + $0x198] sm:$0xff] %v1092_v51  ;;  %v1198_v40 = vld [vmem:[%s8664_s23 + $0x680] sm:$0xff]  ;;  %v1200_v41 = vld [vmem:[%s8664_s23 + $0x690] sm:$0xff] }
  0x50   : > { %1095 = vst [vmem:[%s8669_s10 + $0x1a0] sm:$0xff] %v1094_v52  ;;  %v1202_v42 = vld [vmem:[%s8664_s23 + $0x6a0] sm:$0xff]  ;;  %v1204_v43 = vld [vmem:[%s8664_s23 + $0x6b0] sm:$0xff] }
  0x51   : > { %1097 = vst [vmem:[%s8669_s10 + $0x1a8] sm:$0xff] %v1096_v53  ;;  %v1206_v44 = vld [vmem:[%s8664_s23 + $0x6c0] sm:$0xff]  ;;  %v1208_v45 = vld [vmem:[%s8664_s23 + $0x6d0] sm:$0xff] }
  0x52   : > { %1099 = vst [vmem:[%s8669_s10 + $0x1b0] sm:$0xff] %v1098_v54  ;;  %v1210_v46 = vld [vmem:[%s8664_s23 + $0x6e0] sm:$0xff]  ;;  %v1212_v47 = vld [vmem:[%s8664_s23 + $0x6f0] sm:$0xff] }
  0x53   : > { %1101 = vst [vmem:[%s8669_s10 + $0x1b8] sm:$0xff] %v1100_v55  ;;  %v1214_v48 = vld [vmem:[%s8664_s23 + $0x700] sm:$0xff]  ;;  %v1216_v49 = vld [vmem:[%s8664_s23 + $0x710] sm:$0xff] }
  0x54   : > { %1103 = vst [vmem:[%s8669_s10 + $0x1c0] sm:$0xff] %v1102_v56  ;;  %v1218_v50 = vld [vmem:[%s8664_s23 + $0x720] sm:$0xff]  ;;  %v1220_v51 = vld [vmem:[%s8664_s23 + $0x730] sm:$0xff] }
  0x55   : > { %1105 = vst [vmem:[%s8669_s10 + $0x1c8] sm:$0xff] %v1104_v57  ;;  %v1222_v52 = vld [vmem:[%s8664_s23 + $0x740] sm:$0xff]  ;;  %v1224_v53 = vld [vmem:[%s8664_s23 + $0x750] sm:$0xff] }
  0x56   : > { %1107 = vst [vmem:[%s8669_s10 + $0x1d0] sm:$0xff] %v1106_v58  ;;  %v1226_v54 = vld [vmem:[%s8664_s23 + $0x760] sm:$0xff]  ;;  %v1228_v55 = vld [vmem:[%s8664_s23 + $0x770] sm:$0xff] }
  0x57   : > { %1109 = vst [vmem:[%s8669_s10 + $0x1d8] sm:$0xff] %v1108_v59  ;;  %v1230_v56 = vld [vmem:[%s8664_s23 + $0x780] sm:$0xff]  ;;  %v1232_v57 = vld [vmem:[%s8664_s23 + $0x790] sm:$0xff] }
  0x58   : > { %1111 = vst [vmem:[%s8669_s10 + $0x1e0] sm:$0xff] %v1110_v60  ;;  %v1234_v58 = vld [vmem:[%s8664_s23 + $0x7a0] sm:$0xff]  ;;  %v1236_v59 = vld [vmem:[%s8664_s23 + $0x7b0] sm:$0xff] }
  0x59   : > { %1113 = vst [vmem:[%s8669_s10 + $0x1e8] sm:$0xff] %v1112_v61  ;;  %v1238_v60 = vld [vmem:[%s8664_s23 + $0x7c0] sm:$0xff]  ;;  %v1240_v61 = vld [vmem:[%s8664_s23 + $0x7d0] sm:$0xff] }
  0x5a   : > { %1115 = vst [vmem:[%s8669_s10 + $0x1f0] sm:$0xff] %v1114_v62  ;;  %v1242_v62 = vld [vmem:[%s8664_s23 + $0x7e0] sm:$0xff] }
  0x5b   : > { %1117 = vst [vmem:[%s8669_s10 + $0x1f8] sm:$0xff] %v1116_v63  ;;  %v1244_v63 = vld [vmem:[%s8664_s23 + $0x7f0] sm:$0xff] }
  0x5c   : > { %1119 = vst [vmem:[%s8669_s10 + $0x200] sm:$0xff] %v1118_v0  ;;  %v1246_v0 = vld [vmem:[%s8664_s23 + $0x800] sm:$0xff] }
  0x5d   : > { %1121 = vst [vmem:[%s8669_s10 + $0x208] sm:$0xff] %v1120_v1  ;;  %v1248_v1 = vld [vmem:[%s8664_s23 + $0x810] sm:$0xff] }
  0x5e   : > { %1123 = vst [vmem:[%s8669_s10 + $0x210] sm:$0xff] %v1122_v2  ;;  %v1250_v2 = vld [vmem:[%s8664_s23 + $0x820] sm:$0xff] }
  0x5f   : > { %1125 = vst [vmem:[%s8669_s10 + $0x218] sm:$0xff] %v1124_v3  ;;  %v1252_v3 = vld [vmem:[%s8664_s23 + $0x830] sm:$0xff] }
  0x60   : > { %1127 = vst [vmem:[%s8669_s10 + $0x220] sm:$0xff] %v1126_v4  ;;  %v1254_v4 = vld [vmem:[%s8664_s23 + $0x840] sm:$0xff] }
  0x61   : > { %1129 = vst [vmem:[%s8669_s10 + $0x228] sm:$0xff] %v1128_v5  ;;  %v1256_v5 = vld [vmem:[%s8664_s23 + $0x850] sm:$0xff] }
  0x62   : > { %1131 = vst [vmem:[%s8669_s10 + $0x230] sm:$0xff] %v1130_v6  ;;  %v1258_v6 = vld [vmem:[%s8664_s23 + $0x860] sm:$0xff] }
  0x63   : > { %1133 = vst [vmem:[%s8669_s10 + $0x238] sm:$0xff] %v1132_v7  ;;  %v1260_v7 = vld [vmem:[%s8664_s23 + $0x870] sm:$0xff] }
  0x64   : > { %1135 = vst [vmem:[%s8669_s10 + $0x240] sm:$0xff] %v1134_v8  ;;  %v1262_v8 = vld [vmem:[%s8664_s23 + $0x880] sm:$0xff] }
  0x65   : > { %1137 = vst [vmem:[%s8669_s10 + $0x248] sm:$0xff] %v1136_v9  ;;  %v1264_v9 = vld [vmem:[%s8664_s23 + $0x890] sm:$0xff] }
  0x66   : > { %1139 = vst [vmem:[%s8669_s10 + $0x250] sm:$0xff] %v1138_v10  ;;  %v1266_v10 = vld [vmem:[%s8664_s23 + $0x8a0] sm:$0xff] }
  0x67   : > { %1141 = vst [vmem:[%s8669_s10 + $0x258] sm:$0xff] %v1140_v11  ;;  %v1268_v11 = vld [vmem:[%s8664_s23 + $0x8b0] sm:$0xff] }
  0x68   : > { %1143 = vst [vmem:[%s8669_s10 + $0x260] sm:$0xff] %v1142_v12  ;;  %v1270_v12 = vld [vmem:[%s8664_s23 + $0x8c0] sm:$0xff] }
  0x69   : > { %1145 = vst [vmem:[%s8669_s10 + $0x268] sm:$0xff] %v1144_v13  ;;  %v1272_v13 = vld [vmem:[%s8664_s23 + $0x8d0] sm:$0xff] }
  0x6a   : > { %1147 = vst [vmem:[%s8669_s10 + $0x270] sm:$0xff] %v1146_v14  ;;  %v1274_v14 = vld [vmem:[%s8664_s23 + $0x8e0] sm:$0xff] }
  0x6b   : > { %1149 = vst [vmem:[%s8669_s10 + $0x278] sm:$0xff] %v1148_v15  ;;  %v1276_v15 = vld [vmem:[%s8664_s23 + $0x8f0] sm:$0xff] }
  0x6c   : > { %1151 = vst [vmem:[%s8669_s10 + $0x280] sm:$0xff] %v1150_v16  ;;  %v1278_v16 = vld [vmem:[%s8664_s23 + $0x900] sm:$0xff] }
  0x6d   : > { %1153 = vst [vmem:[%s8669_s10 + $0x288] sm:$0xff] %v1152_v17  ;;  %v1280_v17 = vld [vmem:[%s8664_s23 + $0x910] sm:$0xff] }
  0x6e   : > { %1155 = vst [vmem:[%s8669_s10 + $0x290] sm:$0xff] %v1154_v18  ;;  %v1282_v18 = vld [vmem:[%s8664_s23 + $0x920] sm:$0xff] }
  0x6f   : > { %1157 = vst [vmem:[%s8669_s10 + $0x298] sm:$0xff] %v1156_v19  ;;  %v1284_v19 = vld [vmem:[%s8664_s23 + $0x930] sm:$0xff] }
  0x70   : > { %1159 = vst [vmem:[%s8669_s10 + $0x2a0] sm:$0xff] %v1158_v20  ;;  %v1286_v20 = vld [vmem:[%s8664_s23 + $0x940] sm:$0xff] }
  0x71   : > { %1161 = vst [vmem:[%s8669_s10 + $0x2a8] sm:$0xff] %v1160_v21  ;;  %v1288_v21 = vld [vmem:[%s8664_s23 + $0x950] sm:$0xff] }
  0x72   : > { %1163 = vst [vmem:[%s8669_s10 + $0x2b0] sm:$0xff] %v1162_v22  ;;  %v1290_v22 = vld [vmem:[%s8664_s23 + $0x960] sm:$0xff] }
  0x73   : > { %1165 = vst [vmem:[%s8669_s10 + $0x2b8] sm:$0xff] %v1164_v23  ;;  %v1292_v23 = vld [vmem:[%s8664_s23 + $0x970] sm:$0xff] }
  0x74   : > { %1167 = vst [vmem:[%s8669_s10 + $0x2c0] sm:$0xff] %v1166_v24  ;;  %v1294_v24 = vld [vmem:[%s8664_s23 + $0x980] sm:$0xff] }
  0x75   : > { %1169 = vst [vmem:[%s8669_s10 + $0x2c8] sm:$0xff] %v1168_v25  ;;  %v1296_v25 = vld [vmem:[%s8664_s23 + $0x990] sm:$0xff] }
  0x76   : > { %1171 = vst [vmem:[%s8669_s10 + $0x2d0] sm:$0xff] %v1170_v26  ;;  %v1298_v26 = vld [vmem:[%s8664_s23 + $0x9a0] sm:$0xff] }
  0x77   : > { %1173 = vst [vmem:[%s8669_s10 + $0x2d8] sm:$0xff] %v1172_v27  ;;  %v1300_v27 = vld [vmem:[%s8664_s23 + $0x9b0] sm:$0xff] }
  0x78   : > { %1175 = vst [vmem:[%s8669_s10 + $0x2e0] sm:$0xff] %v1174_v28  ;;  %v1302_v28 = vld [vmem:[%s8664_s23 + $0x9c0] sm:$0xff] }
  0x79   : > { %1177 = vst [vmem:[%s8669_s10 + $0x2e8] sm:$0xff] %v1176_v29  ;;  %v1304_v29 = vld [vmem:[%s8664_s23 + $0x9d0] sm:$0xff] }
  0x7a   : > { %1179 = vst [vmem:[%s8669_s10 + $0x2f0] sm:$0xff] %v1178_v30  ;;  %v1306_v30 = vld [vmem:[%s8664_s23 + $0x9e0] sm:$0xff] }
  0x7b   : > { %1181 = vst [vmem:[%s8669_s10 + $0x2f8] sm:$0xff] %v1180_v31  ;;  %v1308_v31 = vld [vmem:[%s8664_s23 + $0x9f0] sm:$0xff] }
  0x7c   : > { %1183 = vst [vmem:[%s8669_s10 + $0x300] sm:$0xff] %v1182_v32  ;;  %v1310_v32 = vld [vmem:[%s8664_s23 + $0xa00] sm:$0xff] }
  0x7d   : > { %1185 = vst [vmem:[%s8669_s10 + $0x308] sm:$0xff] %v1184_v33  ;;  %v1312_v33 = vld [vmem:[%s8664_s23 + $0xa10] sm:$0xff] }
  0x7e   : > { %1187 = vst [vmem:[%s8669_s10 + $0x310] sm:$0xff] %v1186_v34  ;;  %v1314_v34 = vld [vmem:[%s8664_s23 + $0xa20] sm:$0xff] }
  0x7f   : > { %1189 = vst [vmem:[%s8669_s10 + $0x318] sm:$0xff] %v1188_v35  ;;  %v1316_v35 = vld [vmem:[%s8664_s23 + $0xa30] sm:$0xff] }
  0x80   : > { %1191 = vst [vmem:[%s8669_s10 + $0x320] sm:$0xff] %v1190_v36  ;;  %v1318_v36 = vld [vmem:[%s8664_s23 + $0xa40] sm:$0xff] }
  0x81   : > { %1193 = vst [vmem:[%s8669_s10 + $0x328] sm:$0xff] %v1192_v37  ;;  %v1320_v37 = vld [vmem:[%s8664_s23 + $0xa50] sm:$0xff] }
  0x82   : > { %1195 = vst [vmem:[%s8669_s10 + $0x330] sm:$0xff] %v1194_v38  ;;  %v1322_v38 = vld [vmem:[%s8664_s23 + $0xa60] sm:$0xff] }
  0x83   : > { %1197 = vst [vmem:[%s8669_s10 + $0x338] sm:$0xff] %v1196_v39  ;;  %v1324_v39 = vld [vmem:[%s8664_s23 + $0xa70] sm:$0xff] }
  0x84   : > { %1199 = vst [vmem:[%s8669_s10 + $0x340] sm:$0xff] %v1198_v40  ;;  %v1326_v40 = vld [vmem:[%s8664_s23 + $0xa80] sm:$0xff] }
  0x85   : > { %1201 = vst [vmem:[%s8669_s10 + $0x348] sm:$0xff] %v1200_v41  ;;  %v1328_v41 = vld [vmem:[%s8664_s23 + $0xa90] sm:$0xff] }
  0x86   : > { %1203 = vst [vmem:[%s8669_s10 + $0x350] sm:$0xff] %v1202_v42  ;;  %v1330_v42 = vld [vmem:[%s8664_s23 + $0xaa0] sm:$0xff] }
  0x87   : > { %1205 = vst [vmem:[%s8669_s10 + $0x358] sm:$0xff] %v1204_v43  ;;  %v1332_v43 = vld [vmem:[%s8664_s23 + $0xab0] sm:$0xff] }
  0x88   : > { %1207 = vst [vmem:[%s8669_s10 + $0x360] sm:$0xff] %v1206_v44  ;;  %v1334_v44 = vld [vmem:[%s8664_s23 + $0xac0] sm:$0xff] }
  0x89   : > { %1209 = vst [vmem:[%s8669_s10 + $0x368] sm:$0xff] %v1208_v45  ;;  %v1336_v45 = vld [vmem:[%s8664_s23 + $0xad0] sm:$0xff] }
  0x8a   : > { %1211 = vst [vmem:[%s8669_s10 + $0x370] sm:$0xff] %v1210_v46  ;;  %v1338_v46 = vld [vmem:[%s8664_s23 + $0xae0] sm:$0xff] }
  0x8b   : > { %1213 = vst [vmem:[%s8669_s10 + $0x378] sm:$0xff] %v1212_v47  ;;  %v1340_v47 = vld [vmem:[%s8664_s23 + $0xaf0] sm:$0xff] }
  0x8c   : > { %1215 = vst [vmem:[%s8669_s10 + $0x380] sm:$0xff] %v1214_v48  ;;  %v1342_v48 = vld [vmem:[%s8664_s23 + $0xb00] sm:$0xff] }
  0x8d   : > { %1217 = vst [vmem:[%s8669_s10 + $0x388] sm:$0xff] %v1216_v49  ;;  %v1344_v49 = vld [vmem:[%s8664_s23 + $0xb10] sm:$0xff] }
  0x8e   : > { %1219 = vst [vmem:[%s8669_s10 + $0x390] sm:$0xff] %v1218_v50  ;;  %v1346_v50 = vld [vmem:[%s8664_s23 + $0xb20] sm:$0xff] }
  0x8f   : > { %1221 = vst [vmem:[%s8669_s10 + $0x398] sm:$0xff] %v1220_v51  ;;  %v1348_v51 = vld [vmem:[%s8664_s23 + $0xb30] sm:$0xff] }
  0x90   : > { %1223 = vst [vmem:[%s8669_s10 + $0x3a0] sm:$0xff] %v1222_v52  ;;  %v1350_v52 = vld [vmem:[%s8664_s23 + $0xb40] sm:$0xff] }
  0x91   : > { %1225 = vst [vmem:[%s8669_s10 + $0x3a8] sm:$0xff] %v1224_v53  ;;  %v1352_v53 = vld [vmem:[%s8664_s23 + $0xb50] sm:$0xff] }
  0x92   : > { %1227 = vst [vmem:[%s8669_s10 + $0x3b0] sm:$0xff] %v1226_v54  ;;  %v1354_v54 = vld [vmem:[%s8664_s23 + $0xb60] sm:$0xff] }
  0x93   : > { %1229 = vst [vmem:[%s8669_s10 + $0x3b8] sm:$0xff] %v1228_v55  ;;  %v1356_v55 = vld [vmem:[%s8664_s23 + $0xb70] sm:$0xff] }
  0x94   : > { %1231 = vst [vmem:[%s8669_s10 + $0x3c0] sm:$0xff] %v1230_v56  ;;  %v1358_v56 = vld [vmem:[%s8664_s23 + $0xb80] sm:$0xff] }
  0x95   : > { %1233 = vst [vmem:[%s8669_s10 + $0x3c8] sm:$0xff] %v1232_v57  ;;  %v1360_v57 = vld [vmem:[%s8664_s23 + $0xb90] sm:$0xff] }
  0x96   : > { %1235 = vst [vmem:[%s8669_s10 + $0x3d0] sm:$0xff] %v1234_v58  ;;  %v1362_v58 = vld [vmem:[%s8664_s23 + $0xba0] sm:$0xff] }
  0x97   : > { %1237 = vst [vmem:[%s8669_s10 + $0x3d8] sm:$0xff] %v1236_v59  ;;  %v1364_v59 = vld [vmem:[%s8664_s23 + $0xbb0] sm:$0xff] }
  0x98   : > { %1239 = vst [vmem:[%s8669_s10 + $0x3e0] sm:$0xff] %v1238_v60  ;;  %v1366_v60 = vld [vmem:[%s8664_s23 + $0xbc0] sm:$0xff] }
  0x99   : > { %1241 = vst [vmem:[%s8669_s10 + $0x3e8] sm:$0xff] %v1240_v61  ;;  %v1368_v61 = vld [vmem:[%s8664_s23 + $0xbd0] sm:$0xff] }
  0x9a   : > { %1243 = vst [vmem:[%s8669_s10 + $0x3f0] sm:$0xff] %v1242_v62  ;;  %v1370_v62 = vld [vmem:[%s8664_s23 + $0xbe0] sm:$0xff] }
  0x9b   : > { %1245 = vst [vmem:[%s8669_s10 + $0x3f8] sm:$0xff] %v1244_v63  ;;  %v1372_v63 = vld [vmem:[%s8664_s23 + $0xbf0] sm:$0xff] }
  0x9c   : > { %1247 = vst [vmem:[%s8669_s10 + $0x400] sm:$0xff] %v1246_v0  ;;  %v1374_v0 = vld [vmem:[%s8664_s23 + $0xc00] sm:$0xff] }
  0x9d   : > { %1249 = vst [vmem:[%s8669_s10 + $0x408] sm:$0xff] %v1248_v1  ;;  %v1376_v1 = vld [vmem:[%s8664_s23 + $0xc10] sm:$0xff] }
  0x9e   : > { %1251 = vst [vmem:[%s8669_s10 + $0x410] sm:$0xff] %v1250_v2  ;;  %v1378_v2 = vld [vmem:[%s8664_s23 + $0xc20] sm:$0xff] }
  0x9f   : > { %1253 = vst [vmem:[%s8669_s10 + $0x418] sm:$0xff] %v1252_v3  ;;  %v1380_v3 = vld [vmem:[%s8664_s23 + $0xc30] sm:$0xff] }
  0xa0   : > { %1255 = vst [vmem:[%s8669_s10 + $0x420] sm:$0xff] %v1254_v4  ;;  %v1382_v4 = vld [vmem:[%s8664_s23 + $0xc40] sm:$0xff] }
  0xa1   : > { %1257 = vst [vmem:[%s8669_s10 + $0x428] sm:$0xff] %v1256_v5  ;;  %v1384_v5 = vld [vmem:[%s8664_s23 + $0xc50] sm:$0xff] }
  0xa2   : > { %1259 = vst [vmem:[%s8669_s10 + $0x430] sm:$0xff] %v1258_v6  ;;  %v1386_v6 = vld [vmem:[%s8664_s23 + $0xc60] sm:$0xff] }
  0xa3   : > { %1261 = vst [vmem:[%s8669_s10 + $0x438] sm:$0xff] %v1260_v7  ;;  %v1388_v7 = vld [vmem:[%s8664_s23 + $0xc70] sm:$0xff] }
  0xa4   : > { %1263 = vst [vmem:[%s8669_s10 + $0x440] sm:$0xff] %v1262_v8  ;;  %v1390_v8 = vld [vmem:[%s8664_s23 + $0xc80] sm:$0xff] }
  0xa5   : > { %1265 = vst [vmem:[%s8669_s10 + $0x448] sm:$0xff] %v1264_v9  ;;  %v1392_v9 = vld [vmem:[%s8664_s23 + $0xc90] sm:$0xff] }
  0xa6   : > { %1267 = vst [vmem:[%s8669_s10 + $0x450] sm:$0xff] %v1266_v10  ;;  %v1394_v10 = vld [vmem:[%s8664_s23 + $0xca0] sm:$0xff] }
  0xa7   : > { %1269 = vst [vmem:[%s8669_s10 + $0x458] sm:$0xff] %v1268_v11  ;;  %v1396_v11 = vld [vmem:[%s8664_s23 + $0xcb0] sm:$0xff] }
  0xa8   : > { %1271 = vst [vmem:[%s8669_s10 + $0x460] sm:$0xff] %v1270_v12  ;;  %v1398_v12 = vld [vmem:[%s8664_s23 + $0xcc0] sm:$0xff] }
  0xa9   : > { %1273 = vst [vmem:[%s8669_s10 + $0x468] sm:$0xff] %v1272_v13  ;;  %v1400_v13 = vld [vmem:[%s8664_s23 + $0xcd0] sm:$0xff] }
  0xaa   : > { %1275 = vst [vmem:[%s8669_s10 + $0x470] sm:$0xff] %v1274_v14  ;;  %v1402_v14 = vld [vmem:[%s8664_s23 + $0xce0] sm:$0xff] }
  0xab   : > { %1277 = vst [vmem:[%s8669_s10 + $0x478] sm:$0xff] %v1276_v15  ;;  %v1404_v15 = vld [vmem:[%s8664_s23 + $0xcf0] sm:$0xff] }
  0xac   : > { %1279 = vst [vmem:[%s8669_s10 + $0x480] sm:$0xff] %v1278_v16  ;;  %v1406_v16 = vld [vmem:[%s8664_s23 + $0xd00] sm:$0xff] }
  0xad   : > { %1281 = vst [vmem:[%s8669_s10 + $0x488] sm:$0xff] %v1280_v17  ;;  %v1408_v17 = vld [vmem:[%s8664_s23 + $0xd10] sm:$0xff] }
  0xae   : > { %1283 = vst [vmem:[%s8669_s10 + $0x490] sm:$0xff] %v1282_v18  ;;  %v1410_v18 = vld [vmem:[%s8664_s23 + $0xd20] sm:$0xff] }
  0xaf   : > { %1285 = vst [vmem:[%s8669_s10 + $0x498] sm:$0xff] %v1284_v19  ;;  %v1412_v19 = vld [vmem:[%s8664_s23 + $0xd30] sm:$0xff] }
  0xb0   : > { %1287 = vst [vmem:[%s8669_s10 + $0x4a0] sm:$0xff] %v1286_v20  ;;  %v1414_v20 = vld [vmem:[%s8664_s23 + $0xd40] sm:$0xff] }
  0xb1   : > { %1289 = vst [vmem:[%s8669_s10 + $0x4a8] sm:$0xff] %v1288_v21  ;;  %v1416_v21 = vld [vmem:[%s8664_s23 + $0xd50] sm:$0xff] }
  0xb2   : > { %1291 = vst [vmem:[%s8669_s10 + $0x4b0] sm:$0xff] %v1290_v22  ;;  %v1418_v22 = vld [vmem:[%s8664_s23 + $0xd60] sm:$0xff] }
  0xb3   : > { %1293 = vst [vmem:[%s8669_s10 + $0x4b8] sm:$0xff] %v1292_v23  ;;  %v1420_v23 = vld [vmem:[%s8664_s23 + $0xd70] sm:$0xff] }
  0xb4   : > { %1295 = vst [vmem:[%s8669_s10 + $0x4c0] sm:$0xff] %v1294_v24  ;;  %v1422_v24 = vld [vmem:[%s8664_s23 + $0xd80] sm:$0xff] }
  0xb5   : > { %1297 = vst [vmem:[%s8669_s10 + $0x4c8] sm:$0xff] %v1296_v25  ;;  %v1424_v25 = vld [vmem:[%s8664_s23 + $0xd90] sm:$0xff] }
  0xb6   : > { %1299 = vst [vmem:[%s8669_s10 + $0x4d0] sm:$0xff] %v1298_v26  ;;  %v1426_v26 = vld [vmem:[%s8664_s23 + $0xda0] sm:$0xff] }
  0xb7   : > { %1301 = vst [vmem:[%s8669_s10 + $0x4d8] sm:$0xff] %v1300_v27  ;;  %v1428_v27 = vld [vmem:[%s8664_s23 + $0xdb0] sm:$0xff] }
  0xb8   : > { %1303 = vst [vmem:[%s8669_s10 + $0x4e0] sm:$0xff] %v1302_v28  ;;  %v1430_v28 = vld [vmem:[%s8664_s23 + $0xdc0] sm:$0xff] }
  0xb9   : > { %1305 = vst [vmem:[%s8669_s10 + $0x4e8] sm:$0xff] %v1304_v29  ;;  %v1432_v29 = vld [vmem:[%s8664_s23 + $0xdd0] sm:$0xff] }
  0xba   : > { %1307 = vst [vmem:[%s8669_s10 + $0x4f0] sm:$0xff] %v1306_v30  ;;  %v1434_v30 = vld [vmem:[%s8664_s23 + $0xde0] sm:$0xff] }
  0xbb   : > { %1309 = vst [vmem:[%s8669_s10 + $0x4f8] sm:$0xff] %v1308_v31  ;;  %v1436_v31 = vld [vmem:[%s8664_s23 + $0xdf0] sm:$0xff] }
  0xbc   : > { %1311 = vst [vmem:[%s8669_s10 + $0x500] sm:$0xff] %v1310_v32  ;;  %v1438_v32 = vld [vmem:[%s8664_s23 + $0xe00] sm:$0xff] }
  0xbd   : > { %1313 = vst [vmem:[%s8669_s10 + $0x508] sm:$0xff] %v1312_v33  ;;  %v1440_v33 = vld [vmem:[%s8664_s23 + $0xe10] sm:$0xff] }
  0xbe   : > { %1315 = vst [vmem:[%s8669_s10 + $0x510] sm:$0xff] %v1314_v34  ;;  %v1442_v34 = vld [vmem:[%s8664_s23 + $0xe20] sm:$0xff] }
  0xbf   : > { %1317 = vst [vmem:[%s8669_s10 + $0x518] sm:$0xff] %v1316_v35  ;;  %v1444_v35 = vld [vmem:[%s8664_s23 + $0xe30] sm:$0xff] }
  0xc0   : > { %1319 = vst [vmem:[%s8669_s10 + $0x520] sm:$0xff] %v1318_v36  ;;  %v1446_v36 = vld [vmem:[%s8664_s23 + $0xe40] sm:$0xff] }
  0xc1   : > { %1321 = vst [vmem:[%s8669_s10 + $0x528] sm:$0xff] %v1320_v37  ;;  %v1448_v37 = vld [vmem:[%s8664_s23 + $0xe50] sm:$0xff] }
  0xc2   : > { %1323 = vst [vmem:[%s8669_s10 + $0x530] sm:$0xff] %v1322_v38  ;;  %v1450_v38 = vld [vmem:[%s8664_s23 + $0xe60] sm:$0xff] }
  0xc3   : > { %1325 = vst [vmem:[%s8669_s10 + $0x538] sm:$0xff] %v1324_v39  ;;  %v1452_v39 = vld [vmem:[%s8664_s23 + $0xe70] sm:$0xff] }
  0xc4   : > { %1327 = vst [vmem:[%s8669_s10 + $0x540] sm:$0xff] %v1326_v40  ;;  %v1454_v40 = vld [vmem:[%s8664_s23 + $0xe80] sm:$0xff] }
  0xc5   : > { %1329 = vst [vmem:[%s8669_s10 + $0x548] sm:$0xff] %v1328_v41  ;;  %v1456_v41 = vld [vmem:[%s8664_s23 + $0xe90] sm:$0xff] }
  0xc6   : > { %1331 = vst [vmem:[%s8669_s10 + $0x550] sm:$0xff] %v1330_v42  ;;  %v1458_v42 = vld [vmem:[%s8664_s23 + $0xea0] sm:$0xff] }
  0xc7   : > { %1333 = vst [vmem:[%s8669_s10 + $0x558] sm:$0xff] %v1332_v43  ;;  %v1460_v43 = vld [vmem:[%s8664_s23 + $0xeb0] sm:$0xff] }
  0xc8   : > { %1335 = vst [vmem:[%s8669_s10 + $0x560] sm:$0xff] %v1334_v44  ;;  %v1462_v44 = vld [vmem:[%s8664_s23 + $0xec0] sm:$0xff] }
  0xc9   : > { %1337 = vst [vmem:[%s8669_s10 + $0x568] sm:$0xff] %v1336_v45  ;;  %v1464_v45 = vld [vmem:[%s8664_s23 + $0xed0] sm:$0xff] }
  0xca   : > { %1339 = vst [vmem:[%s8669_s10 + $0x570] sm:$0xff] %v1338_v46  ;;  %v1466_v46 = vld [vmem:[%s8664_s23 + $0xee0] sm:$0xff] }
  0xcb   : > { %1341 = vst [vmem:[%s8669_s10 + $0x578] sm:$0xff] %v1340_v47  ;;  %v1468_v47 = vld [vmem:[%s8664_s23 + $0xef0] sm:$0xff] }
  0xcc   : > { %1343 = vst [vmem:[%s8669_s10 + $0x580] sm:$0xff] %v1342_v48  ;;  %v1470_v48 = vld [vmem:[%s8664_s23 + $0xf00] sm:$0xff] }
  0xcd   : > { %1345 = vst [vmem:[%s8669_s10 + $0x588] sm:$0xff] %v1344_v49  ;;  %v1472_v49 = vld [vmem:[%s8664_s23 + $0xf10] sm:$0xff] }
  0xce   : > { %1347 = vst [vmem:[%s8669_s10 + $0x590] sm:$0xff] %v1346_v50  ;;  %v1474_v50 = vld [vmem:[%s8664_s23 + $0xf20] sm:$0xff] }
  0xcf   : > { %1349 = vst [vmem:[%s8669_s10 + $0x598] sm:$0xff] %v1348_v51  ;;  %v1476_v51 = vld [vmem:[%s8664_s23 + $0xf30] sm:$0xff] }
  0xd0   : > { %1351 = vst [vmem:[%s8669_s10 + $0x5a0] sm:$0xff] %v1350_v52  ;;  %v1478_v52 = vld [vmem:[%s8664_s23 + $0xf40] sm:$0xff] }
  0xd1   : > { %1353 = vst [vmem:[%s8669_s10 + $0x5a8] sm:$0xff] %v1352_v53  ;;  %v1480_v53 = vld [vmem:[%s8664_s23 + $0xf50] sm:$0xff] }
  0xd2   : > { %1355 = vst [vmem:[%s8669_s10 + $0x5b0] sm:$0xff] %v1354_v54  ;;  %v1482_v54 = vld [vmem:[%s8664_s23 + $0xf60] sm:$0xff] }
  0xd3   : > { %1357 = vst [vmem:[%s8669_s10 + $0x5b8] sm:$0xff] %v1356_v55  ;;  %v1484_v55 = vld [vmem:[%s8664_s23 + $0xf70] sm:$0xff] }
  0xd4   : > { %1359 = vst [vmem:[%s8669_s10 + $0x5c0] sm:$0xff] %v1358_v56  ;;  %v1486_v56 = vld [vmem:[%s8664_s23 + $0xf80] sm:$0xff] }
  0xd5   : > { %1361 = vst [vmem:[%s8669_s10 + $0x5c8] sm:$0xff] %v1360_v57  ;;  %v1488_v57 = vld [vmem:[%s8664_s23 + $0xf90] sm:$0xff] }
  0xd6   : > { %1363 = vst [vmem:[%s8669_s10 + $0x5d0] sm:$0xff] %v1362_v58  ;;  %v1490_v58 = vld [vmem:[%s8664_s23 + $0xfa0] sm:$0xff] }
  0xd7   : > { %1365 = vst [vmem:[%s8669_s10 + $0x5d8] sm:$0xff] %v1364_v59  ;;  %v1492_v59 = vld [vmem:[%s8664_s23 + $0xfb0] sm:$0xff] }
  0xd8   : > { %1367 = vst [vmem:[%s8669_s10 + $0x5e0] sm:$0xff] %v1366_v60  ;;  %v1494_v60 = vld [vmem:[%s8664_s23 + $0xfc0] sm:$0xff] }
  0xd9   : > { %1369 = vst [vmem:[%s8669_s10 + $0x5e8] sm:$0xff] %v1368_v61  ;;  %v1496_v61 = vld [vmem:[%s8664_s23 + $0xfd0] sm:$0xff] }
  0xda   : > { %1371 = vst [vmem:[%s8669_s10 + $0x5f0] sm:$0xff] %v1370_v62  ;;  %v1498_v62 = vld [vmem:[%s8664_s23 + $0xfe0] sm:$0xff] }
  0xdb   : > { %1373 = vst [vmem:[%s8669_s10 + $0x5f8] sm:$0xff] %v1372_v63  ;;  %v1500_v63 = vld [vmem:[%s8664_s23 + $0xff0] sm:$0xff] }
  0xdc   : > { %1375 = vst [vmem:[%s8669_s10 + $0x600] sm:$0xff] %v1374_v0  ;;  %v1502_v0 = vld [vmem:[%s8664_s23 + $0x1000] sm:$0xff] }
  0xdd   : > { %1377 = vst [vmem:[%s8669_s10 + $0x608] sm:$0xff] %v1376_v1  ;;  %v1504_v1 = vld [vmem:[%s8664_s23 + $0x1010] sm:$0xff] }
  0xde   : > { %1379 = vst [vmem:[%s8669_s10 + $0x610] sm:$0xff] %v1378_v2  ;;  %v1506_v2 = vld [vmem:[%s8664_s23 + $0x1020] sm:$0xff] }
  0xdf   : > { %1381 = vst [vmem:[%s8669_s10 + $0x618] sm:$0xff] %v1380_v3  ;;  %v1508_v3 = vld [vmem:[%s8664_s23 + $0x1030] sm:$0xff] }
  0xe0   : > { %1383 = vst [vmem:[%s8669_s10 + $0x620] sm:$0xff] %v1382_v4  ;;  %v1510_v4 = vld [vmem:[%s8664_s23 + $0x1040] sm:$0xff] }
  0xe1   : > { %1385 = vst [vmem:[%s8669_s10 + $0x628] sm:$0xff] %v1384_v5  ;;  %v1512_v5 = vld [vmem:[%s8664_s23 + $0x1050] sm:$0xff] }
  0xe2   : > { %1387 = vst [vmem:[%s8669_s10 + $0x630] sm:$0xff] %v1386_v6  ;;  %v1514_v6 = vld [vmem:[%s8664_s23 + $0x1060] sm:$0xff] }
  0xe3   : > { %1389 = vst [vmem:[%s8669_s10 + $0x638] sm:$0xff] %v1388_v7  ;;  %v1516_v7 = vld [vmem:[%s8664_s23 + $0x1070] sm:$0xff] }
  0xe4   : > { %1391 = vst [vmem:[%s8669_s10 + $0x640] sm:$0xff] %v1390_v8  ;;  %v1518_v8 = vld [vmem:[%s8664_s23 + $0x1080] sm:$0xff] }
  0xe5   : > { %1393 = vst [vmem:[%s8669_s10 + $0x648] sm:$0xff] %v1392_v9  ;;  %v1520_v9 = vld [vmem:[%s8664_s23 + $0x1090] sm:$0xff] }
  0xe6   : > { %1395 = vst [vmem:[%s8669_s10 + $0x650] sm:$0xff] %v1394_v10  ;;  %v1522_v10 = vld [vmem:[%s8664_s23 + $0x10a0] sm:$0xff] }
  0xe7   : > { %1397 = vst [vmem:[%s8669_s10 + $0x658] sm:$0xff] %v1396_v11  ;;  %v1524_v11 = vld [vmem:[%s8664_s23 + $0x10b0] sm:$0xff] }
  0xe8   : > { %1399 = vst [vmem:[%s8669_s10 + $0x660] sm:$0xff] %v1398_v12  ;;  %v1526_v12 = vld [vmem:[%s8664_s23 + $0x10c0] sm:$0xff] }
  0xe9   : > { %1401 = vst [vmem:[%s8669_s10 + $0x668] sm:$0xff] %v1400_v13  ;;  %v1528_v13 = vld [vmem:[%s8664_s23 + $0x10d0] sm:$0xff] }
  0xea   : > { %1403 = vst [vmem:[%s8669_s10 + $0x670] sm:$0xff] %v1402_v14  ;;  %v1530_v14 = vld [vmem:[%s8664_s23 + $0x10e0] sm:$0xff] }
  0xeb   : > { %1405 = vst [vmem:[%s8669_s10 + $0x678] sm:$0xff] %v1404_v15  ;;  %v1532_v15 = vld [vmem:[%s8664_s23 + $0x10f0] sm:$0xff] }
  0xec   : > { %1407 = vst [vmem:[%s8669_s10 + $0x680] sm:$0xff] %v1406_v16  ;;  %v1534_v16 = vld [vmem:[%s8664_s23 + $0x1100] sm:$0xff] }
  0xed   : > { %1409 = vst [vmem:[%s8669_s10 + $0x688] sm:$0xff] %v1408_v17  ;;  %v1536_v17 = vld [vmem:[%s8664_s23 + $0x1110] sm:$0xff] }
  0xee   : > { %1411 = vst [vmem:[%s8669_s10 + $0x690] sm:$0xff] %v1410_v18  ;;  %v1538_v18 = vld [vmem:[%s8664_s23 + $0x1120] sm:$0xff] }
  0xef   : > { %1413 = vst [vmem:[%s8669_s10 + $0x698] sm:$0xff] %v1412_v19  ;;  %v1540_v19 = vld [vmem:[%s8664_s23 + $0x1130] sm:$0xff] }
  0xf0   : > { %1415 = vst [vmem:[%s8669_s10 + $0x6a0] sm:$0xff] %v1414_v20  ;;  %v1542_v20 = vld [vmem:[%s8664_s23 + $0x1140] sm:$0xff] }
  0xf1   : > { %1417 = vst [vmem:[%s8669_s10 + $0x6a8] sm:$0xff] %v1416_v21  ;;  %v1544_v21 = vld [vmem:[%s8664_s23 + $0x1150] sm:$0xff] }
  0xf2   : > { %1419 = vst [vmem:[%s8669_s10 + $0x6b0] sm:$0xff] %v1418_v22  ;;  %v1546_v22 = vld [vmem:[%s8664_s23 + $0x1160] sm:$0xff] }
  0xf3   : > { %1421 = vst [vmem:[%s8669_s10 + $0x6b8] sm:$0xff] %v1420_v23  ;;  %v1548_v23 = vld [vmem:[%s8664_s23 + $0x1170] sm:$0xff] }
  0xf4   : > { %1423 = vst [vmem:[%s8669_s10 + $0x6c0] sm:$0xff] %v1422_v24  ;;  %v1550_v24 = vld [vmem:[%s8664_s23 + $0x1180] sm:$0xff] }
  0xf5   : > { %1425 = vst [vmem:[%s8669_s10 + $0x6c8] sm:$0xff] %v1424_v25  ;;  %v1552_v25 = vld [vmem:[%s8664_s23 + $0x1190] sm:$0xff] }
  0xf6   : > { %1427 = vst [vmem:[%s8669_s10 + $0x6d0] sm:$0xff] %v1426_v26  ;;  %v1554_v26 = vld [vmem:[%s8664_s23 + $0x11a0] sm:$0xff] }
  0xf7   : > { %1429 = vst [vmem:[%s8669_s10 + $0x6d8] sm:$0xff] %v1428_v27  ;;  %v1556_v27 = vld [vmem:[%s8664_s23 + $0x11b0] sm:$0xff] }
  0xf8   : > { %1431 = vst [vmem:[%s8669_s10 + $0x6e0] sm:$0xff] %v1430_v28  ;;  %v1558_v28 = vld [vmem:[%s8664_s23 + $0x11c0] sm:$0xff] }
  0xf9   : > { %1433 = vst [vmem:[%s8669_s10 + $0x6e8] sm:$0xff] %v1432_v29  ;;  %v1560_v29 = vld [vmem:[%s8664_s23 + $0x11d0] sm:$0xff] }
  0xfa   : > { %1435 = vst [vmem:[%s8669_s10 + $0x6f0] sm:$0xff] %v1434_v30  ;;  %v1562_v30 = vld [vmem:[%s8664_s23 + $0x11e0] sm:$0xff] }
  0xfb   : > { %1437 = vst [vmem:[%s8669_s10 + $0x6f8] sm:$0xff] %v1436_v31  ;;  %v1564_v31 = vld [vmem:[%s8664_s23 + $0x11f0] sm:$0xff] }
  0xfc   : > { %1439 = vst [vmem:[%s8669_s10 + $0x700] sm:$0xff] %v1438_v32  ;;  %v1566_v32 = vld [vmem:[%s8664_s23 + $0x1200] sm:$0xff] }
  0xfd   : > { %1441 = vst [vmem:[%s8669_s10 + $0x708] sm:$0xff] %v1440_v33  ;;  %v1568_v33 = vld [vmem:[%s8664_s23 + $0x1210] sm:$0xff] }
  0xfe   : > { %1443 = vst [vmem:[%s8669_s10 + $0x710] sm:$0xff] %v1442_v34  ;;  %v1570_v34 = vld [vmem:[%s8664_s23 + $0x1220] sm:$0xff] }
  0xff   : > { %1445 = vst [vmem:[%s8669_s10 + $0x718] sm:$0xff] %v1444_v35  ;;  %v1572_v35 = vld [vmem:[%s8664_s23 + $0x1230] sm:$0xff] }
 0x100   : > { %1447 = vst [vmem:[%s8669_s10 + $0x720] sm:$0xff] %v1446_v36  ;;  %v1574_v36 = vld [vmem:[%s8664_s23 + $0x1240] sm:$0xff] }
 0x101   : > { %1449 = vst [vmem:[%s8669_s10 + $0x728] sm:$0xff] %v1448_v37  ;;  %v1576_v37 = vld [vmem:[%s8664_s23 + $0x1250] sm:$0xff] }
 0x102   : > { %1451 = vst [vmem:[%s8669_s10 + $0x730] sm:$0xff] %v1450_v38  ;;  %v1578_v38 = vld [vmem:[%s8664_s23 + $0x1260] sm:$0xff] }
 0x103   : > { %1453 = vst [vmem:[%s8669_s10 + $0x738] sm:$0xff] %v1452_v39  ;;  %v1580_v39 = vld [vmem:[%s8664_s23 + $0x1270] sm:$0xff] }
 0x104   : > { %1455 = vst [vmem:[%s8669_s10 + $0x740] sm:$0xff] %v1454_v40  ;;  %v1582_v40 = vld [vmem:[%s8664_s23 + $0x1280] sm:$0xff] }
 0x105   : > { %1457 = vst [vmem:[%s8669_s10 + $0x748] sm:$0xff] %v1456_v41  ;;  %v1584_v41 = vld [vmem:[%s8664_s23 + $0x1290] sm:$0xff] }
 0x106   : > { %1459 = vst [vmem:[%s8669_s10 + $0x750] sm:$0xff] %v1458_v42  ;;  %v1586_v42 = vld [vmem:[%s8664_s23 + $0x12a0] sm:$0xff] }
 0x107   : > { %1461 = vst [vmem:[%s8669_s10 + $0x758] sm:$0xff] %v1460_v43  ;;  %v1588_v43 = vld [vmem:[%s8664_s23 + $0x12b0] sm:$0xff] }
 0x108   : > { %1463 = vst [vmem:[%s8669_s10 + $0x760] sm:$0xff] %v1462_v44  ;;  %v1590_v44 = vld [vmem:[%s8664_s23 + $0x12c0] sm:$0xff] }
 0x109   : > { %1465 = vst [vmem:[%s8669_s10 + $0x768] sm:$0xff] %v1464_v45  ;;  %v1592_v45 = vld [vmem:[%s8664_s23 + $0x12d0] sm:$0xff] }
 0x10a   : > { %1467 = vst [vmem:[%s8669_s10 + $0x770] sm:$0xff] %v1466_v46  ;;  %v1594_v46 = vld [vmem:[%s8664_s23 + $0x12e0] sm:$0xff] }
 0x10b   : > { %1469 = vst [vmem:[%s8669_s10 + $0x778] sm:$0xff] %v1468_v47  ;;  %v1596_v47 = vld [vmem:[%s8664_s23 + $0x12f0] sm:$0xff] }
 0x10c   : > { %1471 = vst [vmem:[%s8669_s10 + $0x780] sm:$0xff] %v1470_v48  ;;  %v1598_v48 = vld [vmem:[%s8664_s23 + $0x1300] sm:$0xff] }
 0x10d   : > { %1473 = vst [vmem:[%s8669_s10 + $0x788] sm:$0xff] %v1472_v49  ;;  %v1600_v49 = vld [vmem:[%s8664_s23 + $0x1310] sm:$0xff] }
 0x10e   : > { %1475 = vst [vmem:[%s8669_s10 + $0x790] sm:$0xff] %v1474_v50  ;;  %v1602_v50 = vld [vmem:[%s8664_s23 + $0x1320] sm:$0xff] }
 0x10f   : > { %1477 = vst [vmem:[%s8669_s10 + $0x798] sm:$0xff] %v1476_v51  ;;  %v1604_v51 = vld [vmem:[%s8664_s23 + $0x1330] sm:$0xff] }
 0x110   : > { %1479 = vst [vmem:[%s8669_s10 + $0x7a0] sm:$0xff] %v1478_v52  ;;  %v1606_v52 = vld [vmem:[%s8664_s23 + $0x1340] sm:$0xff] }
 0x111   : > { %1481 = vst [vmem:[%s8669_s10 + $0x7a8] sm:$0xff] %v1480_v53  ;;  %v1608_v53 = vld [vmem:[%s8664_s23 + $0x1350] sm:$0xff] }
 0x112   : > { %1483 = vst [vmem:[%s8669_s10 + $0x7b0] sm:$0xff] %v1482_v54  ;;  %v1610_v54 = vld [vmem:[%s8664_s23 + $0x1360] sm:$0xff] }
 0x113   : > { %1485 = vst [vmem:[%s8669_s10 + $0x7b8] sm:$0xff] %v1484_v55  ;;  %v1612_v55 = vld [vmem:[%s8664_s23 + $0x1370] sm:$0xff] }
 0x114   : > { %1487 = vst [vmem:[%s8669_s10 + $0x7c0] sm:$0xff] %v1486_v56  ;;  %v1614_v56 = vld [vmem:[%s8664_s23 + $0x1380] sm:$0xff] }
 0x115   : > { %1489 = vst [vmem:[%s8669_s10 + $0x7c8] sm:$0xff] %v1488_v57  ;;  %v1616_v57 = vld [vmem:[%s8664_s23 + $0x1390] sm:$0xff] }
 0x116   : > { %1491 = vst [vmem:[%s8669_s10 + $0x7d0] sm:$0xff] %v1490_v58  ;;  %v1618_v58 = vld [vmem:[%s8664_s23 + $0x13a0] sm:$0xff] }
 0x117   : > { %1493 = vst [vmem:[%s8669_s10 + $0x7d8] sm:$0xff] %v1492_v59  ;;  %v1620_v59 = vld [vmem:[%s8664_s23 + $0x13b0] sm:$0xff] }
 0x118   : > { %1495 = vst [vmem:[%s8669_s10 + $0x7e0] sm:$0xff] %v1494_v60  ;;  %v1622_v60 = vld [vmem:[%s8664_s23 + $0x13c0] sm:$0xff] }
 0x119   : > { %1497 = vst [vmem:[%s8669_s10 + $0x7e8] sm:$0xff] %v1496_v61  ;;  %v1624_v61 = vld [vmem:[%s8664_s23 + $0x13d0] sm:$0xff] }
 0x11a   : > { %1499 = vst [vmem:[%s8669_s10 + $0x7f0] sm:$0xff] %v1498_v62  ;;  %v1626_v62 = vld [vmem:[%s8664_s23 + $0x13e0] sm:$0xff] }
 0x11b   : > { %1501 = vst [vmem:[%s8669_s10 + $0x7f8] sm:$0xff] %v1500_v63  ;;  %v1628_v63 = vld [vmem:[%s8664_s23 + $0x13f0] sm:$0xff] }
 0x11c   : > { %1503 = vst [vmem:[%s8669_s10 + $0x800] sm:$0xff] %v1502_v0  ;;  %v1630_v0 = vld [vmem:[%s8664_s23 + $0x1400] sm:$0xff] }
 0x11d   : > { %1505 = vst [vmem:[%s8669_s10 + $0x808] sm:$0xff] %v1504_v1  ;;  %v1632_v1 = vld [vmem:[%s8664_s23 + $0x1410] sm:$0xff] }
 0x11e   : > { %1507 = vst [vmem:[%s8669_s10 + $0x810] sm:$0xff] %v1506_v2  ;;  %v1634_v2 = vld [vmem:[%s8664_s23 + $0x1420] sm:$0xff] }
 0x11f   : > { %1509 = vst [vmem:[%s8669_s10 + $0x818] sm:$0xff] %v1508_v3  ;;  %v1636_v3 = vld [vmem:[%s8664_s23 + $0x1430] sm:$0xff] }
 0x120   : > { %1511 = vst [vmem:[%s8669_s10 + $0x820] sm:$0xff] %v1510_v4  ;;  %v1638_v4 = vld [vmem:[%s8664_s23 + $0x1440] sm:$0xff] }
 0x121   : > { %1513 = vst [vmem:[%s8669_s10 + $0x828] sm:$0xff] %v1512_v5  ;;  %v1640_v5 = vld [vmem:[%s8664_s23 + $0x1450] sm:$0xff] }
 0x122   : > { %1515 = vst [vmem:[%s8669_s10 + $0x830] sm:$0xff] %v1514_v6  ;;  %v1642_v6 = vld [vmem:[%s8664_s23 + $0x1460] sm:$0xff] }
 0x123   : > { %1517 = vst [vmem:[%s8669_s10 + $0x838] sm:$0xff] %v1516_v7  ;;  %v1644_v7 = vld [vmem:[%s8664_s23 + $0x1470] sm:$0xff] }
 0x124   : > { %1519 = vst [vmem:[%s8669_s10 + $0x840] sm:$0xff] %v1518_v8  ;;  %v1646_v8 = vld [vmem:[%s8664_s23 + $0x1480] sm:$0xff] }
 0x125   : > { %1521 = vst [vmem:[%s8669_s10 + $0x848] sm:$0xff] %v1520_v9  ;;  %v1648_v9 = vld [vmem:[%s8664_s23 + $0x1490] sm:$0xff] }
 0x126   : > { %1523 = vst [vmem:[%s8669_s10 + $0x850] sm:$0xff] %v1522_v10  ;;  %v1650_v10 = vld [vmem:[%s8664_s23 + $0x14a0] sm:$0xff] }
 0x127   : > { %1525 = vst [vmem:[%s8669_s10 + $0x858] sm:$0xff] %v1524_v11  ;;  %v1652_v11 = vld [vmem:[%s8664_s23 + $0x14b0] sm:$0xff] }
 0x128   : > { %1527 = vst [vmem:[%s8669_s10 + $0x860] sm:$0xff] %v1526_v12  ;;  %v1654_v12 = vld [vmem:[%s8664_s23 + $0x14c0] sm:$0xff] }
 0x129   : > { %1529 = vst [vmem:[%s8669_s10 + $0x868] sm:$0xff] %v1528_v13  ;;  %v1656_v13 = vld [vmem:[%s8664_s23 + $0x14d0] sm:$0xff] }
 0x12a   : > { %1531 = vst [vmem:[%s8669_s10 + $0x870] sm:$0xff] %v1530_v14  ;;  %v1658_v14 = vld [vmem:[%s8664_s23 + $0x14e0] sm:$0xff] }
 0x12b   : > { %1533 = vst [vmem:[%s8669_s10 + $0x878] sm:$0xff] %v1532_v15  ;;  %v1660_v15 = vld [vmem:[%s8664_s23 + $0x14f0] sm:$0xff] }
 0x12c   : > { %1535 = vst [vmem:[%s8669_s10 + $0x880] sm:$0xff] %v1534_v16  ;;  %v1662_v16 = vld [vmem:[%s8664_s23 + $0x1500] sm:$0xff] }
 0x12d   : > { %1537 = vst [vmem:[%s8669_s10 + $0x888] sm:$0xff] %v1536_v17  ;;  %v1664_v17 = vld [vmem:[%s8664_s23 + $0x1510] sm:$0xff] }
 0x12e   : > { %1539 = vst [vmem:[%s8669_s10 + $0x890] sm:$0xff] %v1538_v18  ;;  %v1666_v18 = vld [vmem:[%s8664_s23 + $0x1520] sm:$0xff] }
 0x12f   : > { %1541 = vst [vmem:[%s8669_s10 + $0x898] sm:$0xff] %v1540_v19  ;;  %v1668_v19 = vld [vmem:[%s8664_s23 + $0x1530] sm:$0xff] }
 0x130   : > { %1543 = vst [vmem:[%s8669_s10 + $0x8a0] sm:$0xff] %v1542_v20  ;;  %v1670_v20 = vld [vmem:[%s8664_s23 + $0x1540] sm:$0xff] }
 0x131   : > { %1545 = vst [vmem:[%s8669_s10 + $0x8a8] sm:$0xff] %v1544_v21  ;;  %v1672_v21 = vld [vmem:[%s8664_s23 + $0x1550] sm:$0xff] }
 0x132   : > { %1547 = vst [vmem:[%s8669_s10 + $0x8b0] sm:$0xff] %v1546_v22  ;;  %v1674_v22 = vld [vmem:[%s8664_s23 + $0x1560] sm:$0xff] }
 0x133   : > { %1549 = vst [vmem:[%s8669_s10 + $0x8b8] sm:$0xff] %v1548_v23  ;;  %v1676_v23 = vld [vmem:[%s8664_s23 + $0x1570] sm:$0xff] }
 0x134   : > { %1551 = vst [vmem:[%s8669_s10 + $0x8c0] sm:$0xff] %v1550_v24  ;;  %v1678_v24 = vld [vmem:[%s8664_s23 + $0x1580] sm:$0xff] }
 0x135   : > { %1553 = vst [vmem:[%s8669_s10 + $0x8c8] sm:$0xff] %v1552_v25  ;;  %v1680_v25 = vld [vmem:[%s8664_s23 + $0x1590] sm:$0xff] }
 0x136   : > { %1555 = vst [vmem:[%s8669_s10 + $0x8d0] sm:$0xff] %v1554_v26  ;;  %v1682_v26 = vld [vmem:[%s8664_s23 + $0x15a0] sm:$0xff] }
 0x137   : > { %1557 = vst [vmem:[%s8669_s10 + $0x8d8] sm:$0xff] %v1556_v27  ;;  %v1684_v27 = vld [vmem:[%s8664_s23 + $0x15b0] sm:$0xff] }
 0x138   : > { %1559 = vst [vmem:[%s8669_s10 + $0x8e0] sm:$0xff] %v1558_v28  ;;  %v1686_v28 = vld [vmem:[%s8664_s23 + $0x15c0] sm:$0xff] }
 0x139   : > { %1561 = vst [vmem:[%s8669_s10 + $0x8e8] sm:$0xff] %v1560_v29  ;;  %v1688_v29 = vld [vmem:[%s8664_s23 + $0x15d0] sm:$0xff] }
 0x13a   : > { %1563 = vst [vmem:[%s8669_s10 + $0x8f0] sm:$0xff] %v1562_v30  ;;  %v1690_v30 = vld [vmem:[%s8664_s23 + $0x15e0] sm:$0xff] }
 0x13b   : > { %1565 = vst [vmem:[%s8669_s10 + $0x8f8] sm:$0xff] %v1564_v31  ;;  %v1692_v31 = vld [vmem:[%s8664_s23 + $0x15f0] sm:$0xff] }
 0x13c   : > { %1567 = vst [vmem:[%s8669_s10 + $0x900] sm:$0xff] %v1566_v32 }
 0x13d   : > { %1569 = vst [vmem:[%s8669_s10 + $0x908] sm:$0xff] %v1568_v33 }
 0x13e   : > { %1571 = vst [vmem:[%s8669_s10 + $0x910] sm:$0xff] %v1570_v34 }
 0x13f   : > { %1573 = vst [vmem:[%s8669_s10 + $0x918] sm:$0xff] %v1572_v35 }
 0x140   : > { %1575 = vst [vmem:[%s8669_s10 + $0x920] sm:$0xff] %v1574_v36 }
 0x141   : > { %1577 = vst [vmem:[%s8669_s10 + $0x928] sm:$0xff] %v1576_v37 }
 0x142   : > { %1579 = vst [vmem:[%s8669_s10 + $0x930] sm:$0xff] %v1578_v38 }
 0x143   : > { %1581 = vst [vmem:[%s8669_s10 + $0x938] sm:$0xff] %v1580_v39 }
 0x144   : > { %1583 = vst [vmem:[%s8669_s10 + $0x940] sm:$0xff] %v1582_v40 }
 0x145   : > { %1585 = vst [vmem:[%s8669_s10 + $0x948] sm:$0xff] %v1584_v41 }
 0x146   : > { %1587 = vst [vmem:[%s8669_s10 + $0x950] sm:$0xff] %v1586_v42 }
 0x147   : > { %1589 = vst [vmem:[%s8669_s10 + $0x958] sm:$0xff] %v1588_v43 }
 0x148   : > { %1591 = vst [vmem:[%s8669_s10 + $0x960] sm:$0xff] %v1590_v44 }
 0x149   : > { %1593 = vst [vmem:[%s8669_s10 + $0x968] sm:$0xff] %v1592_v45 }
 0x14a   : > { %1595 = vst [vmem:[%s8669_s10 + $0x970] sm:$0xff] %v1594_v46 }
 0x14b   : > { %1597 = vst [vmem:[%s8669_s10 + $0x978] sm:$0xff] %v1596_v47 }
 0x14c   : > { %1599 = vst [vmem:[%s8669_s10 + $0x980] sm:$0xff] %v1598_v48 }
 0x14d   : > { %1601 = vst [vmem:[%s8669_s10 + $0x988] sm:$0xff] %v1600_v49 }
 0x14e   : > { %1603 = vst [vmem:[%s8669_s10 + $0x990] sm:$0xff] %v1602_v50 }
 0x14f   : > { %1605 = vst [vmem:[%s8669_s10 + $0x998] sm:$0xff] %v1604_v51 }
 0x150   : > { %1607 = vst [vmem:[%s8669_s10 + $0x9a0] sm:$0xff] %v1606_v52 }
 0x151   : > { %1609 = vst [vmem:[%s8669_s10 + $0x9a8] sm:$0xff] %v1608_v53 }
 0x152   : > { %1611 = vst [vmem:[%s8669_s10 + $0x9b0] sm:$0xff] %v1610_v54 }
 0x153   : > { %1613 = vst [vmem:[%s8669_s10 + $0x9b8] sm:$0xff] %v1612_v55 }
 0x154   : > { %1615 = vst [vmem:[%s8669_s10 + $0x9c0] sm:$0xff] %v1614_v56 }
 0x155   : > { %1617 = vst [vmem:[%s8669_s10 + $0x9c8] sm:$0xff] %v1616_v57 }
 0x156   : > { %1619 = vst [vmem:[%s8669_s10 + $0x9d0] sm:$0xff] %v1618_v58 }
 0x157   : > { %1621 = vst [vmem:[%s8669_s10 + $0x9d8] sm:$0xff] %v1620_v59 }
 0x158   : > { %1623 = vst [vmem:[%s8669_s10 + $0x9e0] sm:$0xff] %v1622_v60 }
 0x159   : > { %1625 = vst [vmem:[%s8669_s10 + $0x9e8] sm:$0xff] %v1624_v61 }
 0x15a   : > { %1627 = vst [vmem:[%s8669_s10 + $0x9f0] sm:$0xff] %v1626_v62 }
 0x15b   : > { %1629 = vst [vmem:[%s8669_s10 + $0x9f8] sm:$0xff] %v1628_v63 }
 0x15c   : > { %1631 = vst [vmem:[%s8669_s10 + $0xa00] sm:$0xff] %v1630_v0 }
 0x15d   : > { %1633 = vst [vmem:[%s8669_s10 + $0xa08] sm:$0xff] %v1632_v1 }
 0x15e   : > { %1635 = vst [vmem:[%s8669_s10 + $0xa10] sm:$0xff] %v1634_v2 }
 0x15f   : > { %1637 = vst [vmem:[%s8669_s10 + $0xa18] sm:$0xff] %v1636_v3 }
 0x160   : > { %1639 = vst [vmem:[%s8669_s10 + $0xa20] sm:$0xff] %v1638_v4 }
 0x161   : > { %1641 = vst [vmem:[%s8669_s10 + $0xa28] sm:$0xff] %v1640_v5 }
 0x162   : > { %1643 = vst [vmem:[%s8669_s10 + $0xa30] sm:$0xff] %v1642_v6 }
 0x163   : > { %1645 = vst [vmem:[%s8669_s10 + $0xa38] sm:$0xff] %v1644_v7 }
 0x164   : > { %1647 = vst [vmem:[%s8669_s10 + $0xa40] sm:$0xff] %v1646_v8 }
 0x165   : > { %1649 = vst [vmem:[%s8669_s10 + $0xa48] sm:$0xff] %v1648_v9 }
 0x166   : > { %1651 = vst [vmem:[%s8669_s10 + $0xa50] sm:$0xff] %v1650_v10 }
 0x167   : > { %1653 = vst [vmem:[%s8669_s10 + $0xa58] sm:$0xff] %v1652_v11 }
 0x168   : > { %1655 = vst [vmem:[%s8669_s10 + $0xa60] sm:$0xff] %v1654_v12 }
 0x169   : > { %1657 = vst [vmem:[%s8669_s10 + $0xa68] sm:$0xff] %v1656_v13 }
 0x16a   : > { %1659 = vst [vmem:[%s8669_s10 + $0xa70] sm:$0xff] %v1658_v14 }
 0x16b   : > { %1661 = vst [vmem:[%s8669_s10 + $0xa78] sm:$0xff] %v1660_v15 }
 0x16c   : > { %1663 = vst [vmem:[%s8669_s10 + $0xa80] sm:$0xff] %v1662_v16 }
 0x16d   : > { %1665 = vst [vmem:[%s8669_s10 + $0xa88] sm:$0xff] %v1664_v17 }
 0x16e   : > { %1667 = vst [vmem:[%s8669_s10 + $0xa90] sm:$0xff] %v1666_v18 }
 0x16f   : > { %1669 = vst [vmem:[%s8669_s10 + $0xa98] sm:$0xff] %v1668_v19 }
 0x170   : > { %1671 = vst [vmem:[%s8669_s10 + $0xaa0] sm:$0xff] %v1670_v20 }
 0x171   : > { %1673 = vst [vmem:[%s8669_s10 + $0xaa8] sm:$0xff] %v1672_v21 }
 0x172   : > { %1675 = vst [vmem:[%s8669_s10 + $0xab0] sm:$0xff] %v1674_v22 }
 0x173   : > { %1677 = vst [vmem:[%s8669_s10 + $0xab8] sm:$0xff] %v1676_v23 }
 0x174   : > { %1679 = vst [vmem:[%s8669_s10 + $0xac0] sm:$0xff] %v1678_v24 }
 0x175   : > { %1681 = vst [vmem:[%s8669_s10 + $0xac8] sm:$0xff] %v1680_v25 }
 0x176   : > { %1683 = vst [vmem:[%s8669_s10 + $0xad0] sm:$0xff] %v1682_v26 }
 0x177   : > { %1685 = vst [vmem:[%s8669_s10 + $0xad8] sm:$0xff] %v1684_v27 }
 0x178   : > { %1687 = vst [vmem:[%s8669_s10 + $0xae0] sm:$0xff] %v1686_v28 }
 0x179   : > { %1689 = vst [vmem:[%s8669_s10 + $0xae8] sm:$0xff] %v1688_v29 }
 0x17a   : > { %1691 = vst [vmem:[%s8669_s10 + $0xaf0] sm:$0xff] %v1690_v30 }
 0x17b   : > { %1693 = vst [vmem:[%s8669_s10 + $0xaf8] sm:$0xff] %v1692_v31 }
 0x17c PF: > { %p6629_p7 = scmp.ge.s32.totalorder %s8561_s30, 1  ;;  %p3158_p8 = scmp.lt.s32.totalorder %s8561_s30, 5 }
 0x17e   : > { %p3159_p9 = pnand %p6629_p7, %p3158_p8 }
 0x17f   : > { %s3165_s11 = sand.u32 (!%p3159_p9), 1, %s8537_s24   ;;  %s6630_s12 = sshll.u32 (!%p3159_p9), %s8549_s27, 1 }
 0x180   : > { %3162 = sbr.rel (%p3159_p9) target bundleno = 1254 (0x4e6), region = 96  ;;  %p3207_p10 = scmp.lt.s32.totalorder (!%p3159_p9), %s6630_s12, 3 }
 0x181   : > { %s8445_s13 = smul.u32 (!%p3159_p9), 2816, %s3165_s11  ;;  %s6631_s15 = sshll.u32 (!%p3159_p9), %s8549_s27, 5 }
 0x182   : > { %p3217_p11 = scmp.lt.s32.totalorder (!%p3159_p9), %s8549_s27, 1  ;;  %p3212_p12 = scmp.lt.s32.totalorder (!%p3159_p9), %s6631_s15, 63 }
 0x183   : > { %s9395_s4 = scalar_lea.vmem (!%p3159_p9), [#allocation4], %s8445_s13  ;;  %p6634_p13 = scmp.ne.s32.totalorder (!%p3159_p9), %s8545_s26, 0 }
 0x185   : > { %s10417_s12 = smov (!%p3207_p10, %s6630_s12), 3  ;;  %s10419_s15 = smov (!%p3212_p12, %s6631_s15), 63 }
 0x186   : > { %s3209_s18 = scalar_lea.vmem %s10399_s5, %s10417_s12  ;;  %s6632_s19 = sshll.u32 %s10419_s15, 3 }
 0x187   : > { %s9387_s22 = scalar_lea.vmem %s10400_s6, %s6632_s19  ;;  %s10421_s27 = smov (!%p3217_p11, %s8549_s27), 1 }
 0x188   : > { %s6633_s24 = sshll.u32 %s10421_s27, 3  ;;  %3224 = sbr.rel (%p6634_p13) target bundleno = 596 (0x254), region = 104 }
 0x189   : > { %s9393_s11 = scalar_lea.vmem %s10401_s7, %s6633_s24 }
 0x18d   : > { %v3237_v32 = vld [vmem:[%s10395_s1 + $0x38] sm:$0xff]  ;;  %v3236_v33 = vld [vmem:[%s10395_s1 + $0x30] sm:$0xff]  ;;  %v8563_v34 = vmov 0.0   ;;  %v3235_v35 = vld [vmem:[%s10395_s1 + $0x28] sm:$0xff]  ;;  %vm3238_vm0 = vcmask 523264  }
 0x18e   : > { %3357 = vmatpush.msra.mxu2 %v3237_v32  ;;  %3405 = vmatpush.msra.mxu3 %v3237_v32  ;;  %3225 = vst [vmem:[#allocation3] sm:$0xff] %v8563_v34  ;;  %v3234_v36 = vld [vmem:[%s10395_s1 + $0x20] sm:$0xff]  ;;  %v3233_v37 = vld [vmem:[%s10395_s1 + $0x18] sm:$0xff]  ;;  %v9416_v38 = vld [vmem:[%s10395_s1 + $0x10] sm:$0xff] }
 0x18f   : > { %3226 = vst [vmem:[#allocation3 + $0x8] sm:$0xff] %v8563_v34  ;;  %3256 = vmatpush.msra.mxu0 %v3237_v32  ;;  %3309 = vmatpush.msra.mxu1 %v3237_v32  ;;  %v9421_v39 = vld [vmem:[%s10395_s1 + $0x8] sm:$0xff]  ;;  %v9430_v40 = vld [vmem:[%s10395_s1] sm:$0xff]  ;;  %v6650_v42 = vld [vmem:[%s10394_s0 + $0x90] sm:$0xff] }
 0x190   : > { %3358 = vmatpush.msra.mxu2 %v3236_v33  ;;  %3406 = vmatpush.msra.mxu3 %v3236_v33  ;;  %v6644_v41 = vld [vmem:[%s10394_s0 + $0x60] sm:$0xff]  ;;  %v6638_v44 = vld [vmem:[%s10394_s0 + $0x30] sm:$0xff]  ;;  %v6645_v45 = vld [vmem:[%s10394_s0 + $0x68] sm:$0xff] }
 0x191   : > { %3257 = vmatpush.msra.mxu0 %v3236_v33  ;;  %3310 = vmatpush.msra.mxu1 %v3236_v33  ;;  %v3227_v43 = vld [vmem:[%s10394_s0] sm:$0xff]  ;;  %v6651_v46 = vld [vmem:[%s10394_s0 + $0x98] sm:$0xff]  ;;  %v3228_v47 = vld [vmem:[%s10394_s0 + $0x8] sm:$0xff] }
 0x192   : > { %3359 = vmatpush.msra.mxu2 %v3235_v35  ;;  %3407 = vmatpush.msra.mxu3 %v3235_v35  ;;  %v6639_v48 = vld [vmem:[%s10394_s0 + $0x38] sm:$0xff]  ;;  %v6646_v49 = vld [vmem:[%s10394_s0 + $0x70] sm:$0x3f]  ;;  %v6652_v50 = vld [vmem:[%s10394_s0 + $0xa0] sm:$0x3f] }
 0x193   : > { %3258 = vmatpush.msra.mxu0 %v3235_v35  ;;  %3311 = vmatpush.msra.mxu1 %v3235_v35  ;;  %v3229_v51 = vld [vmem:[%s10394_s0 + $0x10] sm:$0x3f]  ;;  %v6640_v52 = vld [vmem:[%s10394_s0 + $0x40] sm:$0x3f]  ;;  %v6668_v53 = vld [vmem:[%s10394_s0 + $0x78] sm:$0xff] }
 0x194   : > { %3360 = vmatpush.msra.mxu2 %v3234_v36  ;;  %3408 = vmatpush.msra.mxu3 %v3234_v36  ;;  %v6674_v54 = vld [vmem:[%s10394_s0 + $0xa8] sm:$0xff]  ;;  %v6656_v55 = vld [vmem:[%s10394_s0 + $0x18] sm:$0xff]  ;;  %v6669_v57 = vld [vmem:[%s10394_s0 + $0x80] sm:$0xff] }
 0x195   : > { %3259 = vmatpush.msra.mxu0 %v3234_v36  ;;  %3312 = vmatpush.msra.mxu1 %v3234_v36  ;;  %v6662_v56 = vld [vmem:[%s10394_s0 + $0x48] sm:$0xff]  ;;  %v6675_v58 = vld [vmem:[%s10394_s0 + $0xb0] sm:$0xff]  ;;  %v6657_v59 = vld [vmem:[%s10394_s0 + $0x20] sm:$0xff] }
 0x196   : > { %3361 = vmatpush.msra.mxu2 %v3233_v37  ;;  %3409 = vmatpush.msra.mxu3 %v3233_v37  ;;  %v6663_v60 = vld [vmem:[%s10394_s0 + $0x50] sm:$0xff]  ;;  %v6670_v61 = vld [vmem:[%s10394_s0 + $0x88] sm:$0x3f]  ;;  %v6676_v62 = vld [vmem:[%s10394_s0 + $0xb8] sm:$0x3f] }
 0x197   : > { %3260 = vmatpush.msra.mxu0 %v3233_v37  ;;  %3313 = vmatpush.msra.mxu1 %v3233_v37  ;;  %v6658_v63 = vld [vmem:[%s10394_s0 + $0x28] sm:$0x3f]  ;;  %v6664_v0 = vld [vmem:[%s10394_s0 + $0x58] sm:$0x3f]  ;;  %v8503_v1 = vld [vmem:[%s10396_s2] ss:$0 sm:$0xff] }
 0x198   : > { %3362 = vmatpush.msra.mxu2 %v9416_v38  ;;  %3410 = vmatpush.msra.mxu3 %v9416_v38  ;;  %v8504_v2 = vld [vmem:[%s10397_s3] ss:$0 sm:$0xff] }
 0x199   : > { %3261 = vmatpush.msra.mxu0 %v9416_v38  ;;  %3314 = vmatpush.msra.mxu1 %v9416_v38 }
 0x19a   : > { %3363 = vmatpush.msra.mxu2 %v9421_v39  ;;  %3411 = vmatpush.msra.mxu3 %v9421_v39 }
 0x19b   : > { %3262 = vmatpush.msra.mxu0 %v9421_v39  ;;  %3315 = vmatpush.msra.mxu1 %v9421_v39 }
 0x19c   : > { %3364 = vmatpush.msra.mxu2 %v9430_v40  ;;  %3412 = vmatpush.msra.mxu3 %v9430_v40 }
 0x19d   : > { %6647 = vmatmul.msk.f32.vlgmr.msra.gmra.mxu2 %vm3238_vm0, %v6644_v41  ;;  %6653 = vmatmul.msk.f32.vlgmr.msra.gmra.mxu3 %vm3238_vm0, %v6650_v42 }
 0x19e   : > { %3568 = vmatpush.msrb.mxu2 %v3237_v32  ;;  %3616 = vmatpush.msrb.mxu3 %v3237_v32 }
 0x19f   : > { %3263 = vmatpush.msra.mxu0 %v9430_v40  ;;  %3316 = vmatpush.msra.mxu1 %v9430_v40 }
 0x1a0   : > { %3569 = vmatpush.msrb.mxu2 %v3236_v33  ;;  %6635 = vmatmul.msk.f32.vlgmr.msra.gmra.mxu0 %vm3238_vm0, %v3227_v43 }
 0x1a1   : > { %6641 = vmatmul.msk.f32.vlgmr.msra.gmra.mxu1 %vm3238_vm0, %v6638_v44  ;;  %3467 = vmatpush.msrb.mxu0 %v3237_v32 }
 0x1a2   : > { %3520 = vmatpush.msrb.mxu1 %v3237_v32  ;;  %3617 = vmatpush.msrb.mxu3 %v3236_v33 }
 0x1a3   : > { %3570 = vmatpush.msrb.mxu2 %v3235_v35  ;;  %3468 = vmatpush.msrb.mxu0 %v3236_v33 }
 0x1a4   : > { %3521 = vmatpush.msrb.mxu1 %v3236_v33  ;;  %3618 = vmatpush.msrb.mxu3 %v3235_v35 }
 0x1a5   : > { %6648 = vmatmul.msk.f32.gmra.mxu2 %vm3238_vm0, %v6645_v45  ;;  %6654 = vmatmul.msk.f32.gmra.mxu3 %vm3238_vm0, %v6651_v46  ;;  %v8505_v45 = vld [vmem:[%s10396_s2] ss:$0 sm:$0xff] }
 0x1a6   : > { %3571 = vmatpush.msrb.mxu2 %v3234_v36  ;;  %3469 = vmatpush.msrb.mxu0 %v3235_v35 }
 0x1a7   : > { %3522 = vmatpush.msrb.mxu1 %v3235_v35  ;;  %3619 = vmatpush.msrb.mxu3 %v3234_v36 }
 0x1a8   : > { %6636 = vmatmul.msk.f32.gmra.mxu0 %vm3238_vm0, %v3228_v47  ;;  %3572 = vmatpush.msrb.mxu2 %v3233_v37 }
 0x1a9   : > { %6642 = vmatmul.msk.f32.gmra.mxu1 %vm3238_vm0, %v6639_v48  ;;  %3470 = vmatpush.msrb.mxu0 %v3234_v36 }
 0x1aa   : > { %3523 = vmatpush.msrb.mxu1 %v3234_v36  ;;  %3620 = vmatpush.msrb.mxu3 %v3233_v37 }
 0x1ab   : > { %3573 = vmatpush.msrb.mxu2 %v9416_v38  ;;  %3471 = vmatpush.msrb.mxu0 %v3233_v37 }
 0x1ac   : > { %3524 = vmatpush.msrb.mxu1 %v3233_v37  ;;  %3621 = vmatpush.msrb.mxu3 %v9416_v38 }
 0x1ad   : > { %6649 = vmatmul.msk.f32.gmra.mxu2 %vm3238_vm0, %v6646_v49  ;;  %6655 = vmatmul.msk.f32.gmra.mxu3 %vm3238_vm0, %v6652_v50  ;;  %v8506_v49 = vld [vmem:[%s10397_s3] ss:$0 sm:$0xff] }
 0x1ae   : > { %3574 = vmatpush.msrb.mxu2 %v9421_v39  ;;  %3472 = vmatpush.msrb.mxu0 %v9416_v38 }
 0x1af   : > { %3525 = vmatpush.msrb.mxu1 %v9416_v38  ;;  %3622 = vmatpush.msrb.mxu3 %v9421_v39 }
 0x1b0   : > { %6637 = vmatmul.msk.f32.gmra.mxu0 %vm3238_vm0, %v3229_v51  ;;  %3575 = vmatpush.msrb.mxu2 %v9430_v40 }
 0x1b1   : > { %6643 = vmatmul.msk.f32.gmra.mxu1 %vm3238_vm0, %v6640_v52  ;;  %3473 = vmatpush.msrb.mxu0 %v9421_v39 }
 0x1b2   : > { %3526 = vmatpush.msrb.mxu1 %v9421_v39  ;;  %3623 = vmatpush.msrb.mxu3 %v9430_v40 }
 0x1b3   : > { %3474 = vmatpush.msrb.mxu0 %v9430_v40 }
 0x1b4   : > { %3527 = vmatpush.msrb.mxu1 %v9430_v40 }
 0x1b5   : > { %6671 = vmatmul.msk.f32.vlgmr.msrb.gmra.mxu2 %vm3238_vm0, %v6668_v53  ;;  %6677 = vmatmul.msk.f32.vlgmr.msrb.gmra.mxu3 %vm3238_vm0, %v6674_v54 }
 0x1b8   : > { %6659 = vmatmul.msk.f32.vlgmr.msrb.gmra.mxu0 %vm3238_vm0, %v6656_v55 }
 0x1b9   : > { %6665 = vmatmul.msk.f32.vlgmr.msrb.gmra.mxu1 %vm3238_vm0, %v6662_v56 }
 0x1bd   : > { %6672 = vmatmul.msk.f32.gmra.mxu2 %vm3238_vm0, %v6669_v57  ;;  %6678 = vmatmul.msk.f32.gmra.mxu3 %vm3238_vm0, %v6675_v58 }
 0x1c0   : > { %6660 = vmatmul.msk.f32.gmra.mxu0 %vm3238_vm0, %v6657_v59 }
 0x1c1   : > { %6666 = vmatmul.msk.f32.gmra.mxu1 %vm3238_vm0, %v6663_v60 }
 0x1c5   : > { %6673 = vmatmul.msk.f32.gmra.mxu2 %vm3238_vm0, %v6670_v61  ;;  %6679 = vmatmul.msk.f32.gmra.mxu3 %vm3238_vm0, %v6676_v62 }
 0x1c8   : > { %6661 = vmatmul.msk.f32.gmra.mxu0 %vm3238_vm0, %v6658_v63 }
 0x1c9   : > { %6667 = vmatmul.msk.f32.gmra.mxu1 %vm3238_vm0, %v6664_v0 }
 0x21d   : > { %v3265_v3 = vpop.f32.mrf.mxu0 }
 0x21e   : > { %v3278_v4 = vmul.f32 %v8503_v1, %v3265_v3  ;;  %v3318_v5 = vpop.f32.mrf.mxu1 }
 0x21f   : > { %v3327_v6 = vmul.f32 %v8503_v1, %v3318_v5 }
 0x220   : > { %v3285_v7 = vadd.f32 %v8504_v2, %v3278_v4  ;;  %v3366_v8 = vpop.f32.mrf.mxu2  ;;  %v3414_v9 = vpop.f32.mrf.mxu3 }
 0x221   : > { %v3330_v10 = vadd.f32 %v8504_v2, %v3327_v6  ;;  %v3375_v11 = vmul.f32 %v8503_v1, %v3366_v8  ;;  %v3423_v12 = vmul.f32 %v8503_v1, %v3414_v9 }
 0x223   : > { %v3333_v13 = vmax.f32 %v3285_v7, %v3330_v10  ;;  %v3378_v14 = vadd.f32 %v8504_v2, %v3375_v11  ;;  %v3426_v15 = vadd.f32 %v8504_v2, %v3423_v12 }
 0x225   : > { %v3381_v16 = vmax.f32 %v3333_v13, %v3378_v14  ;;  %v3268_v17 = vpop.f32.mrf.mxu0 }
 0x226   : > { %v3279_v18 = vmul.f32 %v8503_v1, %v3268_v17  ;;  %v3321_v19 = vpop.f32.mrf.mxu1 }
 0x227   : > { %v3429_v20 = vmax.f32 %v3381_v16, %v3426_v15  ;;  %v3328_v21 = vmul.f32 %v8503_v1, %v3321_v19 }
 0x228   : > { %v3286_v22 = vadd.f32 %v8504_v2, %v3279_v18  ;;  %v3369_v23 = vpop.f32.mrf.mxu2  ;;  %v3417_v24 = vpop.f32.mrf.mxu3 }
 0x229   : > { %v3432_v25 = vmax.f32 %v3429_v20, 0.0  ;;  %v3331_v26 = vadd.f32 %v8504_v2, %v3328_v21  ;;  %v3376_v27 = vmul.f32 %v8503_v1, %v3369_v23  ;;  %v3424_v28 = vmul.f32 %v8503_v1, %v3417_v24 }
 0x22b   : > { %3435 = vst [vmem:[#allocation2] sm:$0xff] %v3432_v25  ;;  %v3334_v29 = vmax.f32 %v3286_v22, %v3331_v26  ;;  %v3379_v30 = vadd.f32 %v8504_v2, %v3376_v27  ;;  %v3427_v31 = vadd.f32 %v8504_v2, %v3424_v28 }
 0x22d   : > { %v3382_v32 = vmax.f32 %v3334_v29, %v3379_v30  ;;  %v3271_v33 = vpop.f32.mrf.mxu0 }
 0x22e   : > { %v3280_v34 = vmul.f32 %v8503_v1, %v3271_v33  ;;  %v3324_v35 = vpop.f32.mrf.mxu1 }
 0x22f   : > { %v3430_v36 = vmax.f32 %v3382_v32, %v3427_v31  ;;  %v3329_v37 = vmul.f32 %v8503_v1, %v3324_v35 }
 0x230   : > { %v3287_v38 = vadd.f32 %v8504_v2, %v3280_v34  ;;  %v3372_v39 = vpop.f32.mrf.mxu2  ;;  %v3420_v40 = vpop.f32.mrf.mxu3 }
 0x231   : > { %v3433_v41 = vmax.f32 %v3430_v36, 0.0  ;;  %v3332_v42 = vadd.f32 %v8504_v2, %v3329_v37  ;;  %v3377_v43 = vmul.f32 %v8503_v1, %v3372_v39  ;;  %v3425_v44 = vmul.f32 %v8503_v1, %v3420_v40 }
 0x233   : > { %3436 = vst [vmem:[#allocation2 + $0x8] sm:$0xff] %v3433_v41  ;;  %v3335_v46 = vmax.f32 %v3287_v38, %v3332_v42  ;;  %v3380_v47 = vadd.f32 %v8504_v2, %v3377_v43  ;;  %v3428_v48 = vadd.f32 %v8504_v2, %v3425_v44 }
 0x235   : > { %v3383_v50 = vmax.f32 %v3335_v46, %v3380_v47  ;;  %v3476_v51 = vpop.f32.mrf.mxu0 }
 0x236   : > { %v3489_v52 = vmul.f32 %v8505_v45, %v3476_v51  ;;  %v3529_v53 = vpop.f32.mrf.mxu1 }
 0x237   : > { %v3431_v54 = vmax.f32 %v3383_v50, %v3428_v48  ;;  %v3538_v55 = vmul.f32 %v8505_v45, %v3529_v53 }
 0x238   : > { %v3496_v56 = vadd.f32 %v8506_v49, %v3489_v52  ;;  %v3577_v57 = vpop.f32.mrf.mxu2  ;;  %v3625_v58 = vpop.f32.mrf.mxu3 }
 0x239   : > { %v3434_v59 = vmax.f32 %v3431_v54, 0.0  ;;  %v3541_v60 = vadd.f32 %v8506_v49, %v3538_v55  ;;  %v3586_v61 = vmul.f32 %v8505_v45, %v3577_v57  ;;  %v3634_v62 = vmul.f32 %v8505_v45, %v3625_v58 }
 0x23b   : > { %3437 = vst [vmem:[#allocation2 + $0x10] sm:$0x3f] %v3434_v59  ;;  %v3544_v63 = vmax.f32 %v3496_v56, %v3541_v60  ;;  %v3589_v0 = vadd.f32 %v8506_v49, %v3586_v61  ;;  %v3637_v1 = vadd.f32 %v8506_v49, %v3634_v62 }
 0x23d   : > { %v3592_v2 = vmax.f32 %v3544_v63, %v3589_v0  ;;  %v3479_v3 = vpop.f32.mrf.mxu0 }
 0x23e   : > { %v3490_v4 = vmul.f32 %v8505_v45, %v3479_v3  ;;  %v3532_v5 = vpop.f32.mrf.mxu1 }
 0x23f   : > { %v3640_v6 = vmax.f32 %v3592_v2, %v3637_v1  ;;  %v3539_v7 = vmul.f32 %v8505_v45, %v3532_v5 }
 0x240   : > { %v3497_v8 = vadd.f32 %v8506_v49, %v3490_v4  ;;  %v3580_v9 = vpop.f32.mrf.mxu2  ;;  %v3628_v10 = vpop.f32.mrf.mxu3 }
 0x241   : > { %v3643_v11 = vmax.f32 %v3640_v6, 0.0  ;;  %v3542_v12 = vadd.f32 %v8506_v49, %v3539_v7  ;;  %v3587_v13 = vmul.f32 %v8505_v45, %v3580_v9  ;;  %v3635_v14 = vmul.f32 %v8505_v45, %v3628_v10 }
 0x243   : > { %3647 = vst [vmem:[#allocation2 + $0x18] sm:$0xff] %v3643_v11  ;;  %v3545_v15 = vmax.f32 %v3497_v8, %v3542_v12  ;;  %v3590_v16 = vadd.f32 %v8506_v49, %v3587_v13  ;;  %v3638_v17 = vadd.f32 %v8506_v49, %v3635_v14 }
 0x245   : > { %v3593_v18 = vmax.f32 %v3545_v15, %v3590_v16  ;;  %v3482_v19 = vpop.f32.mrf.mxu0 }
 0x246   : > { %v3491_v20 = vmul.f32 %v8505_v45, %v3482_v19  ;;  %v3535_v21 = vpop.f32.mrf.mxu1 }
 0x247   : > { %v3641_v22 = vmax.f32 %v3593_v18, %v3638_v17  ;;  %v3540_v23 = vmul.f32 %v8505_v45, %v3535_v21 }
 0x248   : > { %v3498_v24 = vadd.f32 %v8506_v49, %v3491_v20  ;;  %v3583_v25 = vpop.f32.mrf.mxu2  ;;  %v3631_v26 = vpop.f32.mrf.mxu3 }
 0x249   : > { %v3644_v27 = vmax.f32 %v3641_v22, 0.0  ;;  %v3543_v28 = vadd.f32 %v8506_v49, %v3540_v23  ;;  %v3588_v29 = vmul.f32 %v8505_v45, %v3583_v25  ;;  %v3636_v30 = vmul.f32 %v8505_v45, %v3631_v26 }
 0x24b   : > { %3648 = vst [vmem:[#allocation2 + $0x20] sm:$0xff] %v3644_v27  ;;  %v3546_v31 = vmax.f32 %v3498_v24, %v3543_v28  ;;  %v3591_v32 = vadd.f32 %v8506_v49, %v3588_v29  ;;  %v3639_v33 = vadd.f32 %v8506_v49, %v3636_v30 }
 0x24d   : > { %v3594_v34 = vmax.f32 %v3546_v31, %v3591_v32 }
 0x24f   : > { %v3642_v35 = vmax.f32 %v3594_v34, %v3639_v33 }
 0x251   : > { %v3645_v36 = vmax.f32 %v3642_v35, 0.0 }
 0x253   : > { %3649 = vst [vmem:[#allocation2 + $0x28] sm:$0x3f] %v3645_v36 }
 0x254 PF: > { %v6738_v37 = vld [vmem:[%s9395_s4 + $0xf0] sm:$0xf]  ;;  %v8123_v38 = vld [vmem:[%s9395_s4 + $0xf4] sm:$0xf0]  ;;  %v8122_v39 = vld [vmem:[%s9395_s4 + $0xf4] sm:$0xf] }
 0x255   : > { %v6739_v40 = vor.u32 %v8123_v38, %v6738_v37  ;;  %v6740_v41 = vld [vmem:[%s9395_s4 + $0xf8] sm:$0xf0]  ;;  %v6802_v42 = vld [vmem:[%s9395_s4 + $0x70] sm:$0xf]  ;;  %v8107_v43 = vld [vmem:[%s9395_s4 + $0x74] sm:$0xf0] }
 0x256   : > { %v6743_v44 = vor.u32 %v8122_v39, %v6740_v41  ;;  %v6803_v45 = vor.u32 %v8107_v43, %v6802_v42  ;;  %v8106_v46 = vld [vmem:[%s9395_s4 + $0x74] sm:$0xf]  ;;  %v6804_v47 = vld [vmem:[%s9395_s4 + $0x78] sm:$0xf0]  ;;  %v6730_v48 = vld [vmem:[%s9395_s4 + $0xe0] sm:$0xf] }
 0x257   : > { %3778 = vmatpush.bf16.msra.mxu0 %v6739_v40  ;;  %v6807_v49 = vor.u32 %v8106_v46, %v6804_v47  ;;  %v8121_v50 = vld [vmem:[%s9395_s4 + $0xe4] sm:$0xf0]  ;;  %v8120_v51 = vld [vmem:[%s9395_s4 + $0xe4] sm:$0xf]  ;;  %v6732_v52 = vld [vmem:[%s9395_s4 + $0xe8] sm:$0xf0] }
 0x258   : > { %3791 = vmatpush.bf16.msra.mxu1 %v6743_v44  ;;  %3884 = vmatpush.bf16.msra.mxu2 %v6803_v45  ;;  %v6731_v53 = vor.u32 %v8121_v50, %v6730_v48  ;;  %v6735_v54 = vor.u32 %v8120_v51, %v6732_v52  ;;  %v6794_v55 = vld [vmem:[%s9395_s4 + $0x60] sm:$0xf]  ;;  %v8105_v56 = vld [vmem:[%s9395_s4 + $0x64] sm:$0xf0]  ;;  %v8104_v57 = vld [vmem:[%s9395_s4 + $0x64] sm:$0xf] }
 0x259   : > { %3897 = vmatpush.bf16.msra.mxu3 %v6807_v49  ;;  %v6795_v58 = vor.u32 %v8105_v56, %v6794_v55  ;;  %v6796_v59 = vld [vmem:[%s9395_s4 + $0x68] sm:$0xf0]  ;;  %v6722_v60 = vld [vmem:[%s9395_s4 + $0xd0] sm:$0xf]  ;;  %v8119_v61 = vld [vmem:[%s9395_s4 + $0xd4] sm:$0xf0] }
 0x25a   : > { %v6799_v62 = vor.u32 %v8104_v57, %v6796_v59  ;;  %v8118_v63 = vld [vmem:[%s9395_s4 + $0xd4] sm:$0xf]  ;;  %v6724_v0 = vld [vmem:[%s9395_s4 + $0xd8] sm:$0xf0]  ;;  %v6786_v1 = vld [vmem:[%s9395_s4 + $0x50] sm:$0xf]  ;;  %v6723_v2 = vor.u32 %v8119_v61, %v6722_v60 }
 0x25b   : > { %3779 = vmatpush.bf16.msra.mxu0 %v6731_v53  ;;  %v8103_v3 = vld [vmem:[%s9395_s4 + $0x54] sm:$0xf0]  ;;  %v8102_v4 = vld [vmem:[%s9395_s4 + $0x54] sm:$0xf]  ;;  %v6788_v5 = vld [vmem:[%s9395_s4 + $0x58] sm:$0xf0]  ;;  %v6727_v6 = vor.u32 %v8118_v63, %v6724_v0 }
 0x25c   : > { %3792 = vmatpush.bf16.msra.mxu1 %v6735_v54  ;;  %3885 = vmatpush.bf16.msra.mxu2 %v6795_v58  ;;  %v6787_v7 = vor.u32 %v8103_v3, %v6786_v1  ;;  %v6714_v8 = vld [vmem:[%s9395_s4 + $0xc0] sm:$0xf]  ;;  %v8117_v9 = vld [vmem:[%s9395_s4 + $0xc4] sm:$0xf0]  ;;  %v8116_v10 = vld [vmem:[%s9395_s4 + $0xc4] sm:$0xf]  ;;  %v6791_v11 = vor.u32 %v8102_v4, %v6788_v5 }
 0x25d   : > { %3898 = vmatpush.bf16.msra.mxu3 %v6799_v62  ;;  %v6716_v12 = vld [vmem:[%s9395_s4 + $0xc8] sm:$0xf0]  ;;  %v6778_v13 = vld [vmem:[%s9395_s4 + $0x40] sm:$0xf]  ;;  %v8101_v14 = vld [vmem:[%s9395_s4 + $0x44] sm:$0xf0]  ;;  %v6715_v17 = vor.u32 %v8117_v9, %v6714_v8 }
 0x25e   : > { %v8100_v15 = vld [vmem:[%s9395_s4 + $0x44] sm:$0xf]  ;;  %v6780_v16 = vld [vmem:[%s9395_s4 + $0x48] sm:$0xf0]  ;;  %v6719_v18 = vor.u32 %v8116_v10, %v6716_v12  ;;  %v6779_v19 = vor.u32 %v8101_v14, %v6778_v13  ;;  %v6706_v20 = vld [vmem:[%s9395_s4 + $0xb0] sm:$0xf] }
 0x25f   : > { %3780 = vmatpush.bf16.msra.mxu0 %v6723_v2  ;;  %v8115_v21 = vld [vmem:[%s9395_s4 + $0xb4] sm:$0xf0]  ;;  %v8114_v22 = vld [vmem:[%s9395_s4 + $0xb4] sm:$0xf]  ;;  %v6783_v23 = vor.u32 %v8100_v15, %v6780_v16  ;;  %v6708_v24 = vld [vmem:[%s9395_s4 + $0xb8] sm:$0xf0] }
 0x260   : > { %3793 = vmatpush.bf16.msra.mxu1 %v6727_v6  ;;  %3886 = vmatpush.bf16.msra.mxu2 %v6787_v7  ;;  %v6770_v25 = vld [vmem:[%s9395_s4 + $0x30] sm:$0xf]  ;;  %v8099_v26 = vld [vmem:[%s9395_s4 + $0x34] sm:$0xf0]  ;;  %v8098_v27 = vld [vmem:[%s9395_s4 + $0x34] sm:$0xf]  ;;  %v6707_v29 = vor.u32 %v8115_v21, %v6706_v20  ;;  %v6711_v30 = vor.u32 %v8114_v22, %v6708_v24 }
 0x261   : > { %3899 = vmatpush.bf16.msra.mxu3 %v6791_v11  ;;  %v6772_v28 = vld [vmem:[%s9395_s4 + $0x38] sm:$0xf0]  ;;  %v6771_v31 = vor.u32 %v8099_v26, %v6770_v25  ;;  %v6698_v32 = vld [vmem:[%s9395_s4 + $0xa0] sm:$0xf]  ;;  %v8113_v33 = vld [vmem:[%s9395_s4 + $0xa4] sm:$0xf0] }
 0x262   : > { %v8112_v34 = vld [vmem:[%s9395_s4 + $0xa4] sm:$0xf]  ;;  %v6775_v35 = vor.u32 %v8098_v27, %v6772_v28  ;;  %v6700_v36 = vld [vmem:[%s9395_s4 + $0xa8] sm:$0xf0]  ;;  %v6762_v37 = vld [vmem:[%s9395_s4 + $0x20] sm:$0xf]  ;;  %v6699_v41 = vor.u32 %v8113_v33, %v6698_v32 }
 0x263   : > { %3781 = vmatpush.bf16.msra.mxu0 %v6715_v17  ;;  %v8097_v38 = vld [vmem:[%s9395_s4 + $0x24] sm:$0xf0]  ;;  %v8096_v39 = vld [vmem:[%s9395_s4 + $0x24] sm:$0xf]  ;;  %v6764_v40 = vld [vmem:[%s9395_s4 + $0x28] sm:$0xf0]  ;;  %v6703_v42 = vor.u32 %v8112_v34, %v6700_v36 }
 0x264   : > { %3794 = vmatpush.bf16.msra.mxu1 %v6719_v18  ;;  %3887 = vmatpush.bf16.msra.mxu2 %v6779_v19  ;;  %v6763_v43 = vor.u32 %v8097_v38, %v6762_v37  ;;  %v6690_v44 = vld [vmem:[%s9395_s4 + $0x90] sm:$0xf]  ;;  %v8111_v45 = vld [vmem:[%s9395_s4 + $0x94] sm:$0xf0]  ;;  %v8110_v46 = vld [vmem:[%s9395_s4 + $0x94] sm:$0xf]  ;;  %v6767_v47 = vor.u32 %v8096_v39, %v6764_v40 }
 0x265   : > { %3900 = vmatpush.bf16.msra.mxu3 %v6783_v23  ;;  %v6692_v48 = vld [vmem:[%s9395_s4 + $0x98] sm:$0xf0]  ;;  %v6754_v49 = vld [vmem:[%s9395_s4 + $0x10] sm:$0xf]  ;;  %v8095_v50 = vld [vmem:[%s9395_s4 + $0x14] sm:$0xf0]  ;;  %v6691_v53 = vor.u32 %v8111_v45, %v6690_v44 }
 0x266   : > { %v8094_v51 = vld [vmem:[%s9395_s4 + $0x14] sm:$0xf]  ;;  %v6756_v52 = vld [vmem:[%s9395_s4 + $0x18] sm:$0xf0]  ;;  %v6682_v54 = vld [vmem:[%s9395_s4 + $0x80] sm:$0xf]  ;;  %v6695_v56 = vor.u32 %v8110_v46, %v6692_v48  ;;  %v6755_v57 = vor.u32 %v8095_v50, %v6754_v49 }
 0x267   : > { %3782 = vmatpush.bf16.msra.mxu0 %v6707_v29  ;;  %v8109_v55 = vld [vmem:[%s9395_s4 + $0x84] sm:$0xf0]  ;;  %v8108_v58 = vld [vmem:[%s9395_s4 + $0x84] sm:$0xf]  ;;  %v6684_v59 = vld [vmem:[%s9395_s4 + $0x88] sm:$0xf0]  ;;  %v6759_v61 = vor.u32 %v8094_v51, %v6756_v52 }
 0x268   : > { %3795 = vmatpush.bf16.msra.mxu1 %v6711_v30  ;;  %3888 = vmatpush.bf16.msra.mxu2 %v6771_v31  ;;  %v6746_v60 = vld [vmem:[%s9395_s4] sm:$0xf]  ;;  %v8093_v62 = vld [vmem:[%s9395_s4 + $0x4] sm:$0xf0]  ;;  %v8092_v63 = vld [vmem:[%s9395_s4 + $0x4] sm:$0xf]  ;;  %v6683_v4 = vor.u32 %v8109_v55, %v6682_v54  ;;  %v6687_v8 = vor.u32 %v8108_v58, %v6684_v59 }
 0x269   : > { %3901 = vmatpush.bf16.msra.mxu3 %v6775_v35  ;;  %v6748_v0 = vld [vmem:[%s9395_s4 + $0x8] sm:$0xf0]  ;;  %v6866_v1 = vld [vmem:[%s9395_s4 + $0x170] sm:$0xf]  ;;  %v8139_v2 = vld [vmem:[%s9395_s4 + $0x174] sm:$0xf0]  ;;  %v6747_v9 = vor.u32 %v8093_v62, %v6746_v60 }
 0x26a   : > { %v8138_v3 = vld [vmem:[%s9395_s4 + $0x174] sm:$0xf]  ;;  %v6868_v5 = vld [vmem:[%s9395_s4 + $0x178] sm:$0xf0]  ;;  %v6930_v6 = vld [vmem:[%s9395_s4 + $0x1f0] sm:$0xf]  ;;  %v6751_v12 = vor.u32 %v8092_v63, %v6748_v0  ;;  %v6867_v13 = vor.u32 %v8139_v2, %v6866_v1 }
 0x26b   : > { %3783 = vmatpush.bf16.msra.mxu0 %v6699_v41  ;;  %v8155_v7 = vld [vmem:[%s9395_s4 + $0x1f4] sm:$0xf0]  ;;  %v8154_v10 = vld [vmem:[%s9395_s4 + $0x1f4] sm:$0xf]  ;;  %v6932_v11 = vld [vmem:[%s9395_s4 + $0x1f8] sm:$0xf0]  ;;  %v6871_v14 = vor.u32 %v8138_v3, %v6868_v5 }
 0x26c   : > { %3796 = vmatpush.bf16.msra.mxu1 %v6703_v42  ;;  %3889 = vmatpush.bf16.msra.mxu2 %v6763_v43  ;;  %v6931_v15 = vor.u32 %v8155_v7, %v6930_v6  ;;  %v6858_v16 = vld [vmem:[%s9395_s4 + $0x160] sm:$0xf]  ;;  %v8137_v17 = vld [vmem:[%s9395_s4 + $0x164] sm:$0xf0]  ;;  %v8136_v18 = vld [vmem:[%s9395_s4 + $0x164] sm:$0xf]  ;;  %v6935_v19 = vor.u32 %v8154_v10, %v6932_v11 }
 0x26d   : > { %3902 = vmatpush.bf16.msra.mxu3 %v6767_v47  ;;  %v6860_v20 = vld [vmem:[%s9395_s4 + $0x168] sm:$0xf0]  ;;  %v6922_v21 = vld [vmem:[%s9395_s4 + $0x1e0] sm:$0xf]  ;;  %v8153_v22 = vld [vmem:[%s9395_s4 + $0x1e4] sm:$0xf0]  ;;  %v6859_v25 = vor.u32 %v8137_v17, %v6858_v16 }
 0x26e   : > { %v8152_v23 = vld [vmem:[%s9395_s4 + $0x1e4] sm:$0xf]  ;;  %v6924_v24 = vld [vmem:[%s9395_s4 + $0x1e8] sm:$0xf0]  ;;  %v6850_v26 = vld [vmem:[%s9395_s4 + $0x150] sm:$0xf]  ;;  %v6863_v27 = vor.u32 %v8136_v18, %v6860_v20  ;;  %v6923_v28 = vor.u32 %v8153_v22, %v6922_v21 }
 0x26f   : > { %3784 = vmatpush.bf16.msra.mxu0 %v6691_v53  ;;  %v8135_v29 = vld [vmem:[%s9395_s4 + $0x154] sm:$0xf0]  ;;  %v8134_v30 = vld [vmem:[%s9395_s4 + $0x154] sm:$0xf]  ;;  %s3650_s19 = smul.u32 24, %s8545_s26  ;;  %v6927_v31 = vor.u32 %v8152_v23, %v6924_v24  ;;  %p8088_p0 = scmp.ne.s32.totalorder %s8545_s26, 1 }
 0x270   : > { %3797 = vmatpush.bf16.msra.mxu1 %v6695_v56  ;;  %3890 = vmatpush.bf16.msra.mxu2 %v6755_v57  ;;  %v6852_v32 = vld [vmem:[%s9395_s4 + $0x158] sm:$0xf0]  ;;  %v6914_v33 = vld [vmem:[%s9395_s4 + $0x1d0] sm:$0xf]  ;;  %v8151_v34 = vld [vmem:[%s9395_s4 + $0x1d4] sm:$0xf0]  ;;  %v6851_v37 = vor.u32 %v8135_v29, %v6850_v26 }
 0x271   : > { %3903 = vmatpush.bf16.msra.mxu3 %v6759_v61  ;;  %v8150_v35 = vld [vmem:[%s9395_s4 + $0x1d4] sm:$0xf]  ;;  %v6916_v36 = vld [vmem:[%s9395_s4 + $0x1d8] sm:$0xf0]  ;;  %s9649_s21 = scalar_lea.vmem [#allocation2], %s3650_s19  ;;  %v6855_v39 = vor.u32 %v8134_v30, %v6852_v32  ;;  %v6915_v40 = vor.u32 %v8151_v34, %v6914_v33 }
 0x272   : > { %v3652_v38 = vld [vmem:[%s9649_s21] sm:$0xff]  ;;  %v8133_v42 = vld [vmem:[%s9395_s4 + $0x144] sm:$0xf0]  ;;  %v6919_v45 = vor.u32 %v8150_v35, %v6916_v36  ;;  %v6844_v46 = vld [vmem:[%s9395_s4 + $0x148] sm:$0xf0] }
 0x273   : > { %3785 = vmatpush.bf16.msra.mxu0 %v6683_v4  ;;  %v6842_v41 = vld [vmem:[%s9395_s4 + $0x140] sm:$0xf]  ;;  %v8132_v43 = vld [vmem:[%s9395_s4 + $0x144] sm:$0xf]  ;;  %v3655_v44 = vpack.c.bf16 %v3652_v38, %v3652_v38  ;;  %v8149_v48 = vld [vmem:[%s9395_s4 + $0x1c4] sm:$0xf0] }
 0x274   : > { %3798 = vmatpush.bf16.msra.mxu1 %v6687_v8  ;;  %3891 = vmatpush.bf16.msra.mxu2 %v6747_v9  ;;  %v6906_v47 = vld [vmem:[%s9395_s4 + $0x1c0] sm:$0xf]  ;;  %v8148_v49 = vld [vmem:[%s9395_s4 + $0x1c4] sm:$0xf]  ;;  %v6908_v50 = vld [vmem:[%s9395_s4 + $0x1c8] sm:$0xf0]  ;;  %v6843_v53 = vor.u32 %v8133_v42, %v6842_v41  ;;  %v6847_v55 = vor.u32 %v8132_v43, %v6844_v46 }
 0x275   : > { %3904 = vmatpush.bf16.msra.mxu3 %v6751_v12  ;;  %v9660_v51 = vpack.i.b16 %v3655_v44, %v3655_v44  ;;  %v3678_v52 = vshrl.u32 %v3655_v44, 16  ;;  %v6834_v54 = vld [vmem:[%s9395_s4 + $0x130] sm:$0xf]  ;;  %v6907_v56 = vor.u32 %v8149_v48, %v6906_v47  ;;  %v8131_v57 = vld [vmem:[%s9395_s4 + $0x134] sm:$0xf0]  ;;  %v6911_v61 = vor.u32 %v8148_v49, %v6908_v50 }
 0x276   : > { %v8130_v58 = vld [vmem:[%s9395_s4 + $0x134] sm:$0xf]  ;;  %v6836_v62 = vld [vmem:[%s9395_s4 + $0x138] sm:$0xf0]  ;;  %v6898_v63 = vld [vmem:[%s9395_s4 + $0x1b0] sm:$0xf]  ;;  %v6835_v4 = vor.u32 %v8131_v57, %v6834_v54 }
 0x277   : > { %4007 = vmatpush.bf16.msrb.mxu0 %v6867_v13  ;;  %v3661_v59 = vperm.slane %v9660_v51, 0  ;;  %v9666_v60 = vpack.i.b16 %v3678_v52, %v3678_v52  ;;  %v8147_v0 = vld [vmem:[%s9395_s4 + $0x1b4] sm:$0xf0]  ;;  %v8146_v1 = vld [vmem:[%s9395_s4 + $0x1b4] sm:$0xf]  ;;  %v6839_v5 = vor.u32 %v8130_v58, %v6836_v62 }
 0x278   : > { %4020 = vmatpush.bf16.msrb.mxu1 %v6871_v14  ;;  %4132 = vmatpush.bf16.msrb.mxu2 %v6931_v15  ;;  %v6900_v2 = vld [vmem:[%s9395_s4 + $0x1b8] sm:$0xf0]  ;;  %v6899_v6 = vor.u32 %v8147_v0, %v6898_v63  ;;  %v6826_v7 = vld [vmem:[%s9395_s4 + $0x120] sm:$0xf]  ;;  %v8129_v8 = vld [vmem:[%s9395_s4 + $0x124] sm:$0xf0] }
 0x279   : > { %4145 = vmatpush.bf16.msrb.mxu3 %v6935_v19  ;;  %3892 = vmatmul.bf16.vlgmr.msra.gmra.mxu2 %v3661_v59  ;;  %v3681_v3 = vperm.slane %v9666_v60, 0  ;;  %v8128_v9 = vld [vmem:[%s9395_s4 + $0x124] sm:$0xf]  ;;  %v6903_v10 = vor.u32 %v8146_v1, %v6900_v2  ;;  %v6828_v11 = vld [vmem:[%s9395_s4 + $0x128] sm:$0xf0]  ;;  %v6827_v16 = vor.u32 %v8129_v8, %v6826_v7  ;;  %v4035_v54 = vperm.slane %v9666_v60, 1 }
 0x27a   : > { %3905 = vmatmul.bf16.vlgmr.msra.gmra.mxu3 %v3661_v59  ;;  %v6890_v12 = vld [vmem:[%s9395_s4 + $0x1a0] sm:$0xf]  ;;  %v8145_v13 = vld [vmem:[%s9395_s4 + $0x1a4] sm:$0xf0]  ;;  %v8144_v14 = vld [vmem:[%s9395_s4 + $0x1a4] sm:$0xf]  ;;  %v6831_v17 = vor.u32 %v8128_v9, %v6828_v11 }
 0x27b   : > { %4008 = vmatpush.bf16.msrb.mxu0 %v6859_v25  ;;  %v6892_v15 = vld [vmem:[%s9395_s4 + $0x1a8] sm:$0xf0]  ;;  %3799 = vmatmul.bf16.vlgmr.msra.gmra.mxu1 %v3681_v3  ;;  %v6891_v18 = vor.u32 %v8145_v13, %v6890_v12  ;;  %v6818_v19 = vld [vmem:[%s9395_s4 + $0x110] sm:$0xf]  ;;  %v8127_v20 = vld [vmem:[%s9395_s4 + $0x114] sm:$0xf0] }
 0x27c   : > { %4021 = vmatpush.bf16.msrb.mxu1 %v6863_v27  ;;  %4133 = vmatpush.bf16.msrb.mxu2 %v6923_v28  ;;  %v8126_v21 = vld [vmem:[%s9395_s4 + $0x114] sm:$0xf]  ;;  %v6895_v22 = vor.u32 %v8144_v14, %v6892_v15  ;;  %v6820_v23 = vld [vmem:[%s9395_s4 + $0x118] sm:$0xf0]  ;;  %v6882_v24 = vld [vmem:[%s9395_s4 + $0x190] sm:$0xf]  ;;  %v6819_v28 = vor.u32 %v8127_v20, %v6818_v19 }
 0x27d   : > { %4146 = vmatpush.bf16.msrb.mxu3 %v6927_v31  ;;  %3786 = vmatmul.bf16.vlgmr.msra.gmra.mxu0 %v3681_v3  ;;  %v8143_v25 = vld [vmem:[%s9395_s4 + $0x194] sm:$0xf0]  ;;  %v8142_v26 = vld [vmem:[%s9395_s4 + $0x194] sm:$0xf]  ;;  %v6884_v27 = vld [vmem:[%s9395_s4 + $0x198] sm:$0xf0]  ;;  %v6823_v31 = vor.u32 %v8126_v21, %v6820_v23 }
 0x27e   : > { %v6810_v29 = vld [vmem:[%s9395_s4 + $0x100] sm:$0xf]  ;;  %v8125_v30 = vld [vmem:[%s9395_s4 + $0x104] sm:$0xf0]  ;;  %v6883_v32 = vor.u32 %v8143_v25, %v6882_v24  ;;  %v8124_v33 = vld [vmem:[%s9395_s4 + $0x104] sm:$0xf]  ;;  %v6887_v36 = vor.u32 %v8142_v26, %v6884_v27 }
 0x27f   : > { %4009 = vmatpush.bf16.msrb.mxu0 %v6851_v37  ;;  %v6812_v34 = vld [vmem:[%s9395_s4 + $0x108] sm:$0xf0]  ;;  %v6874_v35 = vld [vmem:[%s9395_s4 + $0x180] sm:$0xf]  ;;  %v8141_v37 = vld [vmem:[%s9395_s4 + $0x184] sm:$0xf0]  ;;  %v6811_v43 = vor.u32 %v8125_v30, %v6810_v29 }
 0x280   : > { %4022 = vmatpush.bf16.msrb.mxu1 %v6855_v39  ;;  %4134 = vmatpush.bf16.msrb.mxu2 %v6915_v40  ;;  %v8140_v38 = vld [vmem:[%s9395_s4 + $0x184] sm:$0xf]  ;;  %v6876_v39 = vld [vmem:[%s9395_s4 + $0x188] sm:$0xf0]  ;;  %v6994_v40 = vld [vmem:[%s9395_s4 + $0x270] sm:$0xf]  ;;  %v6815_v47 = vor.u32 %v8124_v33, %v6812_v34  ;;  %v6875_v48 = vor.u32 %v8141_v37, %v6874_v35 }
 0x281   : > { %4147 = vmatpush.bf16.msrb.mxu3 %v6919_v45  ;;  %v8171_v41 = vld [vmem:[%s9395_s4 + $0x274] sm:$0xf0]  ;;  %v8170_v42 = vld [vmem:[%s9395_s4 + $0x274] sm:$0xf]  ;;  %v6996_v44 = vld [vmem:[%s9395_s4 + $0x278] sm:$0xf0]  ;;  %v6879_v52 = vor.u32 %v8140_v38, %v6876_v39 }
 0x282   : > { %v7058_v45 = vld [vmem:[%s9395_s4 + $0x2f0] sm:$0xf]  ;;  %v8187_v46 = vld [vmem:[%s9395_s4 + $0x2f4] sm:$0xf0]  ;;  %v8186_v49 = vld [vmem:[%s9395_s4 + $0x2f4] sm:$0xf] }
 0x283   : > { %4010 = vmatpush.bf16.msrb.mxu0 %v6843_v53  ;;  %v7060_v50 = vld [vmem:[%s9395_s4 + $0x2f8] sm:$0xf0]  ;;  %v6995_v53 = vor.u32 %v8171_v41, %v6994_v40  ;;  %v6986_v57 = vld [vmem:[%s9395_s4 + $0x260] sm:$0xf]  ;;  %v8169_v58 = vld [vmem:[%s9395_s4 + $0x264] sm:$0xf0] }
 0x284   : > { %4023 = vmatpush.bf16.msrb.mxu1 %v6847_v55  ;;  %4135 = vmatpush.bf16.msrb.mxu2 %v6907_v56  ;;  %v6999_v55 = vor.u32 %v8170_v42, %v6996_v44  ;;  %v7059_v56 = vor.u32 %v8187_v46, %v7058_v45  ;;  %v8168_v59 = vld [vmem:[%s9395_s4 + $0x264] sm:$0xf]  ;;  %v6988_v62 = vld [vmem:[%s9395_s4 + $0x268] sm:$0xf0]  ;;  %v7050_v63 = vld [vmem:[%s9395_s4 + $0x2e0] sm:$0xf] }
 0x285   : > { %4148 = vmatpush.bf16.msrb.mxu3 %v6911_v61  ;;  %v7063_v61 = vor.u32 %v8186_v49, %v7060_v50  ;;  %v8185_v0 = vld [vmem:[%s9395_s4 + $0x2e4] sm:$0xf0]  ;;  %v8184_v1 = vld [vmem:[%s9395_s4 + $0x2e4] sm:$0xf]  ;;  %v7052_v2 = vld [vmem:[%s9395_s4 + $0x2e8] sm:$0xf0] }
 0x286   : > { %v3910_v3 = vperm.slane %v9660_v51, 1  ;;  %v6978_v7 = vld [vmem:[%s9395_s4 + $0x250] sm:$0xf]  ;;  %v8167_v8 = vld [vmem:[%s9395_s4 + $0x254] sm:$0xf0] }
 0x287   : > { %4011 = vmatpush.bf16.msrb.mxu0 %v6835_v4  ;;  %v6987_v4 = vor.u32 %v8169_v58, %v6986_v57  ;;  %v8166_v9 = vld [vmem:[%s9395_s4 + $0x254] sm:$0xf]  ;;  %v6980_v11 = vld [vmem:[%s9395_s4 + $0x258] sm:$0xf0]  ;;  %v7042_v12 = vld [vmem:[%s9395_s4 + $0x2d0] sm:$0xf] }
 0x288   : > { %4024 = vmatpush.bf16.msrb.mxu1 %v6839_v5  ;;  %4136 = vmatpush.bf16.msrb.mxu2 %v6899_v6  ;;  %v6991_v5 = vor.u32 %v8168_v59, %v6988_v62  ;;  %v7051_v6 = vor.u32 %v8185_v0, %v7050_v63  ;;  %v8183_v13 = vld [vmem:[%s9395_s4 + $0x2d4] sm:$0xf0]  ;;  %v8182_v14 = vld [vmem:[%s9395_s4 + $0x2d4] sm:$0xf]  ;;  %v7044_v15 = vld [vmem:[%s9395_s4 + $0x2d8] sm:$0xf0] }
 0x289   : > { %4149 = vmatpush.bf16.msrb.mxu3 %v6903_v10  ;;  %v7055_v10 = vor.u32 %v8184_v1, %v7052_v2  ;;  %v6970_v19 = vld [vmem:[%s9395_s4 + $0x240] sm:$0xf]  ;;  %v8165_v20 = vld [vmem:[%s9395_s4 + $0x244] sm:$0xf0]  ;;  %v8164_v21 = vld [vmem:[%s9395_s4 + $0x244] sm:$0xf] }
 0x28a   : > { %v6972_v23 = vld [vmem:[%s9395_s4 + $0x248] sm:$0xf0]  ;;  %v7034_v24 = vld [vmem:[%s9395_s4 + $0x2c0] sm:$0xf]  ;;  %v8181_v25 = vld [vmem:[%s9395_s4 + $0x2c4] sm:$0xf0] }
 0x28b   : > { %4012 = vmatpush.bf16.msrb.mxu0 %v6827_v16  ;;  %v6979_v16 = vor.u32 %v8167_v8, %v6978_v7  ;;  %v8180_v26 = vld [vmem:[%s9395_s4 + $0x2c4] sm:$0xf]  ;;  %v7036_v27 = vld [vmem:[%s9395_s4 + $0x2c8] sm:$0xf0]  ;;  %v6975_v29 = vor.u32 %v8164_v21, %v6972_v23  ;;  %v7035_v30 = vor.u32 %v8181_v25, %v7034_v24  ;;  %v8162_v33 = vld [vmem:[%s9395_s4 + $0x234] sm:$0xf] }
 0x28c   : > { %4025 = vmatpush.bf16.msrb.mxu1 %v6831_v17  ;;  %4137 = vmatpush.bf16.msrb.mxu2 %v6891_v18  ;;  %v6983_v17 = vor.u32 %v8166_v9, %v6980_v11  ;;  %v7043_v18 = vor.u32 %v8183_v13, %v7042_v12  ;;  %v7039_v34 = vor.u32 %v8180_v26, %v7036_v27  ;;  %v6964_v35 = vld [vmem:[%s9395_s4 + $0x238] sm:$0xf0]  ;;  %v8179_v37 = vld [vmem:[%s9395_s4 + $0x2b4] sm:$0xf0]  ;;  %v8178_v38 = vld [vmem:[%s9395_s4 + $0x2b4] sm:$0xf] }
 0x28d   : > { %4150 = vmatpush.bf16.msrb.mxu3 %v6895_v22  ;;  %v7047_v22 = vor.u32 %v8182_v14, %v7044_v15  ;;  %v7028_v39 = vld [vmem:[%s9395_s4 + $0x2b8] sm:$0xf0]  ;;  %v6967_v41 = vor.u32 %v8162_v33, %v6964_v35  ;;  %v8161_v44 = vld [vmem:[%s9395_s4 + $0x224] sm:$0xf0]  ;;  %v8160_v45 = vld [vmem:[%s9395_s4 + $0x224] sm:$0xf] }
 0x28e   : > { %v7031_v46 = vor.u32 %v8178_v38, %v7028_v39  ;;  %v8177_v49 = vld [vmem:[%s9395_s4 + $0x2a4] sm:$0xf0]  ;;  %v8176_v50 = vld [vmem:[%s9395_s4 + $0x2a4] sm:$0xf]  ;;  %v8159_v57 = vld [vmem:[%s9395_s4 + $0x214] sm:$0xf0] }
 0x28f   : > { %4013 = vmatpush.bf16.msrb.mxu0 %v6819_v28  ;;  %v6971_v28 = vor.u32 %v8165_v20, %v6970_v19  ;;  %v8158_v58 = vld [vmem:[%s9395_s4 + $0x214] sm:$0xf]  ;;  %v7010_v62 = vld [vmem:[%s9395_s4 + $0x290] sm:$0xf]  ;;  %v8175_v63 = vld [vmem:[%s9395_s4 + $0x294] sm:$0xf0] }
 0x290   : > { %4026 = vmatpush.bf16.msrb.mxu1 %v6823_v31  ;;  %4138 = vmatpush.bf16.msrb.mxu2 %v6883_v32  ;;  %v6962_v31 = vld [vmem:[%s9395_s4 + $0x230] sm:$0xf]  ;;  %v8163_v32 = vld [vmem:[%s9395_s4 + $0x234] sm:$0xf0]  ;;  %v8174_v0 = vld [vmem:[%s9395_s4 + $0x294] sm:$0xf] }
 0x291   : > { %4151 = vmatpush.bf16.msrb.mxu3 %v6887_v36  ;;  %v7026_v36 = vld [vmem:[%s9395_s4 + $0x2b0] sm:$0xf]  ;;  %v6963_v40 = vor.u32 %v8163_v32, %v6962_v31  ;;  %v7012_v1 = vld [vmem:[%s9395_s4 + $0x298] sm:$0xf0]  ;;  %v8156_v7 = vld [vmem:[%s9395_s4 + $0x204] sm:$0xf] }
 0x292   : > { %v7027_v42 = vor.u32 %v8179_v37, %v7026_v36  ;;  %v6940_v8 = vld [vmem:[%s9395_s4 + $0x208] sm:$0xf0]  ;;  %v7002_v9 = vld [vmem:[%s9395_s4 + $0x280] sm:$0xf]  ;;  %v8173_v11 = vld [vmem:[%s9395_s4 + $0x284] sm:$0xf0] }
 0x293   : > { %4014 = vmatpush.bf16.msrb.mxu0 %v6811_v43  ;;  %v6954_v43 = vld [vmem:[%s9395_s4 + $0x220] sm:$0xf]  ;;  %v8172_v12 = vld [vmem:[%s9395_s4 + $0x284] sm:$0xf]  ;;  %v7004_v13 = vld [vmem:[%s9395_s4 + $0x288] sm:$0xf0]  ;;  %v6943_v21 = vor.u32 %v8156_v7, %v6940_v8 }
 0x294   : > { %4027 = vmatpush.bf16.msrb.mxu1 %v6815_v47  ;;  %4139 = vmatpush.bf16.msrb.mxu2 %v6875_v48  ;;  %v6956_v47 = vld [vmem:[%s9395_s4 + $0x228] sm:$0xf0]  ;;  %v7018_v48 = vld [vmem:[%s9395_s4 + $0x2a0] sm:$0xf]  ;;  %v7122_v14 = vld [vmem:[%s9395_s4 + $0x370] sm:$0xf]  ;;  %v7007_v25 = vor.u32 %v8172_v12, %v7004_v13 }
 0x295   : > { %4152 = vmatpush.bf16.msrb.mxu3 %v6879_v52  ;;  %v7020_v52 = vld [vmem:[%s9395_s4 + $0x2a8] sm:$0xf0]  ;;  %v8203_v15 = vld [vmem:[%s9395_s4 + $0x374] sm:$0xf0]  ;;  %v7186_v19 = vld [vmem:[%s9395_s4 + $0x3f0] sm:$0xf] }
 0x296   : > { %4015 = vmatmul.bf16.vlgmr.msrb.gmra.mxu0 %v3910_v3  ;;  %v7023_v59 = vor.u32 %v8176_v50, %v7020_v52  ;;  %v8219_v20 = vld [vmem:[%s9395_s4 + $0x3f4] sm:$0xf0]  ;;  %v8218_v23 = vld [vmem:[%s9395_s4 + $0x3f4] sm:$0xf]  ;;  %v7188_v24 = vld [vmem:[%s9395_s4 + $0x3f8] sm:$0xf0]  ;;  %v7123_v26 = vor.u32 %v8203_v15, %v7122_v14 }
 0x297   : > { %4257 = vmatpush.bf16.msra.mxu0 %v6995_v53  ;;  %4140 = vmatmul.bf16.vlgmr.msrb.gmra.mxu2 %v4035_v54  ;;  %v6955_v53 = vor.u32 %v8161_v44, %v6954_v43  ;;  %v4160_v27 = vperm.slane %v9660_v51, 2  ;;  %v8201_v31 = vld [vmem:[%s9395_s4 + $0x364] sm:$0xf0]  ;;  %v8200_v32 = vld [vmem:[%s9395_s4 + $0x364] sm:$0xf]  ;;  %v7191_v33 = vor.u32 %v8218_v23, %v7188_v24  ;;  %v4285_v37 = vperm.slane %v9666_v60, 2 }
 0x298   : > { %4270 = vmatpush.bf16.msra.mxu1 %v6999_v55  ;;  %4382 = vmatpush.bf16.msra.mxu2 %v7059_v56  ;;  %v7019_v55 = vor.u32 %v8177_v49, %v7018_v48  ;;  %v6946_v56 = vld [vmem:[%s9395_s4 + $0x210] sm:$0xf]  ;;  %v7178_v35 = vld [vmem:[%s9395_s4 + $0x3e0] sm:$0xf]  ;;  %v8217_v36 = vld [vmem:[%s9395_s4 + $0x3e4] sm:$0xf0] }
 0x299   : > { %4395 = vmatpush.bf16.msra.mxu3 %v7063_v61  ;;  %4028 = vmatmul.bf16.vlgmr.msrb.gmra.mxu1 %v3910_v3  ;;  %v6948_v61 = vld [vmem:[%s9395_s4 + $0x218] sm:$0xf0]  ;;  %v6947_v2 = vor.u32 %v8159_v57, %v6946_v56  ;;  %v6938_v3 = vld [vmem:[%s9395_s4 + $0x200] sm:$0xf]  ;;  %v8216_v38 = vld [vmem:[%s9395_s4 + $0x3e4] sm:$0xf] }
 0x29a   : > { %4153 = vmatmul.bf16.vlgmr.msrb.gmra.mxu3 %v4035_v54  ;;  %v6959_v54 = vor.u32 %v8160_v45, %v6956_v47  ;;  %v7180_v39 = vld [vmem:[%s9395_s4 + $0x3e8] sm:$0xf0]  ;;  %v7106_v43 = vld [vmem:[%s9395_s4 + $0x350] sm:$0xf]  ;;  %v8199_v44 = vld [vmem:[%s9395_s4 + $0x354] sm:$0xf0] }
 0x29b   : > { %4258 = vmatpush.bf16.msra.mxu0 %v6987_v4  ;;  %v8157_v4 = vld [vmem:[%s9395_s4 + $0x204] sm:$0xf0]  ;;  %v8198_v45 = vld [vmem:[%s9395_s4 + $0x354] sm:$0xf]  ;;  %v7108_v47 = vld [vmem:[%s9395_s4 + $0x358] sm:$0xf0] }
 0x29c   : > { %4271 = vmatpush.bf16.msra.mxu1 %v6991_v5  ;;  %4383 = vmatpush.bf16.msra.mxu2 %v7051_v6  ;;  %v6951_v5 = vor.u32 %v8158_v58, %v6948_v61  ;;  %v7011_v6 = vor.u32 %v8175_v63, %v7010_v62  ;;  %v7170_v48 = vld [vmem:[%s9395_s4 + $0x3d0] sm:$0xf]  ;;  %v8215_v49 = vld [vmem:[%s9395_s4 + $0x3d4] sm:$0xf0]  ;;  %v8214_v50 = vld [vmem:[%s9395_s4 + $0x3d4] sm:$0xf] }
 0x29d   : > { %4396 = vmatpush.bf16.msra.mxu3 %v7055_v10  ;;  %v7015_v10 = vor.u32 %v8174_v0, %v7012_v1  ;;  %v7172_v52 = vld [vmem:[%s9395_s4 + $0x3d8] sm:$0xf0]  ;;  %v7098_v56 = vld [vmem:[%s9395_s4 + $0x340] sm:$0xf]  ;;  %v8197_v57 = vld [vmem:[%s9395_s4 + $0x344] sm:$0xf0] }
 0x29e   : > { %v8196_v58 = vld [vmem:[%s9395_s4 + $0x344] sm:$0xf]  ;;  %v7100_v61 = vld [vmem:[%s9395_s4 + $0x348] sm:$0xf0]  ;;  %v7162_v62 = vld [vmem:[%s9395_s4 + $0x3c0] sm:$0xf] }
 0x29f   : > { %4259 = vmatpush.bf16.msra.mxu0 %v6979_v16  ;;  %v8202_v16 = vld [vmem:[%s9395_s4 + $0x374] sm:$0xf]  ;;  %v8213_v63 = vld [vmem:[%s9395_s4 + $0x3c4] sm:$0xf0]  ;;  %v8212_v0 = vld [vmem:[%s9395_s4 + $0x3c4] sm:$0xf] }
 0x2a0   : > { %4272 = vmatpush.bf16.msra.mxu1 %v6983_v17  ;;  %4384 = vmatpush.bf16.msra.mxu2 %v7043_v18  ;;  %v6939_v17 = vor.u32 %v8157_v4, %v6938_v3  ;;  %v7124_v18 = vld [vmem:[%s9395_s4 + $0x378] sm:$0xf0]  ;;  %v7164_v1 = vld [vmem:[%s9395_s4 + $0x3c8] sm:$0xf0]  ;;  %v7103_v3 = vor.u32 %v8196_v58, %v7100_v61  ;;  %v7163_v4 = vor.u32 %v8213_v63, %v7162_v62  ;;  %v8194_v7 = vld [vmem:[%s9395_s4 + $0x334] sm:$0xf] }
 0x2a1   : > { %4397 = vmatpush.bf16.msra.mxu3 %v7047_v22  ;;  %v7003_v22 = vor.u32 %v8173_v11, %v7002_v9  ;;  %v7167_v8 = vor.u32 %v8212_v0, %v7164_v1  ;;  %v7092_v9 = vld [vmem:[%s9395_s4 + $0x338] sm:$0xf0]  ;;  %v8211_v11 = vld [vmem:[%s9395_s4 + $0x3b4] sm:$0xf0]  ;;  %v8210_v12 = vld [vmem:[%s9395_s4 + $0x3b4] sm:$0xf] }
 0x2a2   : > { %v7156_v13 = vld [vmem:[%s9395_s4 + $0x3b8] sm:$0xf0]  ;;  %v7095_v15 = vor.u32 %v8194_v7, %v7092_v9  ;;  %v8209_v23 = vld [vmem:[%s9395_s4 + $0x3a4] sm:$0xf0]  ;;  %v8208_v24 = vld [vmem:[%s9395_s4 + $0x3a4] sm:$0xf] }
 0x2a3   : > { %4260 = vmatpush.bf16.msra.mxu0 %v6971_v28  ;;  %v7127_v28 = vor.u32 %v8202_v16, %v7124_v18  ;;  %v8193_v18 = vld [vmem:[%s9395_s4 + $0x324] sm:$0xf0]  ;;  %v8250_v61 = vld [vmem:[%s9395_s4 + $0x4f4] sm:$0xf]  ;;  %v7316_v62 = vld [vmem:[%s9395_s4 + $0x4f8] sm:$0xf0] }
 0x2a4   : > { %4273 = vmatpush.bf16.msra.mxu1 %v6975_v29  ;;  %4385 = vmatpush.bf16.msra.mxu2 %v7035_v30  ;;  %v7187_v29 = vor.u32 %v8219_v20, %v7186_v19  ;;  %v7114_v30 = vld [vmem:[%s9395_s4 + $0x360] sm:$0xf]  ;;  %v8192_v19 = vld [vmem:[%s9395_s4 + $0x324] sm:$0xf]  ;;  %v7159_v20 = vor.u32 %v8210_v12, %v7156_v13  ;;  %v4410_v1 = vperm.slane %v9660_v51, 3  ;;  %v7319_v7 = vor.u32 %v8250_v61, %v7316_v62 }
 0x2a5   : > { %4398 = vmatpush.bf16.msra.mxu3 %v7039_v34  ;;  %v7116_v34 = vld [vmem:[%s9395_s4 + $0x368] sm:$0xf0]  ;;  %v7306_v9 = vld [vmem:[%s9395_s4 + $0x4e0] sm:$0xf]  ;;  %v8248_v12 = vld [vmem:[%s9395_s4 + $0x4e4] sm:$0xf] }
 0x2a6   : > { %v7308_v51 = vld [vmem:[%s9395_s4 + $0x4e8] sm:$0xf0]  ;;  %v8240_v61 = vld [vmem:[%s9395_s4 + $0x4a4] sm:$0xf] }
 0x2a7   : > { %4261 = vmatpush.bf16.msra.mxu0 %v6963_v40  ;;  %v7115_v40 = vor.u32 %v8201_v31, %v7114_v30  ;;  %v8191_v30 = vld [vmem:[%s9395_s4 + $0x314] sm:$0xf0]  ;;  %v8190_v31 = vld [vmem:[%s9395_s4 + $0x314] sm:$0xf]  ;;  %v7276_v62 = vld [vmem:[%s9395_s4 + $0x4a8] sm:$0xf0] }
 0x2a8   : > { %4274 = vmatpush.bf16.msra.mxu1 %v6967_v41  ;;  %4386 = vmatpush.bf16.msra.mxu2 %v7027_v42  ;;  %v7119_v41 = vor.u32 %v8200_v32, %v7116_v34  ;;  %v7179_v42 = vor.u32 %v8217_v36, %v7178_v35  ;;  %v7138_v34 = vld [vmem:[%s9395_s4 + $0x390] sm:$0xf]  ;;  %v8207_v35 = vld [vmem:[%s9395_s4 + $0x394] sm:$0xf0]  ;;  %v8206_v36 = vld [vmem:[%s9395_s4 + $0x394] sm:$0xf] }
 0x2a9   : > { %4399 = vmatpush.bf16.msra.mxu3 %v7031_v46  ;;  %v7183_v46 = vor.u32 %v8216_v38, %v7180_v39  ;;  %v7066_v39 = vld [vmem:[%s9395_s4 + $0x300] sm:$0xf] }
 0x2ab   : > { %4262 = vmatpush.bf16.msra.mxu0 %v6955_v53  ;;  %v7107_v53 = vor.u32 %v8199_v44, %v7106_v43  ;;  %v8188_v43 = vld [vmem:[%s9395_s4 + $0x304] sm:$0xf]  ;;  %v7068_v44 = vld [vmem:[%s9395_s4 + $0x308] sm:$0xf0] }
 0x2ac   : > { %4275 = vmatpush.bf16.msra.mxu1 %v6959_v54  ;;  %4387 = vmatpush.bf16.msra.mxu2 %v7019_v55  ;;  %v7111_v54 = vor.u32 %v8198_v45, %v7108_v47  ;;  %v7171_v55 = vor.u32 %v8215_v49, %v7170_v48  ;;  %v7130_v45 = vld [vmem:[%s9395_s4 + $0x380] sm:$0xf]  ;;  %v8205_v47 = vld [vmem:[%s9395_s4 + $0x384] sm:$0xf0]  ;;  %v8204_v48 = vld [vmem:[%s9395_s4 + $0x384] sm:$0xf]  ;;  %v7071_v58 = vor.u32 %v8188_v43, %v7068_v44 }
 0x2ad   : > { %4400 = vmatpush.bf16.msra.mxu3 %v7023_v59  ;;  %v7175_v59 = vor.u32 %v8214_v50, %v7172_v52  ;;  %v7132_v49 = vld [vmem:[%s9395_s4 + $0x388] sm:$0xf0]  ;;  %v7250_v50 = vld [vmem:[%s9395_s4 + $0x470] sm:$0xf]  ;;  %v8235_v52 = vld [vmem:[%s9395_s4 + $0x474] sm:$0xf0] }
 0x2ae   : > { %v7135_v63 = vor.u32 %v8204_v48, %v7132_v49  ;;  %v7251_v0 = vor.u32 %v8235_v52, %v7250_v50  ;;  %v7220_v43 = vld [vmem:[%s9395_s4 + $0x438] sm:$0xf0]  ;;  %v7282_v44 = vld [vmem:[%s9395_s4 + $0x4b0] sm:$0xf]  ;;  %v3653_v48 = vld [vmem:[%s9649_s21 + $0x8] sm:$0xff] }
 0x2af   : > { %4263 = vmatpush.bf16.msra.mxu0 %v6947_v2  ;;  %v7099_v2 = vor.u32 %v8197_v57, %v7098_v56  ;;  %v7314_v56 = vld [vmem:[%s9395_s4 + $0x4f0] sm:$0xf]  ;;  %v8251_v57 = vld [vmem:[%s9395_s4 + $0x4f4] sm:$0xf0] }
 0x2b0   : > { %4276 = vmatpush.bf16.msra.mxu1 %v6951_v5  ;;  %4388 = vmatpush.bf16.msra.mxu2 %v7011_v6  ;;  %v7090_v5 = vld [vmem:[%s9395_s4 + $0x330] sm:$0xf]  ;;  %v8195_v6 = vld [vmem:[%s9395_s4 + $0x334] sm:$0xf0] }
 0x2b1   : > { %4401 = vmatpush.bf16.msra.mxu3 %v7015_v10  ;;  %v7154_v10 = vld [vmem:[%s9395_s4 + $0x3b0] sm:$0xf]  ;;  %v7091_v14 = vor.u32 %v8195_v6, %v7090_v5  ;;  %v8233_v5 = vld [vmem:[%s9395_s4 + $0x464] sm:$0xf0]  ;;  %v8232_v6 = vld [vmem:[%s9395_s4 + $0x464] sm:$0xf] }
 0x2b2   : > { %v7155_v16 = vor.u32 %v8211_v11, %v7154_v10  ;;  %v8249_v10 = vld [vmem:[%s9395_s4 + $0x4e4] sm:$0xf0]  ;;  %v4535_v11 = vperm.slane %v9666_v60, 3  ;;  %v7311_v60 = vor.u32 %v8248_v12, %v7308_v51  ;;  %v7194_v51 = vld [vmem:[%s9395_s4 + $0x400] sm:$0xf] }
 0x2b3   : > { %4264 = vmatpush.bf16.msra.mxu0 %v6939_v17  ;;  %v7082_v17 = vld [vmem:[%s9395_s4 + $0x320] sm:$0xf] }
 0x2b4   : > { %4277 = vmatpush.bf16.msra.mxu1 %v6943_v21  ;;  %4389 = vmatpush.bf16.msra.mxu2 %v7003_v22  ;;  %v7084_v21 = vld [vmem:[%s9395_s4 + $0x328] sm:$0xf0]  ;;  %v7146_v22 = vld [vmem:[%s9395_s4 + $0x3a0] sm:$0xf] }
 0x2b5   : > { %4402 = vmatpush.bf16.msra.mxu3 %v7007_v25  ;;  %v7148_v25 = vld [vmem:[%s9395_s4 + $0x3a8] sm:$0xf0] }
 0x2b6   : > { %4265 = vmatmul.bf16.vlgmr.msra.gmra.mxu0 %v4160_v27  ;;  %v7151_v32 = vor.u32 %v8208_v24, %v7148_v25 }
 0x2b7   : > { %4507 = vmatpush.bf16.msrb.mxu0 %v7123_v26  ;;  %4278 = vmatmul.bf16.vlgmr.msra.gmra.mxu1 %v4160_v27  ;;  %v7083_v26 = vor.u32 %v8193_v18, %v7082_v17  ;;  %v7087_v27 = vor.u32 %v8192_v19, %v7084_v21  ;;  %v8231_v17 = vld [vmem:[%s9395_s4 + $0x454] sm:$0xf0]  ;;  %v8230_v18 = vld [vmem:[%s9395_s4 + $0x454] sm:$0xf]  ;;  %v7236_v19 = vld [vmem:[%s9395_s4 + $0x458] sm:$0xf0] }
 0x2b8   : > { %4520 = vmatpush.bf16.msrb.mxu1 %v7127_v28  ;;  %4632 = vmatpush.bf16.msrb.mxu2 %v7187_v29  ;;  %v7147_v28 = vor.u32 %v8209_v23, %v7146_v22  ;;  %v7074_v29 = vld [vmem:[%s9395_s4 + $0x310] sm:$0xf]  ;;  %v8247_v21 = vld [vmem:[%s9395_s4 + $0x4d4] sm:$0xf0]  ;;  %v8246_v22 = vld [vmem:[%s9395_s4 + $0x4d4] sm:$0xf]  ;;  %v7239_v25 = vor.u32 %v8230_v18, %v7236_v19 }
 0x2b9   : > { %4645 = vmatpush.bf16.msrb.mxu3 %v7191_v33  ;;  %4390 = vmatmul.bf16.vlgmr.msra.gmra.mxu2 %v4285_v37  ;;  %v7076_v33 = vld [vmem:[%s9395_s4 + $0x318] sm:$0xf0]  ;;  %v7075_v38 = vor.u32 %v8191_v30, %v7074_v29  ;;  %v8228_v29 = vld [vmem:[%s9395_s4 + $0x444] sm:$0xf]  ;;  %v7258_v18 = vld [vmem:[%s9395_s4 + $0x480] sm:$0xf] }
 0x2ba   : > { %4403 = vmatmul.bf16.vlgmr.msra.gmra.mxu3 %v4285_v37  ;;  %v7140_v37 = vld [vmem:[%s9395_s4 + $0x398] sm:$0xf0] }
 0x2bb   : > { %4508 = vmatpush.bf16.msrb.mxu0 %v7115_v40  ;;  %v8189_v40 = vld [vmem:[%s9395_s4 + $0x304] sm:$0xf0]  ;;  %v7300_v23 = vld [vmem:[%s9395_s4 + $0x4d8] sm:$0xf0] }
 0x2bc   : > { %4521 = vmatpush.bf16.msrb.mxu1 %v7119_v41  ;;  %4633 = vmatpush.bf16.msrb.mxu2 %v7179_v42  ;;  %v7079_v41 = vor.u32 %v8190_v31, %v7076_v33  ;;  %v7139_v42 = vor.u32 %v8207_v35, %v7138_v34  ;;  %v7303_v30 = vor.u32 %v8246_v22, %v7300_v23  ;;  %v7228_v31 = vld [vmem:[%s9395_s4 + $0x448] sm:$0xf0]  ;;  %v8245_v33 = vld [vmem:[%s9395_s4 + $0x4c4] sm:$0xf0]  ;;  %v8244_v34 = vld [vmem:[%s9395_s4 + $0x4c4] sm:$0xf] }
 0x2bd   : > { %4646 = vmatpush.bf16.msrb.mxu3 %v7183_v46  ;;  %v7143_v46 = vor.u32 %v8206_v36, %v7140_v37  ;;  %v7292_v35 = vld [vmem:[%s9395_s4 + $0x4c8] sm:$0xf0]  ;;  %v7231_v37 = vor.u32 %v8228_v29, %v7228_v31  ;;  %v7442_v29 = vld [vmem:[%s9395_s4 + $0x5f0] sm:$0xf] }
 0x2be   : > { %v7260_v22 = vld [vmem:[%s9395_s4 + $0x488] sm:$0xf0] }
 0x2bf   : > { %4509 = vmatpush.bf16.msrb.mxu0 %v7107_v53  ;;  %v8234_v53 = vld [vmem:[%s9395_s4 + $0x474] sm:$0xf] }
 0x2c0   : > { %4522 = vmatpush.bf16.msrb.mxu1 %v7111_v54  ;;  %4634 = vmatpush.bf16.msrb.mxu2 %v7171_v55  ;;  %v7067_v54 = vor.u32 %v8189_v40, %v7066_v39  ;;  %v7252_v55 = vld [vmem:[%s9395_s4 + $0x478] sm:$0xf0]  ;;  %v7218_v39 = vld [vmem:[%s9395_s4 + $0x430] sm:$0xf]  ;;  %v8227_v40 = vld [vmem:[%s9395_s4 + $0x434] sm:$0xf0] }
 0x2c1   : > { %4647 = vmatpush.bf16.msrb.mxu3 %v7175_v59  ;;  %v7131_v59 = vor.u32 %v8205_v47, %v7130_v45  ;;  %v8243_v45 = vld [vmem:[%s9395_s4 + $0x4b4] sm:$0xf0]  ;;  %v7284_v47 = vld [vmem:[%s9395_s4 + $0x4b8] sm:$0xf0]  ;;  %v7219_v49 = vor.u32 %v8227_v40, %v7218_v39 }
 0x2c2   : > { %v7283_v52 = vor.u32 %v8243_v45, %v7282_v44  ;;  %v7372_v45 = vld [vmem:[%s9395_s4 + $0x568] sm:$0xf0] }
 0x2c3   : > { %4510 = vmatpush.bf16.msrb.mxu0 %v7099_v2  ;;  %v7255_v2 = vor.u32 %v8234_v53, %v7252_v55  ;;  %v7210_v53 = vld [vmem:[%s9395_s4 + $0x420] sm:$0xf]  ;;  %v8224_v55 = vld [vmem:[%s9395_s4 + $0x424] sm:$0xf] }
 0x2c4   : > { %4523 = vmatpush.bf16.msrb.mxu1 %v7103_v3  ;;  %4635 = vmatpush.bf16.msrb.mxu2 %v7163_v4  ;;  %v7315_v3 = vor.u32 %v8251_v57, %v7314_v56  ;;  %v7242_v4 = vld [vmem:[%s9395_s4 + $0x460] sm:$0xf]  ;;  %v7212_v57 = vld [vmem:[%s9395_s4 + $0x428] sm:$0xf0] }
 0x2c5   : > { %4648 = vmatpush.bf16.msrb.mxu3 %v7167_v8  ;;  %v7244_v8 = vld [vmem:[%s9395_s4 + $0x468] sm:$0xf0]  ;;  %v7243_v13 = vor.u32 %v8233_v5, %v7242_v4  ;;  %v8223_v4 = vld [vmem:[%s9395_s4 + $0x414] sm:$0xf0]  ;;  %v8222_v5 = vld [vmem:[%s9395_s4 + $0x414] sm:$0xf] }
 0x2c7   : > { %4511 = vmatpush.bf16.msrb.mxu0 %v7091_v14  ;;  %v7247_v14 = vor.u32 %v8232_v6, %v7244_v8  ;;  %v7279_v6 = vor.u32 %v8240_v61, %v7276_v62  ;;  %v7266_v8 = vld [vmem:[%s9395_s4 + $0x490] sm:$0xf]  ;;  %v8279_v62 = vld [vmem:[%s9395_s4 + $0x5d4] sm:$0xf0] }
 0x2c8   : > { %4524 = vmatpush.bf16.msrb.mxu1 %v7095_v15  ;;  %4636 = vmatpush.bf16.msrb.mxu2 %v7155_v16  ;;  %v7307_v15 = vor.u32 %v8249_v10, %v7306_v9  ;;  %v7234_v16 = vld [vmem:[%s9395_s4 + $0x450] sm:$0xf]  ;;  %v8239_v9 = vld [vmem:[%s9395_s4 + $0x494] sm:$0xf0]  ;;  %v8238_v10 = vld [vmem:[%s9395_s4 + $0x494] sm:$0xf] }
 0x2c9   : > { %4649 = vmatpush.bf16.msrb.mxu3 %v7159_v20  ;;  %v7298_v20 = vld [vmem:[%s9395_s4 + $0x4d0] sm:$0xf]  ;;  %v7235_v24 = vor.u32 %v8231_v17, %v7234_v16  ;;  %v7267_v16 = vor.u32 %v8239_v9, %v7266_v8  ;;  %v7196_v17 = vld [vmem:[%s9395_s4 + $0x408] sm:$0xf0]  ;;  %v7418_v9 = vld [vmem:[%s9395_s4 + $0x5c0] sm:$0xf] }
 0x2ca   : > { %v7426_v61 = vld [vmem:[%s9395_s4 + $0x5d0] sm:$0xf]  ;;  %v7356_v8 = vld [vmem:[%s9395_s4 + $0x548] sm:$0xf0] }
 0x2cb   : > { %4512 = vmatpush.bf16.msrb.mxu0 %v7083_v26  ;;  %v7299_v26 = vor.u32 %v8247_v21, %v7298_v20  ;;  %v8237_v20 = vld [vmem:[%s9395_s4 + $0x484] sm:$0xf0]  ;;  %v8236_v21 = vld [vmem:[%s9395_s4 + $0x484] sm:$0xf] }
 0x2cc   : > { %4525 = vmatpush.bf16.msrb.mxu1 %v7087_v27  ;;  %4637 = vmatpush.bf16.msrb.mxu2 %v7147_v28  ;;  %v7226_v27 = vld [vmem:[%s9395_s4 + $0x440] sm:$0xf]  ;;  %v8229_v28 = vld [vmem:[%s9395_s4 + $0x444] sm:$0xf0] }
 0x2cd   : > { %4650 = vmatpush.bf16.msrb.mxu3 %v7151_v32  ;;  %v7290_v32 = vld [vmem:[%s9395_s4 + $0x4c0] sm:$0xf]  ;;  %v7227_v36 = vor.u32 %v8229_v28, %v7226_v27  ;;  %v7380_v28 = vld [vmem:[%s9395_s4 + $0x578] sm:$0xf0] }
 0x2cf   : > { %4513 = vmatpush.bf16.msrb.mxu0 %v7075_v38  ;;  %v7291_v38 = vor.u32 %v8245_v33, %v7290_v32  ;;  %v7259_v32 = vor.u32 %v8237_v20, %v7258_v18  ;;  %v8282_v33 = vld [vmem:[%s9395_s4 + $0x5f4] sm:$0xf]  ;;  %v8275_v20 = vld [vmem:[%s9395_s4 + $0x5b4] sm:$0xf0] }
 0x2d0   : > { %4526 = vmatpush.bf16.msrb.mxu1 %v7079_v41  ;;  %4638 = vmatpush.bf16.msrb.mxu2 %v7139_v42  ;;  %v8226_v41 = vld [vmem:[%s9395_s4 + $0x434] sm:$0xf]  ;;  %v7295_v42 = vor.u32 %v8244_v34, %v7292_v35  ;;  %v7444_v34 = vld [vmem:[%s9395_s4 + $0x5f8] sm:$0xf0] }
 0x2d1   : > { %4651 = vmatpush.bf16.msrb.mxu3 %v7143_v46  ;;  %v8242_v46 = vld [vmem:[%s9395_s4 + $0x4b4] sm:$0xf]  ;;  %v7223_v50 = vor.u32 %v8226_v41, %v7220_v43  ;;  %v7370_v41 = vld [vmem:[%s9395_s4 + $0x560] sm:$0xf]  ;;  %v8264_v43 = vld [vmem:[%s9395_s4 + $0x564] sm:$0xf]  ;;  %v7447_v44 = vor.u32 %v8282_v33, %v7444_v34 }
 0x2d2   : > { %v7287_v56 = vor.u32 %v8242_v46, %v7284_v47  ;;  %v7434_v46 = vld [vmem:[%s9395_s4 + $0x5e0] sm:$0xf]  ;;  %v8281_v47 = vld [vmem:[%s9395_s4 + $0x5e4] sm:$0xf0]  ;;  %v8272_v34 = vld [vmem:[%s9395_s4 + $0x5a4] sm:$0xf] }
 0x2d3   : > { %4514 = vmatpush.bf16.msrb.mxu0 %v7067_v54  ;;  %v8225_v54 = vld [vmem:[%s9395_s4 + $0x424] sm:$0xf0] }
 0x2d4   : > { %4527 = vmatpush.bf16.msrb.mxu1 %v7071_v58  ;;  %4639 = vmatpush.bf16.msrb.mxu2 %v7131_v59  ;;  %v7274_v58 = vld [vmem:[%s9395_s4 + $0x4a0] sm:$0xf]  ;;  %v8241_v59 = vld [vmem:[%s9395_s4 + $0x4a4] sm:$0xf0] }
 0x2d5   : > { %4652 = vmatpush.bf16.msrb.mxu3 %v7135_v63  ;;  %v7211_v63 = vor.u32 %v8225_v54, %v7210_v53  ;;  %v7375_v53 = vor.u32 %v8264_v43, %v7372_v45  ;;  %v7435_v54 = vor.u32 %v8281_v47, %v7434_v46  ;;  %v8273_v33 = vld [vmem:[%s9395_s4 + $0x5a4] sm:$0xf0]  ;;  %v7394_v45 = vld [vmem:[%s9395_s4 + $0x590] sm:$0xf]  ;;  %v8271_v46 = vld [vmem:[%s9395_s4 + $0x594] sm:$0xf0] }
 0x2d6   : > { %4515 = vmatmul.bf16.vlgmr.msrb.gmra.mxu0 %v4410_v1  ;;  %v8270_v47 = vld [vmem:[%s9395_s4 + $0x594] sm:$0xf] }
 0x2d7   : > { %4760 = vmatpush.bf16.msra.mxu0 %v7251_v0  ;;  %4528 = vmatmul.bf16.vlgmr.msrb.gmra.mxu1 %v4410_v1  ;;  %v3656_v0 = vpack.c.bf16 %v3653_v48, %v3653_v48  ;;  %v7215_v1 = vor.u32 %v8224_v55, %v7212_v57  ;;  %v7362_v55 = vld [vmem:[%s9395_s4 + $0x550] sm:$0xf]  ;;  %v8262_v57 = vld [vmem:[%s9395_s4 + $0x554] sm:$0xf] }
 0x2d8   : > { %4773 = vmatpush.bf16.msra.mxu1 %v7255_v2  ;;  %4888 = vmatpush.bf16.msra.mxu2 %v7315_v3  ;;  %v7275_v2 = vor.u32 %v8241_v59, %v7274_v58  ;;  %v7202_v3 = vld [vmem:[%s9395_s4 + $0x410] sm:$0xf]  ;;  %v7364_v59 = vld [vmem:[%s9395_s4 + $0x558] sm:$0xf0] }
 0x2d9   : > { %4901 = vmatpush.bf16.msra.mxu3 %v7319_v7  ;;  %4640 = vmatmul.bf16.vlgmr.msrb.gmra.mxu2 %v4535_v11  ;;  %v7204_v7 = vld [vmem:[%s9395_s4 + $0x418] sm:$0xf0]  ;;  %v7203_v12 = vor.u32 %v8223_v4, %v7202_v3  ;;  %v9897_v23 = vpack.i.b16 %v3656_v0, %v3656_v0  ;;  %v7427_v3 = vor.u32 %v8279_v62, %v7426_v61  ;;  %v7354_v4 = vld [vmem:[%s9395_s4 + $0x540] sm:$0xf]  ;;  %v8269_v62 = vld [vmem:[%s9395_s4 + $0x584] sm:$0xf0] }
 0x2da   : > { %4653 = vmatmul.bf16.vlgmr.msrb.gmra.mxu3 %v4535_v11  ;;  %v7268_v11 = vld [vmem:[%s9395_s4 + $0x498] sm:$0xf0] }
 0x2db   : > { %4761 = vmatpush.bf16.msra.mxu0 %v7243_v13  ;;  %v8221_v13 = vld [vmem:[%s9395_s4 + $0x404] sm:$0xf0]  ;;  %v7271_v19 = vor.u32 %v8238_v10, %v7268_v11  ;;  %v8276_v11 = vld [vmem:[%s9395_s4 + $0x5c4] sm:$0xf] }
 0x2dc   : > { %4774 = vmatpush.bf16.msra.mxu1 %v7247_v14  ;;  %4889 = vmatpush.bf16.msra.mxu2 %v7307_v15  ;;  %v8220_v14 = vld [vmem:[%s9395_s4 + $0x404] sm:$0xf]  ;;  %v7207_v15 = vor.u32 %v8222_v5, %v7204_v7  ;;  %v7195_v27 = vor.u32 %v8221_v13, %v7194_v51  ;;  %v8261_v5 = vld [vmem:[%s9395_s4 + $0x544] sm:$0xf0] }
 0x2dd   : > { %4902 = vmatpush.bf16.msra.mxu3 %v7311_v60  ;;  %v4788_v60 = vshrl.u32 %v3656_v0, 16  ;;  %v7199_v31 = vor.u32 %v8220_v14, %v7196_v17  ;;  %v7428_v0 = vld [vmem:[%s9395_s4 + $0x5d8] sm:$0xf0]  ;;  %v8277_v10 = vld [vmem:[%s9395_s4 + $0x5c4] sm:$0xf0]  ;;  %v7355_v51 = vor.u32 %v8261_v5, %v7354_v4 }
 0x2de   : > { %v7419_v14 = vor.u32 %v8277_v10, %v7418_v9  ;;  %v8258_v17 = vld [vmem:[%s9395_s4 + $0x534] sm:$0xf]  ;;  %v8299_v4 = vld [vmem:[%s9395_s4 + $0x674] sm:$0xf0]  ;;  %v7508_v9 = vld [vmem:[%s9395_s4 + $0x678] sm:$0xf0] }
 0x2df   : > { %4762 = vmatpush.bf16.msra.mxu0 %v7235_v24  ;;  %v7378_v24 = vld [vmem:[%s9395_s4 + $0x570] sm:$0xf]  ;;  %v9907_v35 = vpack.i.b16 %v4788_v60, %v4788_v60  ;;  %v7348_v60 = vld [vmem:[%s9395_s4 + $0x538] sm:$0xf0]  ;;  %v8298_v5 = vld [vmem:[%s9395_s4 + $0x674] sm:$0xf] }
 0x2e0   : > { %4775 = vmatpush.bf16.msra.mxu1 %v7239_v25  ;;  %4890 = vmatpush.bf16.msra.mxu2 %v7299_v26  ;;  %v8267_v25 = vld [vmem:[%s9395_s4 + $0x574] sm:$0xf0]  ;;  %v8266_v26 = vld [vmem:[%s9395_s4 + $0x574] sm:$0xf]  ;;  %v7570_v10 = vld [vmem:[%s9395_s4 + $0x6f0] sm:$0xf] }
 0x2e1   : > { %4903 = vmatpush.bf16.msra.mxu3 %v7303_v30  ;;  %v8283_v30 = vld [vmem:[%s9395_s4 + $0x5f4] sm:$0xf0]  ;;  %v7383_v39 = vor.u32 %v8266_v26, %v7380_v28  ;;  %v4791_v48 = vperm.slane %v9907_v35, 0  ;;  %v8257_v28 = vld [vmem:[%s9395_s4 + $0x524] sm:$0xf0] }
 0x2e2   : > { %v7443_v40 = vor.u32 %v8283_v30, %v7442_v29  ;;  %v8256_v29 = vld [vmem:[%s9395_s4 + $0x524] sm:$0xf] }
 0x2e3   : > { %4763 = vmatpush.bf16.msra.mxu0 %v7227_v36  ;;  %v7263_v36 = vor.u32 %v8236_v21, %v7260_v22  ;;  %v8274_v21 = vld [vmem:[%s9395_s4 + $0x5b4] sm:$0xf]  ;;  %v7412_v22 = vld [vmem:[%s9395_s4 + $0x5b8] sm:$0xf0] }
 0x2e4   : > { %4776 = vmatpush.bf16.msra.mxu1 %v7231_v37  ;;  %4891 = vmatpush.bf16.msra.mxu2 %v7291_v38  ;;  %v7379_v37 = vor.u32 %v8267_v25, %v7378_v24  ;;  %v4663_v38 = vperm.slane %v9897_v23, 0  ;;  %v7351_v25 = vor.u32 %v8258_v17, %v7348_v60  ;;  %v7415_v30 = vor.u32 %v8274_v21, %v7412_v22  ;;  %v8296_v21 = vld [vmem:[%s9395_s4 + $0x664] sm:$0xf] }
 0x2e5   : > { %4904 = vmatpush.bf16.msra.mxu3 %v7295_v42  ;;  %v8265_v42 = vld [vmem:[%s9395_s4 + $0x564] sm:$0xf0]  ;;  %v4916_v17 = vperm.slane %v9897_v23, 1 }
 0x2e7   : > { %4764 = vmatpush.bf16.msra.mxu0 %v7219_v49  ;;  %v8280_v49 = vld [vmem:[%s9395_s4 + $0x5e4] sm:$0xf] }
 0x2e8   : > { %4777 = vmatpush.bf16.msra.mxu1 %v7223_v50  ;;  %4892 = vmatpush.bf16.msra.mxu2 %v7283_v52  ;;  %v7436_v50 = vld [vmem:[%s9395_s4 + $0x5e8] sm:$0xf0]  ;;  %v7371_v52 = vor.u32 %v8265_v42, %v7370_v41  ;;  %v8255_v41 = vld [vmem:[%s9395_s4 + $0x514] sm:$0xf0]  ;;  %v8254_v42 = vld [vmem:[%s9395_s4 + $0x514] sm:$0xf] }
 0x2e9   : > { %4905 = vmatpush.bf16.msra.mxu3 %v7287_v56  ;;  %v8263_v56 = vld [vmem:[%s9395_s4 + $0x554] sm:$0xf0]  ;;  %v7439_v58 = vor.u32 %v8280_v49, %v7436_v50 }
 0x2eb   : > { %4765 = vmatpush.bf16.msra.mxu0 %v7211_v63  ;;  %v8278_v63 = vld [vmem:[%s9395_s4 + $0x5d4] sm:$0xf] }
 0x2ec   : > { %4778 = vmatpush.bf16.msra.mxu1 %v7215_v1  ;;  %4893 = vmatpush.bf16.msra.mxu2 %v7275_v2  ;;  %v7363_v1 = vor.u32 %v8263_v56, %v7362_v55  ;;  %v7367_v2 = vor.u32 %v8262_v57, %v7364_v59  ;;  %v7431_v7 = vor.u32 %v8278_v63, %v7428_v0  ;;  %v8252_v57 = vld [vmem:[%s9395_s4 + $0x504] sm:$0xf]  ;;  %v7386_v59 = vld [vmem:[%s9395_s4 + $0x580] sm:$0xf]  ;;  %v7388_v0 = vld [vmem:[%s9395_s4 + $0x588] sm:$0xf0] }
 0x2ed   : > { %4906 = vmatpush.bf16.msra.mxu3 %v7279_v6  ;;  %v8260_v6 = vld [vmem:[%s9395_s4 + $0x544] sm:$0xf]  ;;  %v7395_v56 = vor.u32 %v8271_v46, %v7394_v45  ;;  %v8310_v45 = vld [vmem:[%s9395_s4 + $0x6d4] sm:$0xf]  ;;  %v7556_v46 = vld [vmem:[%s9395_s4 + $0x6d8] sm:$0xf0] }
 0x2ee   : > { %v7359_v13 = vor.u32 %v8260_v6, %v7356_v8  ;;  %v8268_v63 = vld [vmem:[%s9395_s4 + $0x584] sm:$0xf] }
 0x2ef   : > { %4766 = vmatpush.bf16.msra.mxu0 %v7203_v12  ;;  %v7420_v12 = vld [vmem:[%s9395_s4 + $0x5c8] sm:$0xf0] }
 0x2f0   : > { %4779 = vmatpush.bf16.msra.mxu1 %v7207_v15  ;;  %4894 = vmatpush.bf16.msra.mxu2 %v7267_v16  ;;  %v7346_v15 = vld [vmem:[%s9395_s4 + $0x530] sm:$0xf]  ;;  %v8259_v16 = vld [vmem:[%s9395_s4 + $0x534] sm:$0xf0]  ;;  %v7423_v18 = vor.u32 %v8276_v11, %v7420_v12 }
 0x2f1   : > { %4907 = vmatpush.bf16.msra.mxu3 %v7271_v19  ;;  %v7410_v19 = vld [vmem:[%s9395_s4 + $0x5b0] sm:$0xf]  ;;  %v7347_v24 = vor.u32 %v8259_v16, %v7346_v15  ;;  %v8315_v11 = vld [vmem:[%s9395_s4 + $0x6f4] sm:$0xf0]  ;;  %v7391_v15 = vor.u32 %v8268_v63, %v7388_v0 }
 0x2f2   : > { %v7411_v26 = vor.u32 %v8275_v20, %v7410_v19  ;;  %v7571_v60 = vor.u32 %v8315_v11, %v7570_v10  ;;  %v7498_v19 = vld [vmem:[%s9395_s4 + $0x660] sm:$0xf]  ;;  %v8297_v20 = vld [vmem:[%s9395_s4 + $0x664] sm:$0xf0]  ;;  %v7538_v10 = vld [vmem:[%s9395_s4 + $0x6b0] sm:$0xf] }
 0x2f3   : > { %4767 = vmatpush.bf16.msra.mxu0 %v7195_v27  ;;  %v7338_v27 = vld [vmem:[%s9395_s4 + $0x520] sm:$0xf]  ;;  %v8307_v11 = vld [vmem:[%s9395_s4 + $0x6b4] sm:$0xf0] }
 0x2f4   : > { %4780 = vmatpush.bf16.msra.mxu1 %v7199_v31  ;;  %4895 = vmatpush.bf16.msra.mxu2 %v7259_v32  ;;  %v7340_v31 = vld [vmem:[%s9395_s4 + $0x528] sm:$0xf0]  ;;  %v7402_v32 = vld [vmem:[%s9395_s4 + $0x5a0] sm:$0xf] }
 0x2f5   : > { %4908 = vmatpush.bf16.msra.mxu3 %v7263_v36  ;;  %v7404_v36 = vld [vmem:[%s9395_s4 + $0x5a8] sm:$0xf0] }
 0x2f6   : > { %4768 = vmatmul.bf16.vlgmr.msra.gmra.mxu0 %v4663_v38  ;;  %v7407_v43 = vor.u32 %v8272_v34, %v7404_v36 }
 0x2f7   : > { %5013 = vmatpush.bf16.msrb.mxu0 %v7379_v37  ;;  %4781 = vmatmul.bf16.vlgmr.msra.gmra.mxu1 %v4663_v38  ;;  %v7339_v37 = vor.u32 %v8257_v28, %v7338_v27  ;;  %v7343_v38 = vor.u32 %v8256_v29, %v7340_v31  ;;  %v8313_v27 = vld [vmem:[%s9395_s4 + $0x6e4] sm:$0xf0]  ;;  %v5041_v29 = vperm.slane %v9907_v35, 1  ;;  %v7564_v31 = vld [vmem:[%s9395_s4 + $0x6e8] sm:$0xf0] }
 0x2f8   : > { %5026 = vmatpush.bf16.msrb.mxu1 %v7383_v39  ;;  %5138 = vmatpush.bf16.msrb.mxu2 %v7443_v40  ;;  %v7403_v39 = vor.u32 %v8273_v33, %v7402_v32  ;;  %v7330_v40 = vld [vmem:[%s9395_s4 + $0x510] sm:$0xf]  ;;  %v7499_v32 = vor.u32 %v8297_v20, %v7498_v19 }
 0x2f9   : > { %5151 = vmatpush.bf16.msrb.mxu3 %v7447_v44  ;;  %4896 = vmatmul.bf16.vlgmr.msra.gmra.mxu2 %v4791_v48  ;;  %v7332_v44 = vld [vmem:[%s9395_s4 + $0x518] sm:$0xf0]  ;;  %v7331_v50 = vor.u32 %v8255_v41, %v7330_v40  ;;  %v8294_v40 = vld [vmem:[%s9395_s4 + $0x654] sm:$0xf] }
 0x2fa   : > { %4909 = vmatmul.bf16.vlgmr.msra.gmra.mxu3 %v4791_v48  ;;  %v7396_v48 = vld [vmem:[%s9395_s4 + $0x598] sm:$0xf0]  ;;  %v3787_v49 = vpop.f32.mrf.mxu0  ;;  %v7335_v55 = vor.u32 %v8254_v42, %v7332_v44  ;;  %v8311_v44 = vld [vmem:[%s9395_s4 + $0x6d4] sm:$0xf0] }
 0x2fb   : > { %5014 = vmatpush.bf16.msrb.mxu0 %v7371_v52  ;;  %v7322_v52 = vld [vmem:[%s9395_s4 + $0x500] sm:$0xf]  ;;  %v7399_v61 = vor.u32 %v8270_v47, %v7396_v48  ;;  %v7492_v42 = vld [vmem:[%s9395_s4 + $0x658] sm:$0xf0] }
 0x2fc   : > { %5027 = vmatpush.bf16.msrb.mxu1 %v7375_v53  ;;  %5139 = vmatpush.bf16.msrb.mxu2 %v7435_v54  ;;  %v8253_v53 = vld [vmem:[%s9395_s4 + $0x504] sm:$0xf0]  ;;  %v3800_v54 = vpop.f32.mrf.mxu1  ;;  %v7495_v48 = vor.u32 %v8294_v40, %v7492_v42  ;;  %v8303_v40 = vld [vmem:[%s9395_s4 + $0x694] sm:$0xf0]  ;;  %v7524_v42 = vld [vmem:[%s9395_s4 + $0x698] sm:$0xf0] }
 0x2fd   : > { %5152 = vmatpush.bf16.msrb.mxu3 %v7439_v58  ;;  %v7324_v58 = vld [vmem:[%s9395_s4 + $0x508] sm:$0xf0]  ;;  %v7323_v8 = vor.u32 %v8253_v53, %v7322_v52  ;;  %v8293_v52 = vld [vmem:[%s9395_s4 + $0x644] sm:$0xf0]  ;;  %v8292_v53 = vld [vmem:[%s9395_s4 + $0x644] sm:$0xf] }
 0x2fe   : > { %v7327_v12 = vor.u32 %v8252_v57, %v7324_v58  ;;  %v8309_v57 = vld [vmem:[%s9395_s4 + $0x6c4] sm:$0xf0]  ;;  %v8308_v58 = vld [vmem:[%s9395_s4 + $0x6c4] sm:$0xf] }
 0x2ff   : > { %5015 = vmatpush.bf16.msrb.mxu0 %v7363_v1  ;;  %v3893_v1 = vpop.f32.mrf.mxu2 }
 0x300   : > { %5028 = vmatpush.bf16.msrb.mxu1 %v7367_v2  ;;  %5140 = vmatpush.bf16.msrb.mxu2 %v7427_v3  ;;  %v3906_v2 = vpop.f32.mrf.mxu3  ;;  %v7506_v3 = vld [vmem:[%s9395_s4 + $0x670] sm:$0xf]  ;;  %v9970_v6 = vadd.f32 %v3893_v1, %v3787_v49 }
 0x301   : > { %5153 = vmatpush.bf16.msrb.mxu3 %v7431_v7  ;;  %v9972_v7 = vadd.f32 %v3906_v2, %v3800_v54  ;;  %v7507_v16 = vor.u32 %v8299_v4, %v7506_v3  ;;  %v7559_v54 = vor.u32 %v8310_v45, %v7556_v46  ;;  %v7474_v1 = vld [vmem:[%s9395_s4 + $0x630] sm:$0xf]  ;;  %v8291_v2 = vld [vmem:[%s9395_s4 + $0x634] sm:$0xf0]  ;;  %v8290_v3 = vld [vmem:[%s9395_s4 + $0x634] sm:$0xf] }
 0x302   : > { %v3789_v22 = vpop.f32.mrf.mxu0  ;;  %v8285_v45 = vld [vmem:[%s9395_s4 + $0x604] sm:$0xf0] }
 0x303   : > { %5016 = vmatpush.bf16.msrb.mxu0 %v7355_v51  ;;  %v7387_v51 = vor.u32 %v8269_v62, %v7386_v59  ;;  %v7548_v59 = vld [vmem:[%s9395_s4 + $0x6c8] sm:$0xf0]  ;;  %v7530_v22 = vld [vmem:[%s9395_s4 + $0x6a0] sm:$0xf] }
 0x304   : > { %5029 = vmatpush.bf16.msrb.mxu1 %v7359_v13  ;;  %5141 = vmatpush.bf16.msrb.mxu2 %v7419_v14  ;;  %v8314_v13 = vld [vmem:[%s9395_s4 + $0x6f4] sm:$0xf]  ;;  %v7572_v14 = vld [vmem:[%s9395_s4 + $0x6f8] sm:$0xf0]  ;;  %v3802_v28 = vpop.f32.mrf.mxu1 }
 0x305   : > { %5154 = vmatpush.bf16.msrb.mxu3 %v7423_v18  ;;  %v7511_v18 = vor.u32 %v8298_v5, %v7508_v9  ;;  %v7476_v9 = vld [vmem:[%s9395_s4 + $0x638] sm:$0xf0] }
 0x307   : > { %5017 = vmatpush.bf16.msrb.mxu0 %v7347_v24  ;;  %v7575_v24 = vor.u32 %v8314_v13, %v7572_v14  ;;  %v3895_v33 = vpop.f32.mrf.mxu2  ;;  %v7540_v13 = vld [vmem:[%s9395_s4 + $0x6b8] sm:$0xf0]  ;;  %v7475_v14 = vor.u32 %v8291_v2, %v7474_v1  ;;  %v8347_v1 = vld [vmem:[%s9395_s4 + $0x7f4] sm:$0xf0] }
 0x308   : > { %5030 = vmatpush.bf16.msrb.mxu1 %v7351_v25  ;;  %5142 = vmatpush.bf16.msrb.mxu2 %v7411_v26  ;;  %v7500_v25 = vld [vmem:[%s9395_s4 + $0x668] sm:$0xf0]  ;;  %v7562_v26 = vld [vmem:[%s9395_s4 + $0x6e0] sm:$0xf]  ;;  %v3908_v34 = vpop.f32.mrf.mxu3  ;;  %v8287_v33 = vld [vmem:[%s9395_s4 + $0x614] sm:$0xf0] }
 0x309   : > { %5155 = vmatpush.bf16.msrb.mxu3 %v7415_v30  ;;  %v8312_v30 = vld [vmem:[%s9395_s4 + $0x6e4] sm:$0xf]  ;;  %v7503_v36 = vor.u32 %v8296_v21, %v7500_v25  ;;  %v7468_v21 = vld [vmem:[%s9395_s4 + $0x628] sm:$0xf0]  ;;  %v8286_v34 = vld [vmem:[%s9395_s4 + $0x614] sm:$0xf] }
 0x30a   : > { %v7567_v41 = vor.u32 %v8312_v30, %v7564_v31 }
 0x30b   : > { %5018 = vmatpush.bf16.msrb.mxu0 %v7339_v37  ;;  %v7563_v37 = vor.u32 %v8313_v27, %v7562_v26  ;;  %v8304_v26 = vld [vmem:[%s9395_s4 + $0x6a4] sm:$0xf]  ;;  %v7532_v27 = vld [vmem:[%s9395_s4 + $0x6a8] sm:$0xf0] }
 0x30c   : > { %5031 = vmatpush.bf16.msrb.mxu1 %v7343_v38  ;;  %5143 = vmatpush.bf16.msrb.mxu2 %v7403_v39  ;;  %v7490_v38 = vld [vmem:[%s9395_s4 + $0x650] sm:$0xf]  ;;  %v8295_v39 = vld [vmem:[%s9395_s4 + $0x654] sm:$0xf0] }
 0x30d   : > { %5156 = vmatpush.bf16.msrb.mxu3 %v7407_v43  ;;  %v7554_v43 = vld [vmem:[%s9395_s4 + $0x6d0] sm:$0xf]  ;;  %v7491_v47 = vor.u32 %v8295_v39, %v7490_v38  ;;  %v7460_v38 = vld [vmem:[%s9395_s4 + $0x618] sm:$0xf0] }
 0x30e   : > { %v7555_v49 = vor.u32 %v8311_v44, %v7554_v43  ;;  %v7522_v39 = vld [vmem:[%s9395_s4 + $0x690] sm:$0xf]  ;;  %v7450_v44 = vld [vmem:[%s9395_s4 + $0x600] sm:$0xf]  ;;  %v7463_v46 = vor.u32 %v8286_v34, %v7460_v38 }
 0x30f   : > { %5019 = vmatpush.bf16.msrb.mxu0 %v7331_v50  ;;  %v7482_v50 = vld [vmem:[%s9395_s4 + $0x640] sm:$0xf] }
 0x310   : > { %5032 = vmatpush.bf16.msrb.mxu1 %v7335_v55  ;;  %5144 = vmatpush.bf16.msrb.mxu2 %v7395_v56  ;;  %v7484_v55 = vld [vmem:[%s9395_s4 + $0x648] sm:$0xf0]  ;;  %v7546_v56 = vld [vmem:[%s9395_s4 + $0x6c0] sm:$0xf] }
 0x311   : > { %5157 = vmatpush.bf16.msrb.mxu3 %v7399_v61  ;;  %v7483_v61 = vor.u32 %v8293_v52, %v7482_v50  ;;  %v7487_v63 = vor.u32 %v8292_v53, %v7484_v55  ;;  %v7547_v0 = vor.u32 %v8309_v57, %v7546_v56  ;;  %v7514_v50 = vld [vmem:[%s9395_s4 + $0x680] sm:$0xf]  ;;  %v8300_v55 = vld [vmem:[%s9395_s4 + $0x684] sm:$0xf]  ;;  %v7516_v56 = vld [vmem:[%s9395_s4 + $0x688] sm:$0xf0] }
 0x312   : > { %v7610_v38 = vld [vmem:[%s9395_s4 + $0x740] sm:$0xf] }
 0x313   : > { %5020 = vmatpush.bf16.msrb.mxu0 %v7323_v8  ;;  %v4016_v62 = vpop.f32.mrf.mxu0  ;;  %v7551_v8 = vor.u32 %v8308_v58, %v7548_v59  ;;  %v7634_v58 = vld [vmem:[%s9395_s4 + $0x770] sm:$0xf]  ;;  %v8331_v59 = vld [vmem:[%s9395_s4 + $0x774] sm:$0xf0] }
 0x314   : > { %5033 = vmatpush.bf16.msrb.mxu1 %v7327_v12  ;;  %5145 = vmatpush.bf16.msrb.mxu2 %v7387_v51  ;;  %v4033_v4 = vadd.f32 %v4016_v62, %v9970_v6  ;;  %v8306_v51 = vld [vmem:[%s9395_s4 + $0x6b4] sm:$0xf]  ;;  %v7479_v6 = vor.u32 %v8290_v3, %v7476_v9  ;;  %v7451_v62 = vor.u32 %v8285_v45, %v7450_v44  ;;  %v8341_v44 = vld [vmem:[%s9395_s4 + $0x7c4] sm:$0xf0] }
 0x315   : > { %5158 = vmatpush.bf16.msrb.mxu3 %v7391_v15  ;;  %v7539_v15 = vor.u32 %v8307_v11, %v7538_v10  ;;  %v7543_v19 = vor.u32 %v8306_v51, %v7540_v13  ;;  %v7635_v9 = vor.u32 %v8331_v59, %v7634_v58  ;;  %v5166_v10 = vperm.slane %v9897_v23, 2  ;;  %v7626_v51 = vld [vmem:[%s9395_s4 + $0x760] sm:$0xf]  ;;  %v8329_v13 = vld [vmem:[%s9395_s4 + $0x764] sm:$0xf0] }
 0x316   : > { %5021 = vmatmul.bf16.vlgmr.msrb.gmra.mxu0 %v4916_v17  ;;  %v4029_v5 = vpop.f32.mrf.mxu1  ;;  %v7604_v59 = vld [vmem:[%s9395_s4 + $0x738] sm:$0xf0] }
 0x317   : > { %5263 = vmatpush.bf16.msra.mxu0 %v7507_v16  ;;  %5034 = vmatmul.bf16.vlgmr.msrb.gmra.mxu1 %v4916_v17  ;;  %v4034_v12 = vadd.f32 %v4029_v5, %v9972_v7  ;;  %v7466_v17 = vld [vmem:[%s9395_s4 + $0x620] sm:$0xf]  ;;  %v7700_v5 = vld [vmem:[%s9395_s4 + $0x7f8] sm:$0xf0] }
 0x318   : > { %5276 = vmatpush.bf16.msra.mxu1 %v7511_v18  ;;  %5388 = vmatpush.bf16.msra.mxu2 %v7571_v60  ;;  %v8289_v18 = vld [vmem:[%s9395_s4 + $0x624] sm:$0xf0]  ;;  %v8288_v60 = vld [vmem:[%s9395_s4 + $0x624] sm:$0xf] }
 0x319   : > { %5401 = vmatpush.bf16.msra.mxu3 %v7575_v24  ;;  %5146 = vmatmul.bf16.vlgmr.msrb.gmra.mxu2 %v5041_v29  ;;  %v8305_v24 = vld [vmem:[%s9395_s4 + $0x6a4] sm:$0xf0]  ;;  %v7467_v28 = vor.u32 %v8289_v18, %v7466_v17  ;;  %v7471_v30 = vor.u32 %v8288_v60, %v7468_v21  ;;  %v5291_v18 = vperm.slane %v9907_v35, 2  ;;  %v8344_v60 = vld [vmem:[%s9395_s4 + $0x7e4] sm:$0xf] }
 0x31a   : > { %5159 = vmatmul.bf16.vlgmr.msrb.gmra.mxu3 %v5041_v29  ;;  %v4141_v16 = vpop.f32.mrf.mxu2  ;;  %v7531_v31 = vor.u32 %v8305_v24, %v7530_v22  ;;  %v8345_v17 = vld [vmem:[%s9395_s4 + $0x7e4] sm:$0xf0]  ;;  %v7618_v24 = vld [vmem:[%s9395_s4 + $0x750] sm:$0xf] }
 0x31b   : > { %5264 = vmatpush.bf16.msra.mxu0 %v7499_v32  ;;  %v10018_v7 = vadd.f32 %v4141_v16, %v4033_v4  ;;  %v4018_v29 = vpop.f32.mrf.mxu0  ;;  %v7458_v32 = vld [vmem:[%s9395_s4 + $0x610] sm:$0xf]  ;;  %v8346_v4 = vld [vmem:[%s9395_s4 + $0x7f4] sm:$0xf]  ;;  %v7690_v16 = vld [vmem:[%s9395_s4 + $0x7e0] sm:$0xf] }
 0x31c   : > { %5277 = vmatpush.bf16.msra.mxu1 %v7503_v36  ;;  %5389 = vmatpush.bf16.msra.mxu2 %v7563_v37  ;;  %v7535_v37 = vor.u32 %v8304_v26, %v7532_v27  ;;  %v7459_v43 = vor.u32 %v8287_v33, %v7458_v32  ;;  %v7691_v22 = vor.u32 %v8345_v17, %v7690_v16  ;;  %v8327_v26 = vld [vmem:[%s9395_s4 + $0x754] sm:$0xf0]  ;;  %v8326_v27 = vld [vmem:[%s9395_s4 + $0x754] sm:$0xf]  ;;  %v7620_v29 = vld [vmem:[%s9395_s4 + $0x758] sm:$0xf0] }
 0x31d   : > { %5402 = vmatpush.bf16.msra.mxu3 %v7567_v41  ;;  %v4154_v20 = vpop.f32.mrf.mxu3  ;;  %v8302_v41 = vld [vmem:[%s9395_s4 + $0x694] sm:$0xf]  ;;  %v7684_v33 = vld [vmem:[%s9395_s4 + $0x7d8] sm:$0xf0]  ;;  %v7619_v34 = vor.u32 %v8327_v26, %v7618_v24  ;;  %v7650_v26 = vld [vmem:[%s9395_s4 + $0x790] sm:$0xf] }
 0x31e   : > { %v10023_v25 = vadd.f32 %v4154_v20, %v4034_v12  ;;  %v4031_v36 = vpop.f32.mrf.mxu1  ;;  %v7527_v53 = vor.u32 %v8302_v41, %v7524_v42  ;;  %v7627_v20 = vor.u32 %v8329_v13, %v7626_v51  ;;  %v8342_v32 = vld [vmem:[%s9395_s4 + $0x7d4] sm:$0xf]  ;;  %v7612_v42 = vld [vmem:[%s9395_s4 + $0x748] sm:$0xf0]  ;;  %v8336_v13 = vld [vmem:[%s9395_s4 + $0x7a4] sm:$0xf] }
 0x31f   : > { %5265 = vmatpush.bf16.msra.mxu0 %v7491_v47  ;;  %v7523_v47 = vor.u32 %v8303_v40, %v7522_v39  ;;  %v7623_v36 = vor.u32 %v8326_v27, %v7620_v29  ;;  %v8325_v39 = vld [vmem:[%s9395_s4 + $0x744] sm:$0xf0]  ;;  %v8324_v40 = vld [vmem:[%s9395_s4 + $0x744] sm:$0xf]  ;;  %v7687_v41 = vor.u32 %v8342_v32, %v7684_v33  ;;  %v7588_v24 = vld [vmem:[%s9395_s4 + $0x718] sm:$0xf0] }
 0x320   : > { %5278 = vmatpush.bf16.msra.mxu1 %v7495_v48  ;;  %5390 = vmatpush.bf16.msra.mxu2 %v7555_v49  ;;  %v8284_v48 = vld [vmem:[%s9395_s4 + $0x604] sm:$0xf]  ;;  %v7452_v49 = vld [vmem:[%s9395_s4 + $0x608] sm:$0xf0]  ;;  %v8335_v27 = vld [vmem:[%s9395_s4 + $0x794] sm:$0xf0] }
 0x321   : > { %5403 = vmatpush.bf16.msra.mxu3 %v7559_v54  ;;  %v8301_v54 = vld [vmem:[%s9395_s4 + $0x684] sm:$0xf0]  ;;  %v7455_v2 = vor.u32 %v8284_v48, %v7452_v49  ;;  %v7652_v29 = vld [vmem:[%s9395_s4 + $0x798] sm:$0xf0] }
 0x322   : > { %v4143_v52 = vpop.f32.mrf.mxu2  ;;  %v7515_v3 = vor.u32 %v8301_v54, %v7514_v50  ;;  %v7611_v50 = vor.u32 %v8325_v39, %v7610_v38  ;;  %v8317_v32 = vld [vmem:[%s9395_s4 + $0x704] sm:$0xf0]  ;;  %v7642_v38 = vld [vmem:[%s9395_s4 + $0x780] sm:$0xf] }
 0x323   : > { %5266 = vmatpush.bf16.msra.mxu0 %v7483_v61  ;;  %v8330_v61 = vld [vmem:[%s9395_s4 + $0x774] sm:$0xf] }
 0x324   : > { %5279 = vmatpush.bf16.msra.mxu1 %v7487_v63  ;;  %5391 = vmatpush.bf16.msra.mxu2 %v7547_v0  ;;  %v7636_v63 = vld [vmem:[%s9395_s4 + $0x778] sm:$0xf0]  ;;  %v7698_v0 = vld [vmem:[%s9395_s4 + $0x7f0] sm:$0xf] }
 0x325   : > { %5404 = vmatpush.bf16.msra.mxu3 %v7551_v8  ;;  %v4156_v57 = vpop.f32.mrf.mxu3  ;;  %v7519_v8 = vor.u32 %v8300_v55, %v7516_v56  ;;  %v7639_v11 = vor.u32 %v8330_v61, %v7636_v63  ;;  %v7699_v12 = vor.u32 %v8347_v1, %v7698_v0  ;;  %v7602_v55 = vld [vmem:[%s9395_s4 + $0x730] sm:$0xf]  ;;  %v8323_v56 = vld [vmem:[%s9395_s4 + $0x734] sm:$0xf0]  ;;  %v7668_v63 = vld [vmem:[%s9395_s4 + $0x7b8] sm:$0xf0] }
 0x326   : > { %v8322_v57 = vld [vmem:[%s9395_s4 + $0x734] sm:$0xf]  ;;  %v8339_v61 = vld [vmem:[%s9395_s4 + $0x7b4] sm:$0xf0] }
 0x327   : > { %5267 = vmatpush.bf16.msra.mxu0 %v7475_v14  ;;  %v8328_v14 = vld [vmem:[%s9395_s4 + $0x764] sm:$0xf]  ;;  %v7607_v0 = vor.u32 %v8322_v57, %v7604_v59  ;;  %v5416_v59 = vperm.slane %v9897_v23, 3  ;;  %v7820_v23 = vld [vmem:[%s9395_s4 + $0x8e8] sm:$0xf0] }
 0x328   : > { %5280 = vmatpush.bf16.msra.mxu1 %v7479_v6  ;;  %5392 = vmatpush.bf16.msra.mxu2 %v7539_v15  ;;  %v7703_v6 = vor.u32 %v8346_v4, %v7700_v5  ;;  %v7628_v15 = vld [vmem:[%s9395_s4 + $0x768] sm:$0xf0]  ;;  %v8320_v4 = vld [vmem:[%s9395_s4 + $0x724] sm:$0xf] }
 0x329   : > { %5405 = vmatpush.bf16.msra.mxu3 %v7543_v19  ;;  %v7692_v19 = vld [vmem:[%s9395_s4 + $0x7e8] sm:$0xf0]  ;;  %v7631_v21 = vor.u32 %v8328_v14, %v7628_v15 }
 0x32a   : > { %v7660_v14 = vld [vmem:[%s9395_s4 + $0x7a8] sm:$0xf0] }
 0x32b   : > { %5268 = vmatpush.bf16.msra.mxu0 %v7467_v28  ;;  %v7695_v28 = vor.u32 %v8344_v60, %v7692_v19  ;;  %v7586_v19 = vld [vmem:[%s9395_s4 + $0x710] sm:$0xf] }
 0x32c   : > { %5281 = vmatpush.bf16.msra.mxu1 %v7471_v30  ;;  %5393 = vmatpush.bf16.msra.mxu2 %v7531_v31  ;;  %v7682_v30 = vld [vmem:[%s9395_s4 + $0x7d0] sm:$0xf]  ;;  %v8343_v31 = vld [vmem:[%s9395_s4 + $0x7d4] sm:$0xf0] }
 0x32d   : > { %5406 = vmatpush.bf16.msra.mxu3 %v7535_v37  ;;  %v7683_v37 = vor.u32 %v8343_v31, %v7682_v30  ;;  %v7578_v31 = vld [vmem:[%s9395_s4 + $0x700] sm:$0xf] }
 0x32f   : > { %5269 = vmatpush.bf16.msra.mxu0 %v7459_v43  ;;  %v7674_v43 = vld [vmem:[%s9395_s4 + $0x7c0] sm:$0xf] }
 0x330   : > { %5282 = vmatpush.bf16.msra.mxu1 %v7463_v46  ;;  %5394 = vmatpush.bf16.msra.mxu2 %v7523_v47  ;;  %v8340_v46 = vld [vmem:[%s9395_s4 + $0x7c4] sm:$0xf]  ;;  %v7676_v47 = vld [vmem:[%s9395_s4 + $0x7c8] sm:$0xf0]  ;;  %v7675_v54 = vor.u32 %v8341_v44, %v7674_v43  ;;  %v7762_v44 = vld [vmem:[%s9395_s4 + $0x870] sm:$0xf] }
 0x331   : > { %5407 = vmatpush.bf16.msra.mxu3 %v7527_v53  ;;  %v7615_v53 = vor.u32 %v8324_v40, %v7612_v42  ;;  %v7679_v58 = vor.u32 %v8340_v46, %v7676_v47  ;;  %v8333_v40 = vld [vmem:[%s9395_s4 + $0x784] sm:$0xf0]  ;;  %v7644_v42 = vld [vmem:[%s9395_s4 + $0x788] sm:$0xf0]  ;;  %v8362_v46 = vld [vmem:[%s9395_s4 + $0x874] sm:$0xf] }
 0x333   : > { %5270 = vmatpush.bf16.msra.mxu0 %v7451_v62  ;;  %v4266_v45 = vpop.f32.mrf.mxu0  ;;  %v8338_v62 = vld [vmem:[%s9395_s4 + $0x7b4] sm:$0xf] }
 0x334   : > { %5283 = vmatpush.bf16.msra.mxu1 %v7455_v2  ;;  %5395 = vmatpush.bf16.msra.mxu2 %v7515_v3  ;;  %v4283_v48 = vadd.f32 %v4266_v45, %v10018_v7  ;;  %v4279_v49 = vpop.f32.mrf.mxu1  ;;  %v7666_v7 = vld [vmem:[%s9395_s4 + $0x7b0] sm:$0xf]  ;;  %v7594_v2 = vld [vmem:[%s9395_s4 + $0x720] sm:$0xf]  ;;  %v8321_v3 = vld [vmem:[%s9395_s4 + $0x724] sm:$0xf0]  ;;  %v7671_v5 = vor.u32 %v8338_v62, %v7668_v63 }
 0x335   : > { %5408 = vmatpush.bf16.msra.mxu3 %v7519_v8  ;;  %v4284_v52 = vadd.f32 %v4279_v49, %v10023_v25  ;;  %v7603_v25 = vor.u32 %v8323_v56, %v7602_v55  ;;  %v7667_v1 = vor.u32 %v8339_v61, %v7666_v7  ;;  %v7595_v16 = vor.u32 %v8321_v3, %v7594_v2  ;;  %v8363_v45 = vld [vmem:[%s9395_s4 + $0x874] sm:$0xf0]  ;;  %v7764_v49 = vld [vmem:[%s9395_s4 + $0x878] sm:$0xf0]  ;;  %v8378_v55 = vld [vmem:[%s9395_s4 + $0x8f4] sm:$0xf] }
 0x336   : > { %5271 = vmatmul.bf16.vlgmr.msra.gmra.mxu0 %v5166_v10  ;;  %v7828_v56 = vld [vmem:[%s9395_s4 + $0x8f8] sm:$0xf0]  ;;  %v7767_v7 = vor.u32 %v8362_v46, %v7764_v49  ;;  %v7754_v62 = vld [vmem:[%s9395_s4 + $0x860] sm:$0xf]  ;;  %v8361_v63 = vld [vmem:[%s9395_s4 + $0x864] sm:$0xf0] }
 0x337   : > { %5513 = vmatpush.bf16.msrb.mxu0 %v7635_v9  ;;  %5284 = vmatmul.bf16.vlgmr.msra.gmra.mxu1 %v5166_v10  ;;  %v7596_v9 = vld [vmem:[%s9395_s4 + $0x728] sm:$0xf0]  ;;  %v7658_v10 = vld [vmem:[%s9395_s4 + $0x7a0] sm:$0xf]  ;;  %v8377_v3 = vld [vmem:[%s9395_s4 + $0x8e4] sm:$0xf0] }
 0x338   : > { %5526 = vmatpush.bf16.msrb.mxu1 %v7639_v11  ;;  %5638 = vmatpush.bf16.msrb.mxu2 %v7699_v12  ;;  %v8337_v11 = vld [vmem:[%s9395_s4 + $0x7a4] sm:$0xf0]  ;;  %v7818_v2 = vld [vmem:[%s9395_s4 + $0x8e0] sm:$0xf]  ;;  %v8370_v46 = vld [vmem:[%s9395_s4 + $0x8b4] sm:$0xf] }
 0x339   : > { %5651 = vmatpush.bf16.msrb.mxu3 %v7703_v6  ;;  %5396 = vmatmul.bf16.vlgmr.msra.gmra.mxu2 %v5291_v18  ;;  %v7659_v60 = vor.u32 %v8337_v11, %v7658_v10  ;;  %v7819_v10 = vor.u32 %v8377_v3, %v7818_v2  ;;  %v7746_v11 = vld [vmem:[%s9395_s4 + $0x850] sm:$0xf] }
 0x33a   : > { %5409 = vmatmul.bf16.vlgmr.msra.gmra.mxu3 %v5291_v18  ;;  %v7599_v18 = vor.u32 %v8320_v4, %v7596_v9  ;;  %v5541_v4 = vperm.slane %v9907_v35, 3 }
 0x33b   : > { %5514 = vmatpush.bf16.msrb.mxu0 %v7627_v20  ;;  %v4268_v6 = vpop.f32.mrf.mxu0  ;;  %v8319_v20 = vld [vmem:[%s9395_s4 + $0x714] sm:$0xf0] }
 0x33c   : > { %5527 = vmatpush.bf16.msrb.mxu1 %v7631_v21  ;;  %5639 = vmatpush.bf16.msrb.mxu2 %v7691_v22  ;;  %v4391_v8 = vpop.f32.mrf.mxu2  ;;  %v4281_v17 = vpop.f32.mrf.mxu1  ;;  %v8318_v21 = vld [vmem:[%s9395_s4 + $0x714] sm:$0xf]  ;;  %v7663_v22 = vor.u32 %v8336_v13, %v7660_v14  ;;  %v7587_v30 = vor.u32 %v8319_v20, %v7586_v19  ;;  %v7748_v14 = vld [vmem:[%s9395_s4 + $0x858] sm:$0xf0]  ;;  %v7810_v6 = vld [vmem:[%s9395_s4 + $0x8d0] sm:$0xf] }
 0x33d   : > { %5652 = vmatpush.bf16.msrb.mxu3 %v7695_v28  ;;  %v10093_v12 = vadd.f32 %v4391_v8, %v4283_v48  ;;  %v4404_v51 = vpop.f32.mrf.mxu3  ;;  %v8334_v28 = vld [vmem:[%s9395_s4 + $0x794] sm:$0xf]  ;;  %v7591_v33 = vor.u32 %v8318_v21, %v7588_v24  ;;  %v7579_v48 = vor.u32 %v8317_v32, %v7578_v31  ;;  %v7755_v8 = vor.u32 %v8361_v63, %v7754_v62  ;;  %v7738_v21 = vld [vmem:[%s9395_s4 + $0x840] sm:$0xf]  ;;  %v8356_v24 = vld [vmem:[%s9395_s4 + $0x844] sm:$0xf] }
 0x33e   : > { %v10097_v15 = vadd.f32 %v4404_v51, %v4284_v52  ;;  %v7655_v39 = vor.u32 %v8334_v28, %v7652_v29  ;;  %v8379_v52 = vld [vmem:[%s9395_s4 + $0x8f4] sm:$0xf0]  ;;  %v8358_v13 = vld [vmem:[%s9395_s4 + $0x854] sm:$0xf]  ;;  %v7802_v28 = vld [vmem:[%s9395_s4 + $0x8c0] sm:$0xf] }
 0x33f   : > { %5515 = vmatpush.bf16.msrb.mxu0 %v7619_v34  ;;  %v7651_v34 = vor.u32 %v8335_v27, %v7650_v26  ;;  %v8359_v51 = vld [vmem:[%s9395_s4 + $0x854] sm:$0xf0]  ;;  %v8374_v17 = vld [vmem:[%s9395_s4 + $0x8d4] sm:$0xf]  ;;  %v7751_v19 = vor.u32 %v8358_v13, %v7748_v14  ;;  %v7740_v27 = vld [vmem:[%s9395_s4 + $0x848] sm:$0xf0] }
 0x340   : > { %5528 = vmatpush.bf16.msrb.mxu1 %v7623_v36  ;;  %5640 = vmatpush.bf16.msrb.mxu2 %v7683_v37  ;;  %v8316_v36 = vld [vmem:[%s9395_s4 + $0x704] sm:$0xf]  ;;  %v7580_v37 = vld [vmem:[%s9395_s4 + $0x708] sm:$0xf0]  ;;  %v8373_v29 = vld [vmem:[%s9395_s4 + $0x8c4] sm:$0xf0] }
 0x341   : > { %5653 = vmatpush.bf16.msrb.mxu3 %v7687_v41  ;;  %v8332_v41 = vld [vmem:[%s9395_s4 + $0x784] sm:$0xf]  ;;  %v7804_v32 = vld [vmem:[%s9395_s4 + $0x8c8] sm:$0xf0]  ;;  %v8367_v13 = vld [vmem:[%s9395_s4 + $0x894] sm:$0xf0] }
 0x342   : > { %v7647_v57 = vor.u32 %v8332_v41, %v7644_v42  ;;  %v8372_v31 = vld [vmem:[%s9395_s4 + $0x8c4] sm:$0xf]  ;;  %v8355_v41 = vld [vmem:[%s9395_s4 + $0x834] sm:$0xf0]  ;;  %v8354_v42 = vld [vmem:[%s9395_s4 + $0x834] sm:$0xf] }
 0x343   : > { %5516 = vmatpush.bf16.msrb.mxu0 %v7611_v50  ;;  %v7826_v50 = vld [vmem:[%s9395_s4 + $0x8f0] sm:$0xf]  ;;  %v8368_v62 = vld [vmem:[%s9395_s4 + $0x8a4] sm:$0xf]  ;;  %v7788_v63 = vld [vmem:[%s9395_s4 + $0x8a8] sm:$0xf0] }
 0x344   : > { %5529 = vmatpush.bf16.msrb.mxu1 %v7615_v53  ;;  %5641 = vmatpush.bf16.msrb.mxu2 %v7675_v54  ;;  %v4393_v43 = vpop.f32.mrf.mxu2  ;;  %v7583_v53 = vor.u32 %v8316_v36, %v7580_v37  ;;  %v7643_v54 = vor.u32 %v8333_v40, %v7642_v38  ;;  %v7827_v61 = vor.u32 %v8379_v52, %v7826_v50  ;;  %v7730_v40 = vld [vmem:[%s9395_s4 + $0x830] sm:$0xf]  ;;  %v8353_v52 = vld [vmem:[%s9395_s4 + $0x824] sm:$0xf0]  ;;  %v7780_v14 = vld [vmem:[%s9395_s4 + $0x898] sm:$0xf0] }
 0x345   : > { %5654 = vmatpush.bf16.msrb.mxu3 %v7679_v58  ;;  %v4406_v47 = vpop.f32.mrf.mxu3  ;;  %v7763_v58 = vor.u32 %v8363_v45, %v7762_v44  ;;  %v7743_v38 = vor.u32 %v8356_v24, %v7740_v27  ;;  %v7807_v43 = vor.u32 %v8372_v31, %v7804_v32  ;;  %v7794_v44 = vld [vmem:[%s9395_s4 + $0x8b0] sm:$0xf]  ;;  %v8371_v45 = vld [vmem:[%s9395_s4 + $0x8b4] sm:$0xf0]  ;;  %v8364_v27 = vld [vmem:[%s9395_s4 + $0x884] sm:$0xf] }
 0x346   : > { %v7796_v47 = vld [vmem:[%s9395_s4 + $0x8b8] sm:$0xf0]  ;;  %v7795_v50 = vor.u32 %v8371_v45, %v7794_v44  ;;  %v7890_v31 = vld [vmem:[%s9395_s4 + $0x970] sm:$0xf]  ;;  %v8395_v32 = vld [vmem:[%s9395_s4 + $0x974] sm:$0xf0] }
 0x347   : > { %5517 = vmatpush.bf16.msrb.mxu0 %v7603_v25  ;;  %v8360_v25 = vld [vmem:[%s9395_s4 + $0x864] sm:$0xf]  ;;  %v7891_v45 = vor.u32 %v8395_v32, %v7890_v31  ;;  %v8386_v31 = vld [vmem:[%s9395_s4 + $0x934] sm:$0xf] }
 0x348   : > { %5530 = vmatpush.bf16.msrb.mxu1 %v7607_v0  ;;  %5642 = vmatpush.bf16.msrb.mxu2 %v7667_v1  ;;  %v7831_v0 = vor.u32 %v8378_v55, %v7828_v56  ;;  %v7756_v1 = vld [vmem:[%s9395_s4 + $0x868] sm:$0xf0]  ;;  %v7799_v55 = vor.u32 %v8370_v46, %v7796_v47 }
 0x349   : > { %5655 = vmatpush.bf16.msrb.mxu3 %v7671_v5  ;;  %v8376_v5 = vld [vmem:[%s9395_s4 + $0x8e4] sm:$0xf]  ;;  %v7759_v9 = vor.u32 %v8360_v25, %v7756_v1 }
 0x34a   : > { %v7823_v35 = vor.u32 %v8376_v5, %v7820_v23  ;;  %v7714_v5 = vld [vmem:[%s9395_s4 + $0x810] sm:$0xf]  ;;  %v8351_v23 = vld [vmem:[%s9395_s4 + $0x814] sm:$0xf0] }
 0x34b   : > { %5518 = vmatpush.bf16.msrb.mxu0 %v7595_v16  ;;  %v8375_v16 = vld [vmem:[%s9395_s4 + $0x8d4] sm:$0xf0] }
 0x34c   : > { %5531 = vmatpush.bf16.msrb.mxu1 %v7599_v18  ;;  %5643 = vmatpush.bf16.msrb.mxu2 %v7659_v60  ;;  %v7812_v18 = vld [vmem:[%s9395_s4 + $0x8d8] sm:$0xf0]  ;;  %v7747_v60 = vor.u32 %v8359_v51, %v7746_v11  ;;  %v7811_v20 = vor.u32 %v8375_v16, %v7810_v6  ;;  %v7778_v51 = vld [vmem:[%s9395_s4 + $0x890] sm:$0xf]  ;;  %v7715_v6 = vor.u32 %v8351_v23, %v7714_v5  ;;  %v7706_v16 = vld [vmem:[%s9395_s4 + $0x800] sm:$0xf] }
 0x34d   : > { %5656 = vmatpush.bf16.msrb.mxu3 %v7663_v22  ;;  %v8357_v22 = vld [vmem:[%s9395_s4 + $0x844] sm:$0xf0]  ;;  %v7815_v26 = vor.u32 %v8374_v17, %v7812_v18  ;;  %v7716_v11 = vld [vmem:[%s9395_s4 + $0x818] sm:$0xf0]  ;;  %v8348_v18 = vld [vmem:[%s9395_s4 + $0x804] sm:$0xf] }
 0x34e   : > { %v7739_v36 = vor.u32 %v8357_v22, %v7738_v21  ;;  %v8349_v17 = vld [vmem:[%s9395_s4 + $0x804] sm:$0xf0]  ;;  %v7770_v21 = vld [vmem:[%s9395_s4 + $0x880] sm:$0xf]  ;;  %v8407_v5 = vld [vmem:[%s9395_s4 + $0x9d4] sm:$0xf0] }
 0x34f   : > { %5519 = vmatpush.bf16.msrb.mxu0 %v7587_v30  ;;  %v8406_v23 = vld [vmem:[%s9395_s4 + $0x9d4] sm:$0xf] }
 0x350   : > { %5532 = vmatpush.bf16.msrb.mxu1 %v7591_v33  ;;  %5644 = vmatpush.bf16.msrb.mxu2 %v7651_v34 }
 0x351   : > { %5657 = vmatpush.bf16.msrb.mxu3 %v7655_v39  ;;  %v7803_v39 = vor.u32 %v8373_v29, %v7802_v28  ;;  %v7772_v28 = vld [vmem:[%s9395_s4 + $0x888] sm:$0xf0] }
 0x352   : > { %v7775_v44 = vor.u32 %v8364_v27, %v7772_v28  ;;  %v7858_v28 = vld [vmem:[%s9395_s4 + $0x930] sm:$0xf] }
 0x353   : > { %5520 = vmatpush.bf16.msrb.mxu0 %v7579_v48  ;;  %v4516_v30 = vpop.f32.mrf.mxu0  ;;  %v7722_v48 = vld [vmem:[%s9395_s4 + $0x820] sm:$0xf] }
 0x354   : > { %5533 = vmatpush.bf16.msrb.mxu1 %v7583_v53  ;;  %5645 = vmatpush.bf16.msrb.mxu2 %v7643_v54  ;;  %v4533_v33 = vadd.f32 %v4516_v30, %v10093_v12  ;;  %v4529_v34 = vpop.f32.mrf.mxu1  ;;  %v7732_v12 = vld [vmem:[%s9395_s4 + $0x838] sm:$0xf0]  ;;  %v8352_v53 = vld [vmem:[%s9395_s4 + $0x824] sm:$0xf]  ;;  %v7724_v54 = vld [vmem:[%s9395_s4 + $0x828] sm:$0xf0]  ;;  %v7723_v1 = vor.u32 %v8353_v52, %v7722_v48 }
 0x355   : > { %5658 = vmatpush.bf16.msrb.mxu3 %v7647_v57  ;;  %v4534_v37 = vadd.f32 %v4529_v34, %v10097_v15  ;;  %v7731_v15 = vor.u32 %v8355_v41, %v7730_v40  ;;  %v7735_v49 = vor.u32 %v8354_v42, %v7732_v12  ;;  %v7786_v57 = vld [vmem:[%s9395_s4 + $0x8a0] sm:$0xf]  ;;  %v7727_v3 = vor.u32 %v8352_v53, %v7724_v54  ;;  %v8410_v42 = vld [vmem:[%s9395_s4 + $0x9f4] sm:$0xf]  ;;  %v7884_v53 = vld [vmem:[%s9395_s4 + $0x968] sm:$0xf0] }
 0x356   : > { %5521 = vmatmul.bf16.vlgmr.msrb.gmra.mxu0 %v5416_v59  ;;  %v7882_v48 = vld [vmem:[%s9395_s4 + $0x960] sm:$0xf] }
 0x357   : > { %5766 = vmatpush.bf16.msra.mxu0 %v7763_v58  ;;  %5534 = vmatmul.bf16.vlgmr.msrb.gmra.mxu1 %v5416_v59  ;;  %v8369_v58 = vld [vmem:[%s9395_s4 + $0x8a4] sm:$0xf0]  ;;  %v3654_v59 = vld [vmem:[%s9649_s21 + $0x10] sm:$0x3f]  ;;  %v7946_v54 = vld [vmem:[%s9395_s4 + $0x9e0] sm:$0xf] }
 0x358   : > { %5779 = vmatpush.bf16.msra.mxu1 %v7767_v7  ;;  %5894 = vmatpush.bf16.msra.mxu2 %v7827_v61 }
 0x359   : > { %5907 = vmatpush.bf16.msra.mxu3 %v7831_v0  ;;  %5646 = vmatmul.bf16.vlgmr.msrb.gmra.mxu2 %v5541_v4 }
 0x35a   : > { %5659 = vmatmul.bf16.vlgmr.msrb.gmra.mxu3 %v5541_v4  ;;  %v7787_v4 = vor.u32 %v8369_v58, %v7786_v57  ;;  %v8408_v57 = vld [vmem:[%s9395_s4 + $0x9e4] sm:$0xf]  ;;  %v7948_v58 = vld [vmem:[%s9395_s4 + $0x9e8] sm:$0xf0] }
 0x35b   : > { %5767 = vmatpush.bf16.msra.mxu0 %v7755_v8  ;;  %v4518_v25 = vpop.f32.mrf.mxu0  ;;  %v8350_v8 = vld [vmem:[%s9395_s4 + $0x814] sm:$0xf] }
 0x35c   : > { %5780 = vmatpush.bf16.msra.mxu1 %v7759_v9  ;;  %5895 = vmatpush.bf16.msra.mxu2 %v7819_v10  ;;  %v4641_v56 = vpop.f32.mrf.mxu2  ;;  %v4531_v2 = vpop.f32.mrf.mxu1  ;;  %v3657_v9 = vpack.c.bf16 %v3654_v59, %v3654_v59  ;;  %v7791_v10 = vor.u32 %v8368_v62, %v7788_v63  ;;  %v7874_v63 = vld [vmem:[%s9395_s4 + $0x950] sm:$0xf]  ;;  %v8391_v25 = vld [vmem:[%s9395_s4 + $0x954] sm:$0xf0] }
 0x35d   : > { %5908 = vmatpush.bf16.msra.mxu3 %v7823_v35  ;;  %v10166_v7 = vadd.f32 %v4641_v56, %v4533_v33  ;;  %v4654_v61 = vpop.f32.mrf.mxu3  ;;  %v8366_v35 = vld [vmem:[%s9395_s4 + $0x894] sm:$0xf]  ;;  %v7951_v2 = vor.u32 %v8408_v57, %v7948_v58  ;;  %v7842_v58 = vld [vmem:[%s9395_s4 + $0x910] sm:$0xf] }
 0x35e   : > { %v10170_v0 = vadd.f32 %v4654_v61, %v4534_v37  ;;  %v5794_v22 = vshrl.u32 %v3657_v9, 16  ;;  %v7783_v24 = vor.u32 %v8366_v35, %v7780_v14  ;;  %v10188_v29 = vpack.i.b16 %v3657_v9, %v3657_v9  ;;  %v8394_v33 = vld [vmem:[%s9395_s4 + $0x974] sm:$0xf]  ;;  %v7892_v37 = vld [vmem:[%s9395_s4 + $0x978] sm:$0xf0] }
 0x35f   : > { %5768 = vmatpush.bf16.msra.mxu0 %v7747_v60  ;;  %v7719_v60 = vor.u32 %v8350_v8, %v7716_v11  ;;  %v7895_v47 = vor.u32 %v8394_v33, %v7892_v37  ;;  %v7940_v8 = vld [vmem:[%s9395_s4 + $0x9d8] sm:$0xf0]  ;;  %v7875_v9 = vor.u32 %v8391_v25, %v7874_v63  ;;  %v8388_v35 = vld [vmem:[%s9395_s4 + $0x944] sm:$0xf]  ;;  %v7906_v25 = vld [vmem:[%s9395_s4 + $0x990] sm:$0xf] }
 0x360   : > { %5781 = vmatpush.bf16.msra.mxu1 %v7751_v19  ;;  %5896 = vmatpush.bf16.msra.mxu2 %v7811_v20  ;;  %v7779_v19 = vor.u32 %v8367_v13, %v7778_v51  ;;  %v7708_v20 = vld [vmem:[%s9395_s4 + $0x808] sm:$0xf0]  ;;  %v10198_v12 = vpack.i.b16 %v5794_v22, %v5794_v22  ;;  %v5669_v46 = vperm.slane %v10188_v29, 0  ;;  %v7866_v51 = vld [vmem:[%s9395_s4 + $0x940] sm:$0xf]  ;;  %v7943_v14 = vor.u32 %v8406_v23, %v7940_v8 }
 0x361   : > { %5909 = vmatpush.bf16.msra.mxu3 %v7815_v26  ;;  %v8365_v26 = vld [vmem:[%s9395_s4 + $0x884] sm:$0xf0]  ;;  %v7711_v40 = vor.u32 %v8348_v18, %v7708_v20  ;;  %v7860_v33 = vld [vmem:[%s9395_s4 + $0x938] sm:$0xf0] }
 0x362   : > { %v7771_v41 = vor.u32 %v8365_v26, %v7770_v21  ;;  %v5797_v56 = vperm.slane %v10198_v12, 0  ;;  %v8389_v13 = vld [vmem:[%s9395_s4 + $0x944] sm:$0xf0]  ;;  %v7924_v37 = vld [vmem:[%s9395_s4 + $0x9b8] sm:$0xf0] }
 0x363   : > { %5769 = vmatpush.bf16.msra.mxu0 %v7739_v36  ;;  %v7707_v36 = vor.u32 %v8349_v17, %v7706_v16  ;;  %v7930_v16 = vld [vmem:[%s9395_s4 + $0x9c0] sm:$0xf]  ;;  %v8405_v17 = vld [vmem:[%s9395_s4 + $0x9c4] sm:$0xf0]  ;;  %v7867_v22 = vor.u32 %v8389_v13, %v7866_v51  ;;  %v7844_v63 = vld [vmem:[%s9395_s4 + $0x918] sm:$0xf0] }
 0x364   : > { %5782 = vmatpush.bf16.msra.mxu1 %v7743_v38  ;;  %5897 = vmatpush.bf16.msra.mxu2 %v7803_v39  ;;  %v4643_v30 = vpop.f32.mrf.mxu2  ;;  %v7954_v38 = vld [vmem:[%s9395_s4 + $0x9f0] sm:$0xf]  ;;  %v8411_v39 = vld [vmem:[%s9395_s4 + $0x9f4] sm:$0xf0]  ;;  %v7931_v27 = vor.u32 %v8405_v17, %v7930_v16  ;;  %v8381_v23 = vld [vmem:[%s9395_s4 + $0x904] sm:$0xf0] }
 0x365   : > { %5910 = vmatpush.bf16.msra.mxu3 %v7807_v43  ;;  %v4656_v34 = vpop.f32.mrf.mxu3  ;;  %v7956_v43 = vld [vmem:[%s9395_s4 + $0x9f8] sm:$0xf0]  ;;  %v8387_v30 = vld [vmem:[%s9395_s4 + $0x934] sm:$0xf0]  ;;  %v7898_v51 = vld [vmem:[%s9395_s4 + $0x980] sm:$0xf] }
 0x366   : > { %v7959_v52 = vor.u32 %v8410_v42, %v7956_v43  ;;  %v8403_v34 = vld [vmem:[%s9395_s4 + $0x9b4] sm:$0xf0]  ;;  %v8384_v42 = vld [vmem:[%s9395_s4 + $0x924] sm:$0xf]  ;;  %v8018_v17 = vld [vmem:[%s9395_s4 + $0xa70] sm:$0xf] }
 0x367   : > { %5770 = vmatpush.bf16.msra.mxu0 %v7731_v15  ;;  %v7955_v15 = vor.u32 %v8411_v39, %v7954_v38  ;;  %v7863_v38 = vor.u32 %v8386_v31, %v7860_v33  ;;  %v5922_v33 = vperm.slane %v10188_v29, 1 }
 0x368   : > { %5783 = vmatpush.bf16.msra.mxu1 %v7735_v49  ;;  %5898 = vmatpush.bf16.msra.mxu2 %v7795_v50  ;;  %v8393_v49 = vld [vmem:[%s9395_s4 + $0x964] sm:$0xf0]  ;;  %v8392_v50 = vld [vmem:[%s9395_s4 + $0x964] sm:$0xf] }
 0x369   : > { %5911 = vmatpush.bf16.msra.mxu3 %v7799_v55  ;;  %v8409_v55 = vld [vmem:[%s9395_s4 + $0x9e4] sm:$0xf0]  ;;  %v7883_v59 = vor.u32 %v8393_v49, %v7882_v48  ;;  %v7887_v61 = vor.u32 %v8392_v50, %v7884_v53  ;;  %v8400_v49 = vld [vmem:[%s9395_s4 + $0x9a4] sm:$0xf]  ;;  %v7916_v50 = vld [vmem:[%s9395_s4 + $0x9a8] sm:$0xf0] }
 0x36a   : > { %v7947_v62 = vor.u32 %v8409_v55, %v7946_v54 }
 0x36b   : > { %5771 = vmatpush.bf16.msra.mxu0 %v7723_v1  ;;  %v8390_v1 = vld [vmem:[%s9395_s4 + $0x954] sm:$0xf] }
 0x36c   : > { %5784 = vmatpush.bf16.msra.mxu1 %v7727_v3  ;;  %5899 = vmatpush.bf16.msra.mxu2 %v7787_v4  ;;  %v7876_v3 = vld [vmem:[%s9395_s4 + $0x958] sm:$0xf0]  ;;  %v7938_v4 = vld [vmem:[%s9395_s4 + $0x9d0] sm:$0xf] }
 0x36d   : > { %5912 = vmatpush.bf16.msra.mxu3 %v7791_v10  ;;  %v7879_v10 = vor.u32 %v8390_v1, %v7876_v3  ;;  %v7939_v11 = vor.u32 %v8407_v5, %v7938_v4  ;;  %v8399_v1 = vld [vmem:[%s9395_s4 + $0x994] sm:$0xf0]  ;;  %v7908_v3 = vld [vmem:[%s9395_s4 + $0x998] sm:$0xf0]  ;;  %v7834_v5 = vld [vmem:[%s9395_s4 + $0x900] sm:$0xf] }
 0x36f   : > { %5772 = vmatpush.bf16.msra.mxu0 %v7715_v6  ;;  %v7868_v6 = vld [vmem:[%s9395_s4 + $0x948] sm:$0xf0] }
 0x370   : > { %5785 = vmatpush.bf16.msra.mxu1 %v7719_v60  ;;  %5900 = vmatpush.bf16.msra.mxu2 %v7779_v19  ;;  %v8404_v60 = vld [vmem:[%s9395_s4 + $0x9c4] sm:$0xf]  ;;  %v7932_v19 = vld [vmem:[%s9395_s4 + $0x9c8] sm:$0xf0]  ;;  %v7871_v26 = vor.u32 %v8388_v35, %v7868_v6  ;;  %v8397_v35 = vld [vmem:[%s9395_s4 + $0x984] sm:$0xf0] }
 0x371   : > { %5913 = vmatpush.bf16.msra.mxu3 %v7783_v24  ;;  %v7935_v32 = vor.u32 %v8404_v60, %v7932_v19  ;;  %v7900_v6 = vld [vmem:[%s9395_s4 + $0x988] sm:$0xf0]  ;;  %v8426_v60 = vld [vmem:[%s9395_s4 + $0xa74] sm:$0xf] }
 0x373   : > { %5773 = vmatpush.bf16.msra.mxu0 %v7707_v36  ;;  %v4769_v18 = vpop.f32.mrf.mxu0  ;;  %v8402_v36 = vld [vmem:[%s9395_s4 + $0x9b4] sm:$0xf] }
 0x374   : > { %5786 = vmatpush.bf16.msra.mxu1 %v7711_v40  ;;  %5901 = vmatpush.bf16.msra.mxu2 %v7771_v41  ;;  %v4786_v20 = vadd.f32 %v4769_v18, %v10166_v7  ;;  %v4782_v21 = vpop.f32.mrf.mxu1  ;;  %v7922_v7 = vld [vmem:[%s9395_s4 + $0x9b0] sm:$0xf]  ;;  %v7850_v40 = vld [vmem:[%s9395_s4 + $0x920] sm:$0xf]  ;;  %v8385_v41 = vld [vmem:[%s9395_s4 + $0x924] sm:$0xf0]  ;;  %v7927_v43 = vor.u32 %v8402_v36, %v7924_v37 }
 0x375   : > { %5914 = vmatpush.bf16.msra.mxu3 %v7775_v44  ;;  %v4787_v24 = vadd.f32 %v4782_v21, %v10170_v0  ;;  %v7859_v0 = vor.u32 %v8387_v30, %v7858_v28  ;;  %v7923_v39 = vor.u32 %v8403_v34, %v7922_v7  ;;  %v7851_v54 = vor.u32 %v8385_v41, %v7850_v40  ;;  %v8427_v18 = vld [vmem:[%s9395_s4 + $0xa74] sm:$0xf0]  ;;  %v8020_v21 = vld [vmem:[%s9395_s4 + $0xa78] sm:$0xf0]  ;;  %v8442_v28 = vld [vmem:[%s9395_s4 + $0xaf4] sm:$0xf] }
 0x376   : > { %5774 = vmatmul.bf16.vlgmr.msra.gmra.mxu0 %v5669_v46  ;;  %v8084_v30 = vld [vmem:[%s9395_s4 + $0xaf8] sm:$0xf0]  ;;  %v8023_v7 = vor.u32 %v8426_v60, %v8020_v21  ;;  %v8010_v36 = vld [vmem:[%s9395_s4 + $0xa60] sm:$0xf]  ;;  %v8425_v37 = vld [vmem:[%s9395_s4 + $0xa64] sm:$0xf0] }
 0x377   : > { %6019 = vmatpush.bf16.msrb.mxu0 %v7891_v45  ;;  %5787 = vmatmul.bf16.vlgmr.msra.gmra.mxu1 %v5669_v46  ;;  %v7852_v45 = vld [vmem:[%s9395_s4 + $0x928] sm:$0xf0]  ;;  %v7914_v46 = vld [vmem:[%s9395_s4 + $0x9a0] sm:$0xf]  ;;  %v8441_v41 = vld [vmem:[%s9395_s4 + $0xae4] sm:$0xf0] }
 0x378   : > { %6032 = vmatpush.bf16.msrb.mxu1 %v7895_v47  ;;  %6144 = vmatpush.bf16.msrb.mxu2 %v7955_v15  ;;  %v8401_v47 = vld [vmem:[%s9395_s4 + $0x9a4] sm:$0xf0]  ;;  %v8074_v40 = vld [vmem:[%s9395_s4 + $0xae0] sm:$0xf]  ;;  %v7988_v60 = vld [vmem:[%s9395_s4 + $0xa38] sm:$0xf0] }
 0x379   : > { %6157 = vmatpush.bf16.msrb.mxu3 %v7959_v52  ;;  %5902 = vmatmul.bf16.vlgmr.msra.gmra.mxu2 %v5797_v56  ;;  %v7915_v57 = vor.u32 %v8401_v47, %v7914_v46  ;;  %v8075_v47 = vor.u32 %v8441_v41, %v8074_v40  ;;  %v8052_v21 = vld [vmem:[%s9395_s4 + $0xab8] sm:$0xf0] }
 0x37a   : > { %5915 = vmatmul.bf16.vlgmr.msra.gmra.mxu3 %v5797_v56  ;;  %v7855_v56 = vor.u32 %v8384_v42, %v7852_v45  ;;  %v6047_v42 = vperm.slane %v10198_v12, 1  ;;  %v8011_v45 = vor.u32 %v8425_v37, %v8010_v36  ;;  %v8432_v37 = vld [vmem:[%s9395_s4 + $0xaa4] sm:$0xf] }
 0x37b   : > { %6020 = vmatpush.bf16.msrb.mxu0 %v7883_v59  ;;  %v4771_v52 = vpop.f32.mrf.mxu0  ;;  %v8383_v59 = vld [vmem:[%s9395_s4 + $0x914] sm:$0xf0] }
 0x37c   : > { %6033 = vmatpush.bf16.msrb.mxu1 %v7887_v61  ;;  %6145 = vmatpush.bf16.msrb.mxu2 %v7947_v62  ;;  %v4897_v44 = vpop.f32.mrf.mxu2  ;;  %v4784_v55 = vpop.f32.mrf.mxu1  ;;  %v8382_v61 = vld [vmem:[%s9395_s4 + $0x914] sm:$0xf]  ;;  %v7919_v62 = vor.u32 %v8400_v49, %v7916_v50  ;;  %v7843_v4 = vor.u32 %v8383_v59, %v7842_v58  ;;  %v8423_v49 = vld [vmem:[%s9395_s4 + $0xa54] sm:$0xf0]  ;;  %v8068_v58 = vld [vmem:[%s9395_s4 + $0xad8] sm:$0xf0] }
 0x37d   : > { %6158 = vmatpush.bf16.msrb.mxu3 %v7951_v2  ;;  %v10242_v15 = vadd.f32 %v4897_v44, %v4786_v20  ;;  %v4910_v48 = vpop.f32.mrf.mxu3  ;;  %v8398_v2 = vld [vmem:[%s9395_s4 + $0x994] sm:$0xf]  ;;  %v7847_v8 = vor.u32 %v8382_v61, %v7844_v63  ;;  %v7835_v20 = vor.u32 %v8381_v23, %v7834_v5  ;;  %v8076_v44 = vld [vmem:[%s9395_s4 + $0xae8] sm:$0xf0]  ;;  %v8066_v55 = vld [vmem:[%s9395_s4 + $0xad0] sm:$0xf] }
 0x37e   : > { %v10246_v53 = vadd.f32 %v4910_v48, %v4787_v24  ;;  %v7911_v13 = vor.u32 %v8398_v2, %v7908_v3  ;;  %v8443_v24 = vld [vmem:[%s9395_s4 + $0xaf4] sm:$0xf0]  ;;  %v8002_v48 = vld [vmem:[%s9395_s4 + $0xa50] sm:$0xf]  ;;  %v8422_v50 = vld [vmem:[%s9395_s4 + $0xa54] sm:$0xf] }
 0x37f   : > { %6021 = vmatpush.bf16.msrb.mxu0 %v7875_v9  ;;  %v7907_v9 = vor.u32 %v8399_v1, %v7906_v25  ;;  %v8003_v59 = vor.u32 %v8423_v49, %v8002_v48  ;;  %v7994_v63 = vld [vmem:[%s9395_s4 + $0xa40] sm:$0xf]  ;;  %v8421_v25 = vld [vmem:[%s9395_s4 + $0xa44] sm:$0xf0]  ;;  %v8420_v1 = vld [vmem:[%s9395_s4 + $0xa44] sm:$0xf] }
 0x380   : > { %6034 = vmatpush.bf16.msrb.mxu1 %v7879_v10  ;;  %6146 = vmatpush.bf16.msrb.mxu2 %v7939_v11  ;;  %v8380_v10 = vld [vmem:[%s9395_s4 + $0x904] sm:$0xf]  ;;  %v7836_v11 = vld [vmem:[%s9395_s4 + $0x908] sm:$0xf0]  ;;  %v8437_v5 = vld [vmem:[%s9395_s4 + $0xac4] sm:$0xf0] }
 0x381   : > { %6159 = vmatpush.bf16.msrb.mxu3 %v7943_v14  ;;  %v8396_v14 = vld [vmem:[%s9395_s4 + $0x984] sm:$0xf]  ;;  %v7996_v3 = vld [vmem:[%s9395_s4 + $0xa48] sm:$0xf0]  ;;  %v7972_v48 = vld [vmem:[%s9395_s4 + $0xa18] sm:$0xf0] }
 0x382   : > { %v7903_v31 = vor.u32 %v8396_v14, %v7900_v6  ;;  %v7986_v6 = vld [vmem:[%s9395_s4 + $0xa30] sm:$0xf] }
 0x383   : > { %6022 = vmatpush.bf16.msrb.mxu0 %v7867_v22  ;;  %v8082_v22 = vld [vmem:[%s9395_s4 + $0xaf0] sm:$0xf] }
 0x384   : > { %6035 = vmatpush.bf16.msrb.mxu1 %v7871_v26  ;;  %6147 = vmatpush.bf16.msrb.mxu2 %v7931_v27  ;;  %v4899_v16 = vpop.f32.mrf.mxu2  ;;  %v7839_v26 = vor.u32 %v8380_v10, %v7836_v11  ;;  %v7899_v27 = vor.u32 %v8397_v35, %v7898_v51  ;;  %v8083_v34 = vor.u32 %v8443_v24, %v8082_v22  ;;  %v8034_v49 = vld [vmem:[%s9395_s4 + $0xa90] sm:$0xf] }
 0x385   : > { %6160 = vmatpush.bf16.msrb.mxu3 %v7935_v32  ;;  %v4912_v19 = vpop.f32.mrf.mxu3  ;;  %v8019_v32 = vor.u32 %v8427_v18, %v8018_v17  ;;  %v7995_v51 = vor.u32 %v8421_v25, %v7994_v63  ;;  %v7999_v35 = vor.u32 %v8420_v1, %v7996_v3  ;;  %v8419_v16 = vld [vmem:[%s9395_s4 + $0xa34] sm:$0xf0]  ;;  %v8418_v17 = vld [vmem:[%s9395_s4 + $0xa34] sm:$0xf]  ;;  %v7964_v63 = vld [vmem:[%s9395_s4 + $0xa08] sm:$0xf0] }
 0x386   : > { %v8435_v19 = vld [vmem:[%s9395_s4 + $0xab4] sm:$0xf0]  ;;  %v7991_v22 = vor.u32 %v8418_v17, %v7988_v60  ;;  %v8026_v25 = vld [vmem:[%s9395_s4 + $0xa80] sm:$0xf]  ;;  %v8429_v1 = vld [vmem:[%s9395_s4 + $0xa84] sm:$0xf0] }
 0x387   : > { %6023 = vmatpush.bf16.msrb.mxu0 %v7859_v0  ;;  %v8424_v0 = vld [vmem:[%s9395_s4 + $0xa64] sm:$0xf] }
 0x388   : > { %6036 = vmatpush.bf16.msrb.mxu1 %v7863_v38  ;;  %6148 = vmatpush.bf16.msrb.mxu2 %v7923_v39  ;;  %v8087_v38 = vor.u32 %v8442_v28, %v8084_v30  ;;  %v8012_v39 = vld [vmem:[%s9395_s4 + $0xa68] sm:$0xf0]  ;;  %v8416_v28 = vld [vmem:[%s9395_s4 + $0xa24] sm:$0xf] }
 0x389   : > { %6161 = vmatpush.bf16.msrb.mxu3 %v7927_v43  ;;  %v8440_v43 = vld [vmem:[%s9395_s4 + $0xae4] sm:$0xf]  ;;  %v8015_v46 = vor.u32 %v8424_v0, %v8012_v39  ;;  %v8044_v0 = vld [vmem:[%s9395_s4 + $0xaa8] sm:$0xf0] }
 0x38a   : > { %v8079_v52 = vor.u32 %v8440_v43, %v8076_v44  ;;  %v7970_v44 = vld [vmem:[%s9395_s4 + $0xa10] sm:$0xf]  ;;  %v8428_v3 = vld [vmem:[%s9395_s4 + $0xa84] sm:$0xf] }
 0x38b   : > { %6024 = vmatpush.bf16.msrb.mxu0 %v7851_v54  ;;  %v8004_v54 = vld [vmem:[%s9395_s4 + $0xa58] sm:$0xf0] }
 0x38c   : > { %6037 = vmatpush.bf16.msrb.mxu1 %v7855_v56  ;;  %6149 = vmatpush.bf16.msrb.mxu2 %v7915_v57  ;;  %v8439_v56 = vld [vmem:[%s9395_s4 + $0xad4] sm:$0xf0]  ;;  %v8438_v57 = vld [vmem:[%s9395_s4 + $0xad4] sm:$0xf]  ;;  %v8007_v61 = vor.u32 %v8422_v50, %v8004_v54  ;;  %v8036_v54 = vld [vmem:[%s9395_s4 + $0xa98] sm:$0xf0] }
 0x38d   : > { %6162 = vmatpush.bf16.msrb.mxu3 %v7919_v62  ;;  %v8067_v62 = vor.u32 %v8439_v56, %v8066_v55  ;;  %v8071_v2 = vor.u32 %v8438_v57, %v8068_v58  ;;  %v8431_v50 = vld [vmem:[%s9395_s4 + $0xa94] sm:$0xf0]  ;;  %v7962_v58 = vld [vmem:[%s9395_s4 + $0xa00] sm:$0xf] }
 0x38e   : > { %v8035_v57 = vor.u32 %v8431_v50, %v8034_v49 }
 0x38f   : > { %6025 = vmatpush.bf16.msrb.mxu0 %v7843_v4  ;;  %v8058_v4 = vld [vmem:[%s9395_s4 + $0xac0] sm:$0xf] }
 0x390   : > { %6038 = vmatpush.bf16.msrb.mxu1 %v7847_v8  ;;  %6150 = vmatpush.bf16.msrb.mxu2 %v7907_v9  ;;  %v8436_v8 = vld [vmem:[%s9395_s4 + $0xac4] sm:$0xf]  ;;  %v8060_v9 = vld [vmem:[%s9395_s4 + $0xac8] sm:$0xf0]  ;;  %v8059_v14 = vor.u32 %v8437_v5, %v8058_v4 }
 0x391   : > { %6163 = vmatpush.bf16.msrb.mxu3 %v7911_v13  ;;  %v8063_v18 = vor.u32 %v8436_v8, %v8060_v9  ;;  %v8028_v4 = vld [vmem:[%s9395_s4 + $0xa88] sm:$0xf0]  ;;  %v8027_v9 = vor.u32 %v8429_v1, %v8026_v25  ;;  %v6422_v1 = vld [vmem:[#allocation3] sm:$0xff] }
 0x393   : > { %6026 = vmatpush.bf16.msrb.mxu0 %v7835_v20  ;;  %v5022_v23 = vpop.f32.mrf.mxu0  ;;  %v8434_v20 = vld [vmem:[%s9395_s4 + $0xab4] sm:$0xf] }
 0x394   : > { %6039 = vmatpush.bf16.msrb.mxu1 %v7839_v26  ;;  %6151 = vmatpush.bf16.msrb.mxu2 %v7899_v27  ;;  %v5039_v10 = vadd.f32 %v5022_v23, %v10242_v15  ;;  %v5035_v11 = vpop.f32.mrf.mxu1  ;;  %v8050_v15 = vld [vmem:[%s9395_s4 + $0xab0] sm:$0xf]  ;;  %v7978_v26 = vld [vmem:[%s9395_s4 + $0xa20] sm:$0xf]  ;;  %v8417_v27 = vld [vmem:[%s9395_s4 + $0xa24] sm:$0xf0]  ;;  %v8055_v30 = vor.u32 %v8434_v20, %v8052_v21 }
 0x395   : > { %6164 = vmatpush.bf16.msrb.mxu3 %v7903_v31  ;;  %v5040_v13 = vadd.f32 %v5035_v11, %v10246_v53  ;;  %v7987_v53 = vor.u32 %v8419_v16, %v7986_v6  ;;  %v8051_v24 = vor.u32 %v8435_v19, %v8050_v15  ;;  %v7979_v40 = vor.u32 %v8417_v27, %v7978_v26 }
 0x396   : > { %6027 = vmatmul.bf16.vlgmr.msrb.gmra.mxu0 %v5922_v33  ;;  %v6172_v11 = vperm.slane %v10188_v29, 2 }
 0x397   : > { %6269 = vmatpush.bf16.msra.mxu0 %v8019_v32  ;;  %6040 = vmatmul.bf16.vlgmr.msrb.gmra.mxu1 %v5922_v33  ;;  %v7980_v32 = vld [vmem:[%s9395_s4 + $0xa28] sm:$0xf0]  ;;  %v8042_v33 = vld [vmem:[%s9395_s4 + $0xaa0] sm:$0xf] }
 0x398   : > { %6282 = vmatpush.bf16.msra.mxu1 %v8023_v7  ;;  %6394 = vmatpush.bf16.msra.mxu2 %v8083_v34  ;;  %v8433_v7 = vld [vmem:[%s9395_s4 + $0xaa4] sm:$0xf0] }
 0x399   : > { %6407 = vmatpush.bf16.msra.mxu3 %v8087_v38  ;;  %6152 = vmatmul.bf16.vlgmr.msrb.gmra.mxu2 %v6047_v42  ;;  %v8043_v43 = vor.u32 %v8433_v7, %v8042_v33 }
 0x39a   : > { %6165 = vmatmul.bf16.vlgmr.msrb.gmra.mxu3 %v6047_v42  ;;  %v7983_v42 = vor.u32 %v8416_v28, %v7980_v32 }
 0x39b   : > { %6270 = vmatpush.bf16.msra.mxu0 %v8011_v45  ;;  %v5024_v38 = vpop.f32.mrf.mxu0  ;;  %v8415_v45 = vld [vmem:[%s9395_s4 + $0xa14] sm:$0xf0] }
 0x39c   : > { %6283 = vmatpush.bf16.msra.mxu1 %v8015_v46  ;;  %6395 = vmatpush.bf16.msra.mxu2 %v8075_v47  ;;  %v5147_v31 = vpop.f32.mrf.mxu2  ;;  %v5037_v41 = vpop.f32.mrf.mxu1  ;;  %v8414_v46 = vld [vmem:[%s9395_s4 + $0xa14] sm:$0xf]  ;;  %v8047_v47 = vor.u32 %v8432_v37, %v8044_v0  ;;  %v7971_v55 = vor.u32 %v8415_v45, %v7970_v44 }
 0x39d   : > { %6408 = vmatpush.bf16.msra.mxu3 %v8079_v52  ;;  %v5164_v34 = vadd.f32 %v5147_v31, %v5039_v10  ;;  %v5160_v36 = vpop.f32.mrf.mxu3  ;;  %v8430_v52 = vld [vmem:[%s9395_s4 + $0xa94] sm:$0xf]  ;;  %v7975_v56 = vor.u32 %v8414_v46, %v7972_v48  ;;  %v8031_v10 = vor.u32 %v8428_v3, %v8028_v4  ;;  %v6423_v4 = vld [vmem:[#allocation3 + $0x8] sm:$0xff] }
 0x39e   : > { %v5165_v39 = vadd.f32 %v5160_v36, %v5040_v13 }
 0x39f   : > { %6271 = vmatpush.bf16.msra.mxu0 %v8003_v59  ;;  %v8413_v59 = vld [vmem:[%s9395_s4 + $0xa04] sm:$0xf0] }
 0x3a0   : > { %6284 = vmatpush.bf16.msra.mxu1 %v8007_v61  ;;  %6396 = vmatpush.bf16.msra.mxu2 %v8067_v62  ;;  %v8412_v61 = vld [vmem:[%s9395_s4 + $0xa04] sm:$0xf]  ;;  %v8039_v62 = vor.u32 %v8430_v52, %v8036_v54  ;;  %v7963_v23 = vor.u32 %v8413_v59, %v7962_v58 }
 0x3a1   : > { %6409 = vmatpush.bf16.msra.mxu3 %v8071_v2  ;;  %v7967_v8 = vor.u32 %v8412_v61, %v7964_v63 }
 0x3a3   : > { %6272 = vmatpush.bf16.msra.mxu0 %v7995_v51  ;;  %v6297_v51 = vperm.slane %v10198_v12, 2 }
 0x3a4   : > { %6285 = vmatpush.bf16.msra.mxu1 %v7999_v35  ;;  %6397 = vmatpush.bf16.msra.mxu2 %v8059_v14  ;;  %v5149_v2 = vpop.f32.mrf.mxu2 }
 0x3a5   : > { %6410 = vmatpush.bf16.msra.mxu3 %v8063_v18  ;;  %v5162_v5 = vpop.f32.mrf.mxu3 }
 0x3a7   : > { %6273 = vmatpush.bf16.msra.mxu0 %v7987_v53 }
 0x3a8   : > { %6286 = vmatpush.bf16.msra.mxu1 %v7991_v22  ;;  %6398 = vmatpush.bf16.msra.mxu2 %v8051_v24 }
 0x3a9   : > { %6411 = vmatpush.bf16.msra.mxu3 %v8055_v30 }
 0x3ab   : > { %6274 = vmatpush.bf16.msra.mxu0 %v7979_v40 }
 0x3ac   : > { %6287 = vmatpush.bf16.msra.mxu1 %v7983_v42  ;;  %6399 = vmatpush.bf16.msra.mxu2 %v8043_v43 }
 0x3ad   : > { %6412 = vmatpush.bf16.msra.mxu3 %v8047_v47 }
 0x3af   : > { %6275 = vmatpush.bf16.msra.mxu0 %v7971_v55 }
 0x3b0   : > { %6288 = vmatpush.bf16.msra.mxu1 %v7975_v56  ;;  %6400 = vmatpush.bf16.msra.mxu2 %v8035_v57 }
 0x3b1   : > { %6413 = vmatpush.bf16.msra.mxu3 %v8039_v62 }
 0x3b3   : > { %6276 = vmatpush.bf16.msra.mxu0 %v7963_v23  ;;  %v5272_v13 = vpop.f32.mrf.mxu0 }
 0x3b4   : > { %6289 = vmatpush.bf16.msra.mxu1 %v7967_v8  ;;  %6401 = vmatpush.bf16.msra.mxu2 %v8027_v9  ;;  %v5289_v35 = vadd.f32 %v5272_v13, %v5164_v34  ;;  %v5285_v14 = vpop.f32.mrf.mxu1 }
 0x3b5   : > { %6414 = vmatpush.bf16.msra.mxu3 %v8031_v10  ;;  %v5290_v6 = vadd.f32 %v5285_v14, %v5165_v39 }
 0x3b6   : > { %6277 = vmatmul.bf16.vlgmr.msra.gmra.mxu0 %v6172_v11 }
 0x3b7   : > { %6290 = vmatmul.bf16.vlgmr.msra.gmra.mxu1 %v6172_v11  ;;  %6402 = vmatmul.bf16.vlgmr.msra.gmra.mxu2 %v6297_v51 }
 0x3b8   : > { %6415 = vmatmul.bf16.vlgmr.msra.gmra.mxu3 %v6297_v51 }
 0x3bb   : > { %v5274_v60 = vpop.f32.mrf.mxu0 }
 0x3bc   : > { %v5397_v16 = vpop.f32.mrf.mxu2  ;;  %v5287_v29 = vpop.f32.mrf.mxu1 }
 0x3bd   : > { %v5414_v17 = vadd.f32 %v5397_v16, %v5289_v35  ;;  %v5410_v18 = vpop.f32.mrf.mxu3 }
 0x3be   : > { %v5415_v15 = vadd.f32 %v5410_v18, %v5290_v6 }
 0x3c4   : > { %v5399_v19 = vpop.f32.mrf.mxu2 }
 0x3c5   : > { %v5412_v20 = vpop.f32.mrf.mxu3 }
 0x3d3   : > { %v5522_v12 = vpop.f32.mrf.mxu0 }
 0x3d4   : > { %v5539_v21 = vadd.f32 %v5522_v12, %v5414_v17  ;;  %v5535_v53 = vpop.f32.mrf.mxu1 }
 0x3d5   : > { %v5540_v22 = vadd.f32 %v5535_v53, %v5415_v15 }
 0x3db   : > { %v5524_v28 = vpop.f32.mrf.mxu0 }
 0x3dc   : > { %v5647_v24 = vpop.f32.mrf.mxu2  ;;  %v5537_v31 = vpop.f32.mrf.mxu1 }
 0x3dd   : > { %v5664_v26 = vadd.f32 %v5647_v24, %v5539_v21  ;;  %v5660_v27 = vpop.f32.mrf.mxu3 }
 0x3de   : > { %v5665_v30 = vadd.f32 %v5660_v27, %v5540_v22 }
 0x3e4   : > { %v5649_v32 = vpop.f32.mrf.mxu2 }
 0x3e5   : > { %v5662_v33 = vpop.f32.mrf.mxu3 }
 0x3f3   : > { %v5775_v7 = vpop.f32.mrf.mxu0 }
 0x3f4   : > { %v5788_v34 = vpop.f32.mrf.mxu1  ;;  %v5792_v49 = vadd.f32 %v5775_v7, %v5664_v26 }
 0x3f5   : > { %v5793_v50 = vadd.f32 %v5788_v34, %v5665_v30 }
 0x3fb   : > { %v5777_v0 = vpop.f32.mrf.mxu0 }
 0x3fc   : > { %v5903_v36 = vpop.f32.mrf.mxu2  ;;  %v5790_v38 = vpop.f32.mrf.mxu1 }
 0x3fd   : > { %v5916_v37 = vpop.f32.mrf.mxu3  ;;  %v5920_v52 = vadd.f32 %v5903_v36, %v5792_v49 }
 0x3fe   : > { %v5921_v55 = vadd.f32 %v5916_v37, %v5793_v50 }
 0x404   : > { %v5905_v39 = vpop.f32.mrf.mxu2 }
 0x405   : > { %v5918_v40 = vpop.f32.mrf.mxu3 }
 0x413   : > { %v6028_v41 = vpop.f32.mrf.mxu0 }
 0x414   : > { %v6041_v42 = vpop.f32.mrf.mxu1  ;;  %v6045_v57 = vadd.f32 %v6028_v41, %v5920_v52 }
 0x415   : > { %v6046_v58 = vadd.f32 %v6041_v42, %v5921_v55 }
 0x41b   : > { %v6030_v45 = vpop.f32.mrf.mxu0 }
 0x41c   : > { %v6153_v43 = vpop.f32.mrf.mxu2  ;;  %v6043_v46 = vpop.f32.mrf.mxu1 }
 0x41d   : > { %v6166_v44 = vpop.f32.mrf.mxu3  ;;  %v6170_v59 = vadd.f32 %v6153_v43, %v6045_v57 }
 0x41e   : > { %v6171_v61 = vadd.f32 %v6166_v44, %v6046_v58 }
 0x424   : > { %v6155_v47 = vpop.f32.mrf.mxu2 }
 0x425   : > { %v6168_v48 = vpop.f32.mrf.mxu3 }
 0x433   : > { %v6278_v54 = vpop.f32.mrf.mxu0 }
 0x434   : > { %v6291_v56 = vpop.f32.mrf.mxu1  ;;  %v6295_v62 = vadd.f32 %v6278_v54, %v6170_v59 }
 0x435   : > { %v6296_v63 = vadd.f32 %v6291_v56, %v6171_v61 }
 0x43a   : > { %v6403_v25 = vpop.f32.mrf.mxu2 }
 0x43b   : > { %v6420_v2 = vadd.f32 %v6403_v25, %v6295_v62  ;;  %v6416_v3 = vpop.f32.mrf.mxu3  ;;  %v6280_v5 = vpop.f32.mrf.mxu0 }
 0x43c   : > { %v6421_v23 = vadd.f32 %v6416_v3, %v6296_v63  ;;  %v6293_v8 = vpop.f32.mrf.mxu1 }
 0x43d   : > { %v6424_v9 = vadd.f32 %v6422_v1, %v6420_v2 }
 0x43e   : > { %v6425_v10 = vadd.f32 %v6423_v4, %v6421_v23 }
 0x43f   : > { %6426 = vst [vmem:[#allocation3] sm:$0xff] %v6424_v9  ;;  %6431 = sbr.rel (%p8088_p0) target bundleno = 1254 (0x4e6), region = 108 }
 0x440   : > { %6427 = vst [vmem:[#allocation3 + $0x8] sm:$0xff] %v6425_v10 }
 0x442   : > { %v6405_v11 = vpop.f32.mrf.mxu2 }
 0x443   : > { %v6418_v51 = vpop.f32.mrf.mxu3 }
 0x444   : > { %v6459_v13 = vld [vmem:[%s9387_s22 + $0x78] sm:$0xff]  ;;  %v6458_v14 = vld [vmem:[%s9387_s22 + $0x70] sm:$0xff]  ;;  %v6457_v16 = vld [vmem:[%s9387_s22 + $0x68] sm:$0xff] }
 0x445   : > { %v6475_v35 = vld [vmem:[%s9387_s22 + $0xf8] sm:$0xff]  ;;  %6476 = vmatpush.msra.mxu0 %v6459_v13  ;;  %v6474_v6 = vld [vmem:[%s9387_s22 + $0xf0] sm:$0xff]  ;;  %v6473_v17 = vld [vmem:[%s9387_s22 + $0xe8] sm:$0xff] }
 0x446   : > { %6496 = vmatpush.msra.mxu1 %v6475_v35  ;;  %v6456_v18 = vld [vmem:[%s9387_s22 + $0x60] sm:$0xff]  ;;  %v6455_v15 = vld [vmem:[%s9387_s22 + $0x58] sm:$0xff]  ;;  %v6454_v19 = vld [vmem:[%s9387_s22 + $0x50] sm:$0xff] }
 0x447   : > { %6477 = vmatpush.msra.mxu0 %v6458_v14  ;;  %v6472_v60 = vld [vmem:[%s9387_s22 + $0xe0] sm:$0xff]  ;;  %v6471_v29 = vld [vmem:[%s9387_s22 + $0xd8] sm:$0xff]  ;;  %v6470_v20 = vld [vmem:[%s9387_s22 + $0xd0] sm:$0xff] }
 0x448   : > { %6497 = vmatpush.msra.mxu1 %v6474_v6  ;;  %v6453_v12 = vld [vmem:[%s9387_s22 + $0x48] sm:$0xff]  ;;  %v6452_v53 = vld [vmem:[%s9387_s22 + $0x40] sm:$0xff]  ;;  %v6451_v24 = vld [vmem:[%s9387_s22 + $0x38] sm:$0xff] }
 0x449   : > { %6478 = vmatpush.msra.mxu0 %v6457_v16  ;;  %v6469_v21 = vld [vmem:[%s9387_s22 + $0xc8] sm:$0xff]  ;;  %v6468_v22 = vld [vmem:[%s9387_s22 + $0xc0] sm:$0xff]  ;;  %v6467_v26 = vld [vmem:[%s9387_s22 + $0xb8] sm:$0xff] }
 0x44a   : > { %6498 = vmatpush.msra.mxu1 %v6473_v17  ;;  %v6450_v27 = vld [vmem:[%s9387_s22 + $0x30] sm:$0xff]  ;;  %v6434_v30 = vld [vmem:[%s3209_s18] sm:$0x3]  ;;  %v6449_v31 = vld [vmem:[%s9387_s22 + $0x28] sm:$0xff] }
 0x44b   : > { %6479 = vmatpush.msra.mxu0 %v6456_v18  ;;  %v6466_v28 = vld [vmem:[%s9387_s22 + $0xb0] sm:$0xff]  ;;  %v6465_v32 = vld [vmem:[%s9387_s22 + $0xa8] sm:$0xff]  ;;  %v6448_v33 = vld [vmem:[%s9387_s22 + $0x20] sm:$0xff]  ;;  %v6436_v34 = vperm.slane %v6434_v30, 0  ;;  %v6437_v36 = vperm.slane %v6434_v30, 1 }
 0x44c   : > { %6499 = vmatpush.msra.mxu1 %v6472_v60  ;;  %v6464_v7 = vld [vmem:[%s9387_s22 + $0xa0] sm:$0xff]  ;;  %v6432_v37 = vld [vmem:[#allocation3] sm:$0xff]  ;;  %v6433_v0 = vld [vmem:[#allocation3 + $0x8] sm:$0xff] }
 0x44d   : > { %6480 = vmatpush.msra.mxu0 %v6455_v15  ;;  %v6447_v38 = vld [vmem:[%s9387_s22 + $0x18] sm:$0xff]  ;;  %v6446_v40 = vld [vmem:[%s9387_s22 + $0x10] sm:$0xff]  ;;  %v6440_v42 = vadd.f32 %v6436_v34, %v6432_v37  ;;  %v6441_v43 = vadd.f32 %v6437_v36, %v6433_v0  ;;  %v6445_v44 = vld [vmem:[%s9387_s22 + $0x8] sm:$0xff] }
 0x44e   : > { %6500 = vmatpush.msra.mxu1 %v6471_v29  ;;  %v6463_v39 = vld [vmem:[%s9387_s22 + $0x98] sm:$0xff]  ;;  %v6462_v41 = vld [vmem:[%s9387_s22 + $0x90] sm:$0xff]  ;;  %v6461_v45 = vld [vmem:[%s9387_s22 + $0x88] sm:$0xff] }
 0x44f   : > { %6481 = vmatpush.msra.mxu0 %v6454_v19  ;;  %v6444_v46 = vld [vmem:[%s9387_s22] sm:$0xff]  ;;  %v6442_v48 = vmax.f32 %v6440_v42, 0.0  ;;  %v6443_v49 = vmax.f32 %v6441_v43, 0.0 }
 0x450   : > { %6501 = vmatpush.msra.mxu1 %v6470_v20  ;;  %v6460_v47 = vld [vmem:[%s9387_s22 + $0x80] sm:$0xff] }
 0x451   : > { %6482 = vmatpush.msra.mxu0 %v6453_v12 }
 0x452   : > { %6502 = vmatpush.msra.mxu1 %v6469_v21 }
 0x453   : > { %6483 = vmatpush.msra.mxu0 %v6452_v53 }
 0x454   : > { %6503 = vmatpush.msra.mxu1 %v6468_v22 }
 0x455   : > { %6484 = vmatpush.msra.mxu0 %v6451_v24 }
 0x456   : > { %6504 = vmatpush.msra.mxu1 %v6467_v26 }
 0x457   : > { %6485 = vmatpush.msra.mxu0 %v6450_v27 }
 0x458   : > { %6505 = vmatpush.msra.mxu1 %v6466_v28 }
 0x459   : > { %6486 = vmatpush.msra.mxu0 %v6449_v31 }
 0x45a   : > { %6506 = vmatpush.msra.mxu1 %v6465_v32 }
 0x45b   : > { %6487 = vmatpush.msra.mxu0 %v6448_v33 }
 0x45c   : > { %6507 = vmatpush.msra.mxu1 %v6464_v7 }
 0x45d   : > { %6488 = vmatpush.msra.mxu0 %v6447_v38 }
 0x45e   : > { %6508 = vmatpush.msra.mxu1 %v6463_v39 }
 0x45f   : > { %6489 = vmatpush.msra.mxu0 %v6446_v40 }
 0x460   : > { %6509 = vmatpush.msra.mxu1 %v6462_v41 }
 0x461   : > { %6490 = vmatpush.msra.mxu0 %v6445_v44 }
 0x462   : > { %6510 = vmatpush.msra.mxu1 %v6461_v45 }
 0x463   : > { %6491 = vmatpush.msra.mxu0 %v6444_v46 }
 0x464   : > { %6511 = vmatpush.msra.mxu1 %v6460_v47  ;;  %6492 = vmatmul.f32.vlgmr.msra.gmra.mxu0 %v6442_v48 }
 0x465   : > { %6512 = vmatmul.f32.vlgmr.msra.gmra.mxu1 %v6443_v49 }
 0x4e1   : > { %v6493_v50 = vpop.f32.mrf.mxu0 }
 0x4e2   : > { %v6513_v52 = vpop.f32.mrf.mxu1 }
 0x4e3   : > { %v6514_v54 = vadd.f32 %v6513_v52, %v6493_v50 }
 0x4e5   : > { %6516 = vst [vmem:[%s9393_s11] sm:$0xff] %v6514_v54 }
 0x4e6 PF: > { %s17_s30 = sadd.s32 1, %s8561_s30   ;;  %s10404_s24 = smov %s8541_s25 }
 0x4e7   : > { %p14_p1 = scmp.ge.s32.totalorder %s17_s30, 6   ;;  %s10405_s25 = smov %s8655_s14 }
 0x4e8   : > { %s10406_s26 = smov %s8553_s28  ;;  %s10407_s27 = smov %s8557_s29 }
 0x4e9   : > { %s10408_s28 = smov %s10411_s8  ;;  %s10409_s29 = smov %s10415_s9 }
 0x4ea   :  { %16 = sbr.rel (!%p14_p1) target bundleno = 6 (0x6), region = 164 }

</bundles_post_ra>
